<compile_context>
chip_gen: v6e
topology: v6e:2x2x1
jax: 0.10.0
libtpu: 0.0.40
codegen_flags: <defaults>
</compile_context>

<pallas_src>
import functools

import numpy as np
import jax
import jax.numpy as jnp
from jax import lax
from jax.experimental import pallas as pl
from jax.experimental.pallas import tpu as pltpu


def _raymarch_kernel(*refs, wall, use_floor, feature_index, has_background,
                     P, F):
    it = iter(refs)
    L_ref = next(it)                      # (P, P)  inclusive lower-triangular
    Ls_ref = next(it)                     # (P, P)  strict lower-triangular
    E_ref = next(it)                      # (P, P*F) w[r,p] -> lane p*F+f
    S_ref = next(it)                      # (P*F, F) per-channel sum over points
    bg_ref = next(it) if has_background else None     # (1, F)
    dens_ref = next(it)                   # (TR, P)
    feat_ref = next(it)                   # (TR, P*F)  lane q = point*F + chan
    len_ref = next(it)                    # (TR, P)
    fd_ref = next(it) if use_floor else None           # (TR, 1)
    dd_ref = next(it)                     # (2, TR)  [depth; depth_prob]
    feats_ref = next(it)                  # (TR, F)
    probs_ref = next(it)                  # (P, TR)  point-major probs

    f32 = jnp.float32
    hi = lax.Precision.HIGHEST

    def mm(spec, a, b):
        return jnp.einsum(spec, a, b, preferred_element_type=f32, precision=hi)

    d = dens_ref[...].astype(f32)         # (TR, P)
    lens = len_ref[...].astype(f32)       # (TR, P)
    L = L_ref[...]
    Ls = Ls_ref[...]

    pidx = lax.broadcasted_iota(jnp.int32, d.shape, 1)     # point index (lanes)

    if wall:                              # rays_densities[..., -1, 0] = 1
        d = jnp.where(pidx == P - 1, 1.0, d)

    is_floor = None
    if use_floor:
        fd = fd_ref[...]                  # floor depth, precomputed in wrapper
        is_floor = lens > fd              # (TR, P)
        d = jnp.where(is_floor, 1.0, d)

    # probs = clamp(inclusive_cumsum, 1) - clamp(exclusive_cumsum, 1)
    # Ray-major (TR, P) copy for the weighting / reductions ("NT" contraction,
    # no transpose materialized):
    ci = mm('ri,ji->rj', d, L)            # inclusive cumsum  (TR, P)
    ce = mm('ri,ji->rj', d, Ls)           # exclusive cumsum  (TR, P)
    probs = jnp.maximum(jnp.minimum(ci, 1.0) - jnp.minimum(ce, 1.0), 0.0)

    # Point-major (P, TR) copy straight off the MXU for the lane-dense output.
    ci_t = mm('ji,ri->jr', L, d)          # (P, TR)
    ce_t = mm('ji,ri->jr', Ls, d)
    probs_t = jnp.maximum(jnp.minimum(ci_t, 1.0) - jnp.minimum(ce_t, 1.0), 0.0)

    ones_row = jnp.ones((1, P), f32)
    depth_row = mm('op,rp->or', ones_row, probs * lens)    # (1, TR) lane-major
    dprob_row = jnp.max(probs_t, axis=0, keepdims=True)    # (1, TR) sublane max

    if feature_index is not None:
        # first-occurrence argmax -> one-hot, fused into the prob weights so a
        # single weighted reduction produces the mixed features.
        dprob_col = jnp.max(probs, axis=-1, keepdims=True)  # (TR, 1)
        amax = jnp.min(jnp.where(probs == dprob_col, pidx, P),
                       axis=-1, keepdims=True)
        onehot = (pidx == amax).astype(f32)
        w = probs * (1.0 - feature_index) + onehot * feature_index
    else:
        w = probs

    feat2d = feat_ref[...].astype(f32)    # (TR, P*F)

    if has_background:
        # feature replacement decomposed so no mask expansion is needed:
        #   sum_p w*feat_eff = sum_p w*(1-m)*feat + (sum_p w*m) * background
        fmask = pidx == P - 1
        if use_floor:
            fmask = jnp.logical_or(fmask, is_floor)
        mf = fmask.astype(f32)
        wbg = jnp.sum(w * mf, axis=-1, keepdims=True)       # (TR, 1)
        w_use = w * (1.0 - mf)
    else:
        w_use = w

    w_exp = mm('rp,pq->rq', w_use, E_ref[...])              # (TR, P*F)
    feats = mm('rq,qf->rf', w_exp * feat2d, S_ref[...])     # (TR, F)
    if has_background:
        feats = feats + wbg * bg_ref[...]                   # (TR,1)*(1,F)

    dd_ref[...] = jnp.concatenate([depth_row, dprob_row], axis=0)   # (2, TR)
    feats_ref[...] = feats
    probs_ref[...] = probs_t


def _round_up(x, m):
    return ((x + m - 1) // m) * m


def _vmem_capacity_bytes():
    try:
        info = pltpu.get_tpu_info()
        cap = getattr(info, "vmem_capacity_bytes", None)
        if cap:
            return int(cap)
    except Exception:
        pass
    return 64 * 1024 * 1024          # conservative (v7x-sized) fallback


def _pick_tile_rays(R, P, F, in_itemsize, feat_itemsize, use_floor, vmem_cap):
    lane = 128
    pad = lambda n: ((n + lane - 1) // lane) * lane
    # Per ray-row VMEM bytes with lane padding (minor dims round up to 128;
    # the (·, TR) outputs round their leading dim up to 8 sublanes).
    block_row = (2 * pad(P) * in_itemsize            # densities + lengths
                 + pad(P * F) * feat_itemsize        # features (flat P*F)
                 + (pad(1) * 4 if use_floor else 0)  # floor depth column
                 + pad(F) * 4                        # (TR, F) feature output
                 + (_round_up(P, 8) + 8) * 4)        # (P,TR) probs + (2,TR) slab
    # In-kernel f32 temporaries (cumsums, probs, weights, expanded weights...)
    tmp_row = (10 * pad(P) + 3 * pad(P * F)) * 4
    per_ray = 2 * block_row + tmp_row                # x2: double-buffered blocks
    budget = min(int(0.5 * vmem_cap), 96 * 1024 * 1024)
    tr = int(budget // max(per_ray, 1))
    tr = max(128, (tr // 128) * 128)
    tr = min(tr, 1024)                               # 512-1024 ~ HBM roofline
    tr = min(tr, _round_up(R, 128))
    if R >= 2 * 128:                                 # keep >= 2 grid steps
        tr = min(tr, max(128, ((R // 2) // 128) * 128))
    if R >= 4 * 128:                                 # >= 2 steps per v7x core
        tr = min(tr, max(128, ((R // 4) // 128) * 128))
    return tr


def depth_emission_raymarch(rays_densities, rays_features, origins, directions,
                            lengths, *, voxel_size, background=None, floor=0.0,
                            wall=True, feature_index=0.5, tile_rays=None):
    """Pallas port of DepthEmissionRaymarcher.forward.

    rays_densities: (B, H, W, P, 1); rays_features: (B, H, W, P, F)
    origins / directions: (B, H, W, 3); lengths: (B, H, W, P)
    Returns (depth, features, probs_point_major, depth_probs, visible_mask);
    probs is returned point-major with shape (P, *ray_shape).
    """
    ray_shape = rays_densities.shape[:-2]
    P = int(rays_densities.shape[-2])
    F = int(rays_features.shape[-1])
    # TODO(synk): F == 0 (no feature channels) is not supported in this port.
    assert F >= 1
    R = int(np.prod(ray_shape))

    # All device-side reshapes below are free row-major views (no transposes).
    d2 = rays_densities.reshape(R, P)
    l2 = lengths.reshape(R, P)
    f2 = rays_features.reshape(R, P * F)            # lane q = point*F + channel

    use_floor = bool(floor)
    if use_floor:
        fd = (floor - origins[..., 2]) / directions[..., 2]
        fd = jnp.where(fd <= 0.0, 10000.0, fd)
        fd = fd.astype(jnp.float32).reshape(R, 1)

    has_bg = (background is not None) and (F > 0)

    in_itemsize = jnp.dtype(rays_densities.dtype).itemsize
    feat_itemsize = jnp.dtype(rays_features.dtype).itemsize
    vmem_cap = _vmem_capacity_bytes()
    if tile_rays is None:
        tile_rays = _pick_tile_rays(R, P, F, in_itemsize, feat_itemsize,
                                    use_floor, vmem_cap)
    TR = int(tile_rays)
    assert TR % 128 == 0, "tile_rays must be a multiple of 128"

    # Small constant operands, hoisted out of the body; constant index_map so
    # they are DMA'd once and stay resident.
    L = np.tril(np.ones((P, P), np.float32))             # inclusive scan
    Ls = np.tril(np.ones((P, P), np.float32), k=-1)      # exclusive scan
    q = np.arange(P * F)
    E = np.zeros((P, P * F), np.float32)
    E[q // F, q] = 1.0                                   # expand w[r,p] to lanes
    S = np.zeros((P * F, F), np.float32)
    S[q, q % F] = 1.0                                    # per-channel reduce

    consts = [jnp.asarray(L), jnp.asarray(Ls), jnp.asarray(E), jnp.asarray(S)]
    const_specs = [
        pl.BlockSpec((P, P), lambda i: (0, 0)),
        pl.BlockSpec((P, P), lambda i: (0, 0)),
        pl.BlockSpec((P, P * F), lambda i: (0, 0)),
        pl.BlockSpec((P * F, F), lambda i: (0, 0)),
    ]
    if has_bg:
        bg = np.asarray(background, np.float32).reshape(1, F)
        consts.append(jnp.asarray(bg))
        const_specs.append(pl.BlockSpec((1, F), lambda i: (0, 0)))

    big_inputs = [d2, f2, l2]
    big_specs = [
        pl.BlockSpec((TR, P), lambda i: (i, 0)),         # densities
        pl.BlockSpec((TR, P * F), lambda i: (i, 0)),     # features (native)
        pl.BlockSpec((TR, P), lambda i: (i, 0)),         # lengths
    ]
    if use_floor:
        big_inputs.append(fd)
        big_specs.append(pl.BlockSpec((TR, 1), lambda i: (i, 0)))

    kernel = functools.partial(
        _raymarch_kernel,
        wall=bool(wall),
        use_floor=use_floor,
        feature_index=(None if feature_index is None else float(feature_index)),
        has_background=has_bg,
        P=P, F=F)

    grid = (pl.cdiv(R, TR),)                             # partial tail block OK
    out_shapes = (
        jax.ShapeDtypeStruct((2, R), jnp.float32),       # [depth; depth_prob]
        jax.ShapeDtypeStruct((R, F), jnp.float32),       # rendered features
        jax.ShapeDtypeStruct((P, R), jnp.float32),       # probs, point-major
    )
    out_specs = (
        pl.BlockSpec((2, TR), lambda i: (0, i)),
        pl.BlockSpec((TR, F), lambda i: (i, 0)),
        pl.BlockSpec((P, TR), lambda i: (0, i)),
    )

    # <= 0.75 x physical VMEM: 48 MiB on v7x (headroom kept), 96 MiB on v5e/v6e.
    vmem_limit = max(32 * 1024 * 1024,
                     min(int(0.75 * vmem_cap), 112 * 1024 * 1024))

    dd, feats, probs_pm = pl.pallas_call(
        kernel,
        out_shape=out_shapes,
        grid=grid,
        in_specs=const_specs + big_specs,
        out_specs=out_specs,
        compiler_params=pltpu.CompilerParams(
            dimension_semantics=("parallel",),
            vmem_limit_bytes=vmem_limit),
    )(*consts, *big_inputs)

    depth = dd[0].reshape(ray_shape)
    dprob = dd[1].reshape(ray_shape)
    feats_out = feats.reshape(*ray_shape, F)
    probs_pm = probs_pm.reshape((P,) + tuple(ray_shape))  # point-major, free view
    # Visibility mask recomputed from the already-returned depth (kept out of
    # the kernel to avoid a full-size per-point writeback).
    vis_mask = lengths < depth[..., None] - voxel_size
    return depth, feats_out, probs_pm, dprob, vis_mask


def _reference(rays_densities, rays_features, origins, directions, lengths,
               *, voxel_size, background=None, floor=0.0, wall=True,
               feature_index=0.5):
    """Pure-JAX mirror of the PyTorch forward for verification."""
    d = rays_densities[..., 0]
    f = rays_features
    if wall:
        d = d.at[..., -1].set(1.0)
    if background is not None and f.shape[-1] > 0:
        f = f.at[..., -1, :].set(jnp.asarray(background, f.dtype))
    if floor:
        floor_depth = (floor - origins[..., 2]) / directions[..., 2]
        floor_depth = jnp.where(floor_depth <= 0, 10000.0, floor_depth)
        is_floor = lengths > floor_depth[..., None]
        d = jnp.where(is_floor, 1.0, d)
        if background is not None and f.shape[-1] > 0:
            f = jnp.where(is_floor[..., None], jnp.asarray(background, f.dtype), f)
    csum = jnp.minimum(jnp.cumsum(d, axis=-1), 1.0)
    probs = jnp.diff(csum, axis=-1,
                     prepend=jnp.zeros(d.shape[:-1] + (1,), d.dtype))
    depth = jnp.sum(probs * lengths, axis=-1)
    feats = jnp.sum(probs[..., None] * f, axis=-2)
    dprob = jnp.max(probs, axis=-1)
    if feature_index is not None:
        amax = jnp.argmax(probs, axis=-1)
        idx_feat = jnp.take_along_axis(f, amax[..., None, None], axis=-2)[..., 0, :]
        feats = feats * (1 - feature_index) + idx_feat * feature_index
    vis = lengths < depth[..., None] - voxel_size
    return depth, feats, probs, dprob, vis


if __name__ == "__main__":
    key = jax.random.PRNGKey(0)
    kd, kf, kl, ko, kdir = jax.random.split(key, 5)

    # W = 17 makes R = 272, which is not a multiple of the tile size -> the
    # partial-tail-block path (no-padding change) is exercised.
    B, H, W, P, F = 2, 8, 17, 8, 4
    rays_densities = jax.random.uniform(kd, (B, H, W, P, 1), jnp.float32) * 0.4
    rays_features = jax.random.normal(kf, (B, H, W, P, F), jnp.float32)
    lengths = jnp.cumsum(
        jax.random.uniform(kl, (B, H, W, P), jnp.float32, 0.5, 1.5), axis=-1)
    origins = jax.random.uniform(ko, (B, H, W, 3), jnp.float32, 0.5, 2.0)
    directions = jax.random.normal(kdir, (B, H, W, 3), jnp.float32)

    configs = [
        dict(voxel_size=1.0, background=None, floor=0.3, wall=True,
             feature_index=0.5),
        dict(voxel_size=0.5, background=[0.1, 0.2, 0.3, 0.4], floor=0.0,
             wall=False, feature_index=None),
    ]
    tiles = [None, 256]                 # auto-picked tile + explicit override

    for cfg, tr in zip(configs, tiles):
        depth, feats, probs_pm, dprob, vis_mask = depth_emission_raymarch(
            rays_densities, rays_features, origins, directions, lengths,
            tile_rays=tr, **cfg)
        jax.block_until_ready((depth, feats, probs_pm, dprob, vis_mask))

        # Host-side: point-major probs -> (..., P); ragged gather done on host.
        probs = np.moveaxis(np.asarray(probs_pm), 0, -1)
        visible_probs = probs[np.asarray(vis_mask)]

        r_depth, r_feats, r_probs, r_dprob, r_vis = _reference(
            rays_densities, rays_features, origins, directions, lengths, **cfg)

        np.testing.assert_allclose(np.asarray(depth), np.asarray(r_depth),
                                   rtol=1e-4, atol=1e-4)
        np.testing.assert_allclose(np.asarray(feats), np.asarray(r_feats),
                                   rtol=1e-4, atol=1e-4)
        np.testing.assert_allclose(probs, np.asarray(r_probs),
                                   rtol=1e-4, atol=1e-4)
        np.testing.assert_allclose(np.asarray(dprob), np.asarray(r_dprob),
                                   rtol=1e-4, atol=1e-4)

    print("KERNEL_OK")
</pallas_src>

<mosaic_0001>
module attributes {stable_mosaic.version = 11 : i64} {
  func.func @_raymarch_kernel(%arg0: i32, %arg1: memref<8x8xf32, #tpu.memory_space<vmem>>, %arg2: memref<8x8xf32, #tpu.memory_space<vmem>>, %arg3: memref<8x32xf32, #tpu.memory_space<vmem>>, %arg4: memref<32x4xf32, #tpu.memory_space<vmem>>, %arg5: memref<128x8xf32, #tpu.memory_space<vmem>>, %arg6: memref<128x32xf32, #tpu.memory_space<vmem>>, %arg7: memref<128x8xf32, #tpu.memory_space<vmem>>, %arg8: memref<128x1xf32, #tpu.memory_space<vmem>>, %arg9: memref<2x128xf32, #tpu.memory_space<vmem>>, %arg10: memref<128x4xf32, #tpu.memory_space<vmem>>, %arg11: memref<8x128xf32, #tpu.memory_space<vmem>>) attributes {dimension_semantics = [#tpu.dimension_semantics<parallel>], iteration_bounds = array<i64: 3>, scalar_prefetch = 0 : i64, scratch_operands = 0 : i64, tpu.core_type = #tpu.core_type<tc>, window_params = [{pipeline_mode = #tpu.pipeline_mode<synchronous>, transform_indices = @transform_0, window_bounds = array<i64: 8, 8>}, {pipeline_mode = #tpu.pipeline_mode<synchronous>, transform_indices = @transform_1, window_bounds = array<i64: 8, 8>}, {pipeline_mode = #tpu.pipeline_mode<synchronous>, transform_indices = @transform_2, window_bounds = array<i64: 8, 32>}, {pipeline_mode = #tpu.pipeline_mode<synchronous>, transform_indices = @transform_3, window_bounds = array<i64: 32, 4>}, {transform_indices = @transform_4, window_bounds = array<i64: 128, 8>}, {transform_indices = @transform_5, window_bounds = array<i64: 128, 32>}, {transform_indices = @transform_6, window_bounds = array<i64: 128, 8>}, {transform_indices = @transform_7, window_bounds = array<i64: 128, 1>}, {transform_indices = @transform_8, window_bounds = array<i64: 2, 128>}, {transform_indices = @transform_9, window_bounds = array<i64: 128, 4>}, {transform_indices = @transform_10, window_bounds = array<i64: 8, 128>}]} {
    %c0 = arith.constant 0 : index
    %c0_0 = arith.constant 0 : index
    %0 = vector.load %arg5[%c0, %c0_0] : memref<128x8xf32, #tpu.memory_space<vmem>>, vector<128x8xf32>
    %c0_1 = arith.constant 0 : index
    %c0_2 = arith.constant 0 : index
    %1 = vector.load %arg7[%c0_1, %c0_2] : memref<128x8xf32, #tpu.memory_space<vmem>>, vector<128x8xf32>
    %c0_3 = arith.constant 0 : index
    %c0_4 = arith.constant 0 : index
    %2 = vector.load %arg1[%c0_3, %c0_4] : memref<8x8xf32, #tpu.memory_space<vmem>>, vector<8x8xf32>
    %c0_5 = arith.constant 0 : index
    %c0_6 = arith.constant 0 : index
    %3 = vector.load %arg2[%c0_5, %c0_6] : memref<8x8xf32, #tpu.memory_space<vmem>>, vector<8x8xf32>
    %4 = tpu.iota {dimensions = array<i32: 1>} : vector<128x8xi32>
    %c7_i32 = arith.constant 7 : i32
    %5 = vector.broadcast %c7_i32 : i32 to vector<128x8xi32>
    %6 = arith.cmpi eq, %4, %5 : vector<128x8xi32>
    %cst = arith.constant 1.000000e+00 : f32
    %7 = vector.broadcast %cst : f32 to vector<128x8xf32>
    %8 = arith.select %6, %7, %0 : vector<128x8xi1>, vector<128x8xf32>
    %c0_7 = arith.constant 0 : index
    %c0_8 = arith.constant 0 : index
    %9 = vector.load %arg8[%c0_7, %c0_8] : memref<128x1xf32, #tpu.memory_space<vmem>>, vector<128x1xf32>
    %10 = vector.broadcast %9 : vector<128x1xf32> to vector<128x8xf32>
    %11 = arith.cmpf ogt, %1, %10 : vector<128x8xf32>
    %cst_9 = arith.constant 1.000000e+00 : f32
    %12 = vector.broadcast %cst_9 : f32 to vector<128x8xf32>
    %13 = arith.select %11, %12, %8 : vector<128x8xi1>, vector<128x8xf32>
    "tpu.trace_start"() <{level = 10 : i32, message = "ri,ji->rj"}> : () -> ()
    %cst_10 = arith.constant dense<0.000000e+00> : vector<128x8xf32>
    %14 = tpu.matmul %13, %2, %cst_10 {dimension_numbers = #tpu.dot_dimension_numbers<[1], [1], [0], [0], [0, 0, 1, 0], [], []>, precision = #tpu.contract_precision<fp32>} : vector<128x8xf32>, vector<8x8xf32>, vector<128x8xf32> -> vector<128x8xf32>
    %cst_11 = arith.constant dense<0.000000e+00> : vector<128x8xf32>
    %15 = tpu.matmul %13, %3, %cst_11 {dimension_numbers = #tpu.dot_dimension_numbers<[1], [1], [0], [0], [0, 0, 1, 0], [], []>, precision = #tpu.contract_precision<fp32>} : vector<128x8xf32>, vector<8x8xf32>, vector<128x8xf32> -> vector<128x8xf32>
    "tpu.trace_stop"() : () -> ()
    %cst_12 = arith.constant 1.000000e+00 : f32
    %16 = vector.broadcast %cst_12 : f32 to vector<128x8xf32>
    %17 = arith.minimumf %14, %16 : vector<128x8xf32>
    %cst_13 = arith.constant 1.000000e+00 : f32
    %18 = vector.broadcast %cst_13 : f32 to vector<128x8xf32>
    %19 = arith.minimumf %15, %18 : vector<128x8xf32>
    %20 = arith.subf %17, %19 : vector<128x8xf32>
    %cst_14 = arith.constant 0.000000e+00 : f32
    %21 = vector.broadcast %cst_14 : f32 to vector<128x8xf32>
    %22 = arith.maximumf %20, %21 : vector<128x8xf32>
    "tpu.trace_start"() <{level = 10 : i32, message = "ji,ri->jr"}> : () -> ()
    %cst_15 = arith.constant dense<0.000000e+00> : vector<8x128xf32>
    %23 = tpu.matmul %2, %13, %cst_15 {dimension_numbers = #tpu.dot_dimension_numbers<[1], [1], [0], [0], [0, 0, 1, 0], [], []>, precision = #tpu.contract_precision<fp32>} : vector<8x8xf32>, vector<128x8xf32>, vector<8x128xf32> -> vector<8x128xf32>
    %cst_16 = arith.constant dense<0.000000e+00> : vector<8x128xf32>
    %24 = tpu.matmul %3, %13, %cst_16 {dimension_numbers = #tpu.dot_dimension_numbers<[1], [1], [0], [0], [0, 0, 1, 0], [], []>, precision = #tpu.contract_precision<fp32>} : vector<8x8xf32>, vector<128x8xf32>, vector<8x128xf32> -> vector<8x128xf32>
    "tpu.trace_stop"() : () -> ()
    %cst_17 = arith.constant 1.000000e+00 : f32
    %25 = vector.broadcast %cst_17 : f32 to vector<8x128xf32>
    %26 = arith.minimumf %23, %25 : vector<8x128xf32>
    %cst_18 = arith.constant 1.000000e+00 : f32
    %27 = vector.broadcast %cst_18 : f32 to vector<8x128xf32>
    %28 = arith.minimumf %24, %27 : vector<8x128xf32>
    %29 = arith.subf %26, %28 : vector<8x128xf32>
    %cst_19 = arith.constant 0.000000e+00 : f32
    %30 = vector.broadcast %cst_19 : f32 to vector<8x128xf32>
    %31 = arith.maximumf %29, %30 : vector<8x128xf32>
    %cst_20 = arith.constant 1.000000e+00 : f32
    %32 = vector.broadcast %cst_20 : f32 to vector<1x8xf32>
    %33 = arith.mulf %22, %1 : vector<128x8xf32>
    "tpu.trace_start"() <{level = 10 : i32, message = "op,rp->or"}> : () -> ()
    %cst_21 = arith.constant dense<0.000000e+00> : vector<1x128xf32>
    %34 = tpu.matmul %32, %33, %cst_21 {dimension_numbers = #tpu.dot_dimension_numbers<[1], [1], [0], [0], [0, 0, 1, 0], [], []>, precision = #tpu.contract_precision<fp32>} : vector<1x8xf32>, vector<128x8xf32>, vector<1x128xf32> -> vector<1x128xf32>
    "tpu.trace_stop"() : () -> ()
    %cst_22 = arith.constant dense<0xFF800000> : vector<128xf32>
    %35 = vector.multi_reduction <maximumf>, %31, %cst_22 [0] : vector<8x128xf32> to vector<128xf32>
    %36 = vector.shape_cast %35 : vector<128xf32> to vector<1x128xf32>
    %cst_23 = arith.constant dense<0xFF800000> : vector<128xf32>
    %37 = vector.multi_reduction <maximumf>, %22, %cst_23 [1] : vector<128x8xf32> to vector<128xf32>
    %38 = vector.shape_cast %37 : vector<128xf32> to vector<128x1xf32>
    %39 = vector.broadcast %38 : vector<128x1xf32> to vector<128x8xf32>
    %40 = arith.cmpf oeq, %22, %39 : vector<128x8xf32>
    %c8_i32 = arith.constant 8 : i32
    %41 = vector.broadcast %c8_i32 : i32 to vector<128x8xi32>
    %42 = arith.select %40, %4, %41 : vector<128x8xi1>, vector<128x8xi32>
    %cst_24 = arith.constant dense<2147483647> : vector<128xi32>
    %43 = vector.multi_reduction <minsi>, %42, %cst_24 [1] : vector<128x8xi32> to vector<128xi32>
    %44 = vector.shape_cast %43 : vector<128xi32> to vector<128x1xi32>
    %45 = vector.broadcast %44 : vector<128x1xi32> to vector<128x8xi32>
    %46 = arith.cmpi eq, %4, %45 : vector<128x8xi32>
    %47 = arith.extui %46 : vector<128x8xi1> to vector<128x8xi32>
    %48 = arith.sitofp %47 : vector<128x8xi32> to vector<128x8xf32>
    %cst_25 = arith.constant 5.000000e-01 : f32
    %49 = vector.broadcast %cst_25 : f32 to vector<128x8xf32>
    %50 = arith.mulf %22, %49 : vector<128x8xf32>
    %cst_26 = arith.constant 5.000000e-01 : f32
    %51 = vector.broadcast %cst_26 : f32 to vector<128x8xf32>
    %52 = arith.mulf %48, %51 : vector<128x8xf32>
    %53 = arith.addf %50, %52 : vector<128x8xf32>
    %c0_27 = arith.constant 0 : index
    %c0_28 = arith.constant 0 : index
    %54 = vector.load %arg6[%c0_27, %c0_28] : memref<128x32xf32, #tpu.memory_space<vmem>>, vector<128x32xf32>
    %c0_29 = arith.constant 0 : index
    %c0_30 = arith.constant 0 : index
    %55 = vector.load %arg3[%c0_29, %c0_30] : memref<8x32xf32, #tpu.memory_space<vmem>>, vector<8x32xf32>
    "tpu.trace_start"() <{level = 10 : i32, message = "rp,pq->rq"}> : () -> ()
    %cst_31 = arith.constant dense<0.000000e+00> : vector<128x32xf32>
    %56 = tpu.matmul %53, %55, %cst_31 {dimension_numbers = #tpu.dot_dimension_numbers<[1], [0], [0], [1], [0, 0, 1, 1], [], []>, precision = #tpu.contract_precision<fp32>} : vector<128x8xf32>, vector<8x32xf32>, vector<128x32xf32> -> vector<128x32xf32>
    "tpu.trace_stop"() : () -> ()
    %57 = arith.mulf %56, %54 : vector<128x32xf32>
    %c0_32 = arith.constant 0 : index
    %c0_33 = arith.constant 0 : index
    %58 = vector.load %arg4[%c0_32, %c0_33] : memref<32x4xf32, #tpu.memory_space<vmem>>, vector<32x4xf32>
    "tpu.trace_start"() <{level = 10 : i32, message = "rq,qf->rf"}> : () -> ()
    %cst_34 = arith.constant dense<0.000000e+00> : vector<128x4xf32>
    %59 = tpu.matmul %57, %58, %cst_34 {dimension_numbers = #tpu.dot_dimension_numbers<[1], [0], [0], [1], [0, 0, 1, 1], [], []>, precision = #tpu.contract_precision<fp32>} : vector<128x32xf32>, vector<32x4xf32>, vector<128x4xf32> -> vector<128x4xf32>
    "tpu.trace_stop"() : () -> ()
    %60 = tpu.concatenate %34, %36 in 0 : vector<1x128xf32>, vector<1x128xf32> -> vector<2x128xf32>
    %c0_35 = arith.constant 0 : index
    %c0_36 = arith.constant 0 : index
    %61 = vector.load %arg9[%c0_35, %c0_36] : memref<2x128xf32, #tpu.memory_space<vmem>>, vector<2x128xf32>
    tpu.vector_store %arg9[%c0_35, %c0_36], %60 {strides = array<i32>} : memref<2x128xf32, #tpu.memory_space<vmem>>, vector<2x128xf32>,
    %c0_37 = arith.constant 0 : index
    %c0_38 = arith.constant 0 : index
    %62 = vector.load %arg10[%c0_37, %c0_38] : memref<128x4xf32, #tpu.memory_space<vmem>>, vector<128x4xf32>
    tpu.vector_store %arg10[%c0_37, %c0_38], %59 {strides = array<i32>} : memref<128x4xf32, #tpu.memory_space<vmem>>, vector<128x4xf32>,
    %c0_39 = arith.constant 0 : index
    %c0_40 = arith.constant 0 : index
    %63 = vector.load %arg11[%c0_39, %c0_40] : memref<8x128xf32, #tpu.memory_space<vmem>>, vector<8x128xf32>
    tpu.vector_store %arg11[%c0_39, %c0_40], %31 {strides = array<i32>} : memref<8x128xf32, #tpu.memory_space<vmem>>, vector<8x128xf32>,
    return
  }
  func.func @transform_0(%arg0: i32) -> (i32, i32) {
    %c0_i32 = arith.constant 0 : i32
    %c0_i32_0 = arith.constant 0 : i32
    %c0_i32_1 = arith.constant 0 : i32
    return %c0_i32, %c0_i32_0 : i32, i32
  }
  func.func @transform_1(%arg0: i32) -> (i32, i32) {
    %c0_i32 = arith.constant 0 : i32
    %c0_i32_0 = arith.constant 0 : i32
    %c0_i32_1 = arith.constant 0 : i32
    return %c0_i32, %c0_i32_0 : i32, i32
  }
  func.func @transform_2(%arg0: i32) -> (i32, i32) {
    %c0_i32 = arith.constant 0 : i32
    %c0_i32_0 = arith.constant 0 : i32
    %c0_i32_1 = arith.constant 0 : i32
    return %c0_i32, %c0_i32_0 : i32, i32
  }
  func.func @transform_3(%arg0: i32) -> (i32, i32) {
    %c0_i32 = arith.constant 0 : i32
    %c0_i32_0 = arith.constant 0 : i32
    %c0_i32_1 = arith.constant 0 : i32
    return %c0_i32, %c0_i32_0 : i32, i32
  }
  func.func @transform_4(%arg0: i32) -> (i32, i32) {
    %c0_i32 = arith.constant 0 : i32
    %c0_i32_0 = arith.constant 0 : i32
    return %arg0, %c0_i32 : i32, i32
  }
  func.func @transform_5(%arg0: i32) -> (i32, i32) {
    %c0_i32 = arith.constant 0 : i32
    %c0_i32_0 = arith.constant 0 : i32
    return %arg0, %c0_i32 : i32, i32
  }
  func.func @transform_6(%arg0: i32) -> (i32, i32) {
    %c0_i32 = arith.constant 0 : i32
    %c0_i32_0 = arith.constant 0 : i32
    return %arg0, %c0_i32 : i32, i32
  }
  func.func @transform_7(%arg0: i32) -> (i32, i32) {
    %c0_i32 = arith.constant 0 : i32
    %c0_i32_0 = arith.constant 0 : i32
    return %arg0, %c0_i32 : i32, i32
  }
  func.func @transform_8(%arg0: i32) -> (i32, i32) {
    %c0_i32 = arith.constant 0 : i32
    %c0_i32_0 = arith.constant 0 : i32
    return %c0_i32, %arg0 : i32, i32
  }
  func.func @transform_9(%arg0: i32) -> (i32, i32) {
    %c0_i32 = arith.constant 0 : i32
    %c0_i32_0 = arith.constant 0 : i32
    return %arg0, %c0_i32 : i32, i32
  }
  func.func @transform_10(%arg0: i32) -> (i32, i32) {
    %c0_i32 = arith.constant 0 : i32
    %c0_i32_0 = arith.constant 0 : i32
    return %c0_i32, %arg0 : i32, i32
  }
}

</mosaic_0001>

<bundles_post_ra>
// kernel: tpu_custom_call.1
= control target key start
LH: loop header
LB: loop body
LE: loop exit
PB: predicated region body
PF: predicated region fallthrough
CT: control target
= control target key end

     0   :  { %s14164_s0 = inlined_call_operand.vmem [shape: f32[8,8], index: 0, kind: input, shape index: {}]   ;;  %s14165_s1 = inlined_call_operand.vmem [shape: f32[8,8], index: 1, kind: input, shape index: {}]   ;;  %s14166_s2 = inlined_call_operand.vmem [shape: f32[8,32], index: 2, kind: input, shape index: {}]   ;;  %s14167_s3 = inlined_call_operand.vmem [shape: f32[32,4], index: 3, kind: input, shape index: {}]   ;;  %s14168_s4 = inlined_call_operand.vmem [shape: f32[272,8], index: 4, kind: input, shape index: {}]   ;;  %s14169_s5 = inlined_call_operand.vmem [shape: f32[272,32], index: 5, kind: input, shape index: {}]   ;;  %s14170_s6 = inlined_call_operand.vmem [shape: f32[272,8], index: 6, kind: input, shape index: {}]   ;;  %s14171_s7 = inlined_call_operand.vmem [shape: f32[272,1], index: 7, kind: input, shape index: {}]   ;;  %s14172_s8 = inlined_call_operand.hbm [shape: f32[2,272], index: 8, kind: output, shape index: {0}]   ;;  %s14173_s9 = inlined_call_operand.vmem [shape: f32[272,4], index: 9, kind: output, shape index: {1}]   ;;  %s14174_s10 = inlined_call_operand.hbm [shape: f32[8,272], index: 10, kind: output, shape index: {2}]  }
   0x1   :  { %14364 = sst [smem:[#allocation141_spill]] %s14164_s0 }
   0x2   :  { %14365 = sst [smem:[#allocation142_spill]] %s14165_s1 }
   0x3   :  { %14366 = sst [smem:[#allocation143_spill]] %s14166_s2 }
   0x4   :  { %14367 = sst [smem:[#allocation144_spill]] %s14167_s3 }
   0x5   :  { %14368 = sst [smem:[#allocation145_spill]] %s14168_s4 }
   0x6   :  { %14369 = sst [smem:[#allocation146_spill]] %s14169_s5 }
   0x7   :  { %14370 = sst [smem:[#allocation147_spill]] %s14170_s6 }
   0x8   :  { %16 = vsyncpa [#allocation3], 0 }
   0x9   :  { %18 = vsyncpa [#allocation3 + $0x1], 0 }
   0xa   :  { %19 = vsyncpa [#allocation6], 0 }
   0xb   :  { %21 = vsyncpa [#allocation6 + $0x1], 0  ;;  %s10641_s13 = smov 0   ;;  %s10643_s14 = smov 0  }
   0xc   :  { %s10645_s15 = smov 0   ;;  %s10647_s16 = smov 0  }
   0xd LB: > { %s10662_s17 = sadd.s32 4294967295, %s10546_s16   ;;  %s8214_s18 = sadd.s32 4294967294, %s10546_s16   ;;  %s10546_s16 = sphi %s10647_s16, %s14850_s16   ;;  %s10542_s15 = sphi %s10645_s15, %s14849_s15   ;;  %s10538_s14 = sphi %s10643_s14, %s14848_s14   ;;  %s10534_s13 = sphi %s10641_s13, %s14847_s13  }
   0xe   : > { %s10666_s19 = sadd.s32 1, %s10546_s16   ;;  %s222_s20 = sadd.s32 1, %s10542_s15 }
   0xf   : > { %s219_s21 = ssub.s32 %s10546_s16, %s10666_s19  ;;  %p232_p0 = scmp.ne.s32.totalorder %s10542_s15, %s10538_s14 }
  0x10   : > { %p220_p1 = scmp.eq.s32.totalorder %s219_s21, 0  ;;  %p233_p2 = scmp.eq.s32.totalorder %s10662_s17, 2 }
  0x11   : > { %p238_p3 = scmp.ne.s32.totalorder %s10538_s14, %s10534_s13  ;;  %p239_p4 = scmp.eq.s32.totalorder %s8214_s18, 2 }
  0x12   : > { %s10677_s22 = scalar_select %p220_p1, %s10542_s15, %s222_s20  }
  0x13   : > { %p10679_p5 = por %p233_p2, %p232_p0  ;;  %p10683_p6 = por %p239_p4, %p238_p3 }
  0x14   : > { %p8217_p7 = scmp.ge.s32.totalorder %s10546_s16, 1  ;;  %p389_p8 = scmp.lt.s32.totalorder %s10546_s16, 4 }
  0x16   : > { %p390_p9 = pnand %p8217_p7, %p389_p8 }
  0x18   : > { %393 = sbr.rel (%p390_p9) target bundleno = 1645 (0x66d), region = 52 }
  0x1d   : > { %vm709_vm0 = vcmask 64512   ;;  %s10690_s25 = sshll.u32 %s10662_s17, 4  ;;  %s14373_s0 = sld [smem:[#allocation141_spill]]  ;;  %v14175_v1 = vmov 0   ;;  %v562_v24 = vlaneseq }
  0x1e   : > { %10407 = vset.pattern.permute.xlu1 %v14175_v1  ;;  %10406 = vset.pattern.permute.xlu0 %v14175_v1  ;;  %p472_p10 = scmp.lt.s32.totalorder %s10690_s25, 33  ;;  %s14379_s4 = sld [smem:[#allocation145_spill]] }
  0x1f   : > { %v10742_v25 = vand.u32 127, %v562_v24  ;;  %s14380_s6 = sld [smem:[#allocation147_spill]] }
  0x20   : > { %s473_s28 = scalar_select %p472_p10, %s10690_s25, 33 }
  0x21   : > { %14378 = vst [vmem:[#allocation13_spill] sm:$0xff] %v10742_v25  ;;  %vm564_vm1 = vcmp.eq.s32.totalorder %v10742_v25, 7  ;;  %s14381_s1 = sld [smem:[#allocation142_spill]] }
  0x22   : > { %s10706_s29 = sshll.u32 %s473_s28, 3  ;;  %s14735_s2 = sld [smem:[#allocation143_spill]] }
  0x23   : > { %v560_v0 = vld [vmem:[%s14373_s0] sm:$0xff]  ;;  %s10713_s12 = scalar_lea.vmem %s14171_s7, %s10706_s29  ;;  %s14763_s3 = sld [smem:[#allocation144_spill]] }
  0x24   : > { %v759_v2 = vsel %vm709_vm0, %v560_v0, 0  ;;  %v583_v6 = vld [vmem:[%s10713_s12 + $0x10] sm:$0xff]  ;;  %v581_v7 = vld [vmem:[%s10713_s12] sm:$0xff]  ;;  %v584_v9 = vld [vmem:[%s10713_s12 + $0x18] sm:$0xff]  ;;  %s10748_s21 = scalar_lea.vmem %s14379_s4, %s10706_s29  ;;  %s14787_s5 = sld [smem:[#allocation146_spill]] }
  0x25   : > { %v10699_v3 = vand.u32 4294901760, %v759_v2  ;;  %609 = vperm.xlu1 %10407, %v583_v6   ;;  %599 = vperm.xlu0 %10406, %v581_v7   ;;  %v582_v10 = vld [vmem:[%s10713_s12 + $0x8] sm:$0xff]  ;;  %v585_v13 = vld [vmem:[%s10713_s12 + $0x20] sm:$0xff]  ;;  %v588_v14 = vld [vmem:[%s10713_s12 + $0x38] sm:$0xff]  ;;  %s10754_s28 = scalar_lea.vmem %s14380_s6, %s10706_s29  ;;  %s10584_s0 = smov [#allocation2]  }
  0x26   : > { %v586_v12 = vld [vmem:[%s10713_s12 + $0x28] sm:$0xff]  ;;  %v587_v15 = vld [vmem:[%s10713_s12 + $0x30] sm:$0xff]  ;;  %v589_v17 = vld [vmem:[%s10713_s12 + $0x40] sm:$0xff] }
  0x27   : > { %14374 = vst [vmem:[#allocation9_spill] sm:$0xff] %v10699_v3  ;;  %v10703_v4 = vsub.f32 %v759_v2, %v10699_v3  ;;  %9004 = vmatprep.subr.mxu0 %v10699_v3  ;;  %v590_v16 = vld [vmem:[%s10713_s12 + $0x48] sm:$0xff]  ;;  %v592_v18 = vld [vmem:[%s10713_s12 + $0x58] sm:$0xff]  ;;  %v591_v19 = vld [vmem:[%s10713_s12 + $0x50] sm:$0xff] }
  0x28   : > { %9005 = vmatpush3.xpose.msra.mxu0 %v10699_v3  ;;  %v594_v20 = vld [vmem:[%s10713_s12 + $0x68] sm:$0xff]  ;;  %v593_v21 = vld [vmem:[%s10713_s12 + $0x60] sm:$0xff]  ;;  %v596_v22 = vld [vmem:[%s10713_s12 + $0x78] sm:$0xff] }
  0x29   : > { %14375 = vst [vmem:[#allocation10_spill] sm:$0xff] %v10703_v4  ;;  %v10716_v5 = vand.u32 4294901760, %v10703_v4  ;;  %9056 = vmatprep.subr.mxu0 %v10703_v4  ;;  %614 = vperm.xlu1 %10407, %v584_v9   ;;  %v595_v23 = vld [vmem:[%s10713_s12 + $0x70] sm:$0xff]  ;;  %v528_v27 = vld [vmem:[%s10748_s21] sm:$0xff]  ;;  %v531_v29 = vld [vmem:[%s10748_s21 + $0x18] sm:$0xff]  ;;  %s12707_s12 = sand.u32 1, %s10538_s14  }
  0x2a   : > { %604 = vperm.xlu0 %10406, %v582_v10   ;;  %v530_v26 = vld [vmem:[%s10748_s21 + $0x10] sm:$0xff]  ;;  %v529_v30 = vld [vmem:[%s10748_s21 + $0x8] sm:$0xff]  ;;  %v544_v31 = vld [vmem:[%s10754_s28] sm:$0xff]  ;;  %v565_v35 = vsel %vm564_vm1, 1.0, %v528_v27  ;;  %v568_v41 = vsel %vm564_vm1, 1.0, %v531_v29  ;;  %s8218_s27 = sshll.u32 %s12707_s12, 1 }
  0x2b   : > { %14376 = vst [vmem:[#allocation11_spill] sm:$0xff] %v10716_v5  ;;  %v1021_v8 = vsub.f32 %v10703_v4, %v10716_v5  ;;  %v546_v28 = vld [vmem:[%s10754_s28 + $0x10] sm:$0xff]  ;;  %v533_v32 = vld [vmem:[%s10748_s21 + $0x28] sm:$0xff]  ;;  %v532_v33 = vld [vmem:[%s10748_s21 + $0x20] sm:$0xff]  ;;  %v567_v34 = vsel %vm564_vm1, 1.0, %v530_v26  ;;  %v566_v42 = vsel %vm564_vm1, 1.0, %v529_v30 }
  0x2c   : > { %v535_v36 = vld [vmem:[%s10748_s21 + $0x38] sm:$0xff]  ;;  %v534_v37 = vld [vmem:[%s10748_s21 + $0x30] sm:$0xff]  ;;  %v537_v43 = vld [vmem:[%s10748_s21 + $0x48] sm:$0xff]  ;;  %v570_v46 = vsel %vm564_vm1, 1.0, %v533_v32  ;;  %v569_v47 = vsel %vm564_vm1, 1.0, %v532_v33  ;;  %s7803_s20 = scalar_lea.sflag [#allocation3], %s12707_s12 }
  0x2d   : > { %v10725_v11 = vand.u32 4294901760, %v1021_v8  ;;  %624 = vperm.xlu1 %10407, %v586_v12   ;;  %v547_v40 = vld [vmem:[%s10754_s28 + $0x18] sm:$0xff]  ;;  %v536_v44 = vld [vmem:[%s10748_s21 + $0x40] sm:$0xff]  ;;  %v545_v45 = vld [vmem:[%s10754_s28 + $0x8] sm:$0xff]  ;;  %v10787_v52 = vsel %vm564_vm1, 1.0, %v535_v36  ;;  %v10791_v53 = vsel %vm564_vm1, 1.0, %v534_v37 }
  0x2e   : > { %619 = vperm.xlu0 %10406, %v585_v13   ;;  %v539_v48 = vld [vmem:[%s10748_s21 + $0x58] sm:$0xff]  ;;  %v538_v49 = vld [vmem:[%s10748_s21 + $0x50] sm:$0xff]  ;;  %v541_v54 = vld [vmem:[%s10748_s21 + $0x68] sm:$0xff]  ;;  %v10801_v58 = vsel %vm564_vm1, 1.0, %v537_v43  ;;  %v10805_v59 = vsel %vm564_vm1, 1.0, %v536_v44 }
  0x2f   : > { %14377 = vst [vmem:[#allocation12_spill] sm:$0xff] %v10725_v11  ;;  %9030 = vmatprep.subr.mxu1 %v10725_v11  ;;  %v561_v55 = vld [vmem:[%s14381_s1] sm:$0xff]  ;;  %v10813_v0 = vsel %vm564_vm1, 1.0, %v539_v48  ;;  %v10817_v2 = vsel %vm564_vm1, 1.0, %v538_v49  ;;  %v543_v7 = vld [vmem:[%s10748_s21 + $0x78] sm:$0xff]  ;;  %v10823_v8 = vsel %vm564_vm1, 1.0, %v541_v54 }
  0x30   : > { %9031 = vmatpush3.xpose.msra.mxu1 %v10725_v11  ;;  %v540_v6 = vld [vmem:[%s10748_s21 + $0x60] sm:$0xff]  ;;  %v1853_v9 = vsel %vm709_vm0, %v561_v55, 0  ;;  %v550_v36 = vld [vmem:[%s10754_s28 + $0x30] sm:$0xff]  ;;  %v553_v55 = vld [vmem:[%s10754_s28 + $0x48] sm:$0xff]  ;;  %s10428_s1 = sshll.u32 %s10584_s0, 4  ;;  %s10429_s1 = int_to_ptr.vmem [resolvable:$false] %s10428_s1 }
  0x31   : > { %9082 = vmatprep.subr.mxu1 %v10699_v3  ;;  %634 = vperm.xlu1 %10407, %v588_v14   ;;  %v10860_v30 = vand.u32 4294901760, %v1853_v9  ;;  %v559_v1 = vld [vmem:[%s10754_s28 + $0x78] sm:$0xff]  ;;  %v558_v25 = vld [vmem:[%s10754_s28 + $0x70] sm:$0xff] }
  0x32   : > { %629 = vperm.xlu0 %10406, %v587_v15   ;;  %v549_v15 = vld [vmem:[%s10754_s28 + $0x28] sm:$0xff] }
  0x33   : > { %14390 = vst [vmem:[#allocation22_spill] sm:$0xff] %v10860_v30  ;;  %v10893_v48 = vsub.f32 %v1853_v9, %v10860_v30 }
  0x35   : > { %644 = vperm.xlu1 %10407, %v590_v16   ;;  %v548_v16 = vld [vmem:[%s10754_s28 + $0x20] sm:$0xff]  ;;  %14398 = vst [vmem:[#allocation30_spill] sm:$0xff] %v10893_v48 }
  0x36   : > { %639 = vperm.xlu0 %10406, %v589_v17   ;;  %v542_v17 = vld [vmem:[%s10748_s21 + $0x70] sm:$0xff]  ;;  %s8220_s21 = sshll.u32 %s12707_s12, 3 }
  0x37   : > { %v10858_v29 = vsel %vm564_vm1, 1.0, %v542_v17  ;;  %s12947_s26 = scalar_lea.vmem [#allocation5], %s8220_s21  ;;  %s13488_s21 = scalar_lea.vmem %s14787_s5, %s10706_s29 }
  0x38   : > { %s8251_s29 = sshll.u32 %s10662_s17, 5 }
  0x39   : > { %654 = vperm.xlu1 %10407, %v592_v18   ;;  %s7823_s11 = scalar_lea.hbm %s14172_s8, %s8251_s29 }
  0x3a   : > { %649 = vperm.xlu0 %10406, %v591_v19  }
  0x3d   : > { %664 = vperm.xlu1 %10407, %v594_v20   ;;  %v10840_v20 = vsel %vm564_vm1, 1.0, %v540_v6 }
  0x3e   : > { %659 = vperm.xlu0 %10406, %v593_v21   ;;  %v10844_v21 = vsel %vm564_vm1, 1.0, %v543_v7 }
  0x41   : > { %674 = vperm.xlu1 %10407, %v596_v22  }
  0x42   : > { %669 = vperm.xlu0 %10406, %v595_v23  }
  0xa0   : > { %v610_v38 = vpop.permute.xlu1 %609  ;;  %v600_v39 = vpop.permute.xlu0 %599 }
  0xa1   : > { %vm679_vm2 = vcmp.gt.f32.partialorder %v546_v28, %v610_v38  ;;  %vm677_vm3 = vcmp.gt.f32.partialorder %v544_v31, %v600_v39 }
  0xa2   : > { %v695_v50 = vsel %vm679_vm2, 1.0, %v567_v34  ;;  %v693_v51 = vsel %vm677_vm3, 1.0, %v565_v35  ;;  %v551_v35 = vld [vmem:[%s10754_s28 + $0x38] sm:$0xff]  ;;  %vm10582_vm3 = vmmov 0  }
  0xa3   : > { %v717_v56 = vsel %vm709_vm0, %v695_v50, 0  ;;  %v711_v57 = vsel %vm709_vm0, %v693_v51, 0 }
  0xa4   : > { %v10807_v60 = vand.u32 4294901760, %v717_v56  ;;  %v10809_v61 = vand.u32 4294901760, %v711_v57  ;;  %v615_v62 = vpop.permute.xlu1 %614 }
  0xa5   : > { %v605_v63 = vpop.permute.xlu0 %604  ;;  %vm680_vm4 = vcmp.gt.f32.partialorder %v547_v40, %v615_v62 }
  0xa6   : > { %14382 = vst [vmem:[#allocation14_spill] sm:$0xff] %v10807_v60  ;;  %14383 = vst [vmem:[#allocation15_spill] sm:$0xff] %v10809_v61  ;;  %vm678_vm5 = vcmp.gt.f32.partialorder %v545_v45, %v605_v63  ;;  %v10827_v10 = vsub.f32 %v717_v56, %v10807_v60  ;;  %v10830_v12 = vsub.f32 %v711_v57, %v10809_v61  ;;  %v696_v13 = vsel %vm680_vm4, 1.0, %v568_v41  ;;  %v552_v56 = vld [vmem:[%s10754_s28 + $0x40] sm:$0xff] }
  0xa7   : > { %v694_v14 = vsel %vm678_vm5, 1.0, %v566_v42  ;;  %9032 = vmatprep.mubr.f32.mxu1 %v10809_v61  ;;  %v720_v18 = vsel %vm709_vm0, %v696_v13, 0 }
  0xa8   : > { %14384 = vst [vmem:[#allocation16_spill] sm:$0xff] %v10827_v10  ;;  %14385 = vst [vmem:[#allocation17_spill] sm:$0xff] %v10830_v12  ;;  %v714_v19 = vsel %vm709_vm0, %v694_v14, 0  ;;  %v10846_v22 = vand.u32 4294901760, %v720_v18  ;;  %v625_v24 = vpop.permute.xlu1 %624  ;;  %v10851_v27 = vand.u32 4294901760, %v10830_v12  ;;  %v10854_v28 = vand.u32 4294901760, %v10827_v10 }
  0xa9   : > { %v10848_v23 = vand.u32 4294901760, %v714_v19  ;;  %v620_v26 = vpop.permute.xlu0 %619  ;;  %vm682_vm6 = vcmp.gt.f32.partialorder %v549_v15, %v625_v24 }
  0xaa   : > { %14386 = vst [vmem:[#allocation18_spill] sm:$0xff] %v10846_v22  ;;  %14388 = vst [vmem:[#allocation20_spill] sm:$0xff] %v10851_v27  ;;  %vm681_vm7 = vcmp.gt.f32.partialorder %v548_v16, %v620_v26  ;;  %v10863_v31 = vsub.f32 %v720_v18, %v10846_v22  ;;  %v698_v33 = vsel %vm682_vm6, 1.0, %v570_v46  ;;  %v830_v39 = vsub.f32 %v10830_v12, %v10851_v27  ;;  %v555_v26 = vld [vmem:[%s10754_s28 + $0x58] sm:$0xff] }
  0xab   : > { %14387 = vst [vmem:[#allocation19_spill] sm:$0xff] %v10848_v23  ;;  %14389 = vst [vmem:[#allocation21_spill] sm:$0xff] %v10854_v28  ;;  %v10866_v32 = vsub.f32 %v714_v19, %v10848_v23  ;;  %v697_v34 = vsel %vm681_vm7, 1.0, %v569_v47  ;;  %9033 = vmatmul.mubr.f32.vlgmr.msra.gmra.mxu1 %v10848_v23  ;;  %v726_v37 = vsel %vm709_vm0, %v698_v33, 0  ;;  %v850_v40 = vsub.f32 %v10827_v10, %v10854_v28  ;;  %v554_v33 = vld [vmem:[%s10754_s28 + $0x50] sm:$0xff] }
  0xac   : > { %14391 = vst [vmem:[#allocation23_spill] sm:$0xff] %v10863_v31  ;;  %v723_v38 = vsel %vm709_vm0, %v697_v34, 0  ;;  %9035 = vmatprep.mubr.f32.mxu1 %v10807_v60  ;;  %9083 = vmatpush3.xpose.msra.mxu1 %v10699_v3  ;;  %v10879_v41 = vand.u32 4294901760, %v726_v37  ;;  %v635_v43 = vpop.permute.xlu1 %634  ;;  %v10887_v46 = vand.u32 4294901760, %v10863_v31  ;;  %v10890_v47 = vand.u32 4294901760, %v830_v39 }
  0xad   : > { %14392 = vst [vmem:[#allocation24_spill] sm:$0xff] %v10866_v32  ;;  %v10881_v42 = vand.u32 4294901760, %v723_v38  ;;  %v630_v44 = vpop.permute.xlu0 %629  ;;  %v10884_v45 = vand.u32 4294901760, %v10866_v32  ;;  %9134 = vmatprep.subr.mxu1 %v10699_v3  ;;  %vm684_vm8 = vcmp.gt.f32.partialorder %v551_v35, %v635_v43  ;;  %v10918_v13 = vand.u32 4294901760, %v850_v40 }
  0xae   : > { %14393 = vst [vmem:[#allocation25_spill] sm:$0xff] %v10879_v41  ;;  %14396 = vst [vmem:[#allocation28_spill] sm:$0xff] %v10887_v46  ;;  %vm683_vm9 = vcmp.gt.f32.partialorder %v550_v36, %v630_v44  ;;  %v10896_v49 = vsub.f32 %v726_v37, %v10879_v41  ;;  %v700_v51 = vsel %vm684_vm8, 1.0, %v10787_v52  ;;  %9006 = vmatprep.mubr.f32.mxu0 %v10890_v47 }
  0xaf   : > { %14394 = vst [vmem:[#allocation26_spill] sm:$0xff] %v10881_v42  ;;  %14395 = vst [vmem:[#allocation27_spill] sm:$0xff] %v10884_v45  ;;  %v10899_v50 = vsub.f32 %v723_v38, %v10881_v42  ;;  %v699_v54 = vsel %vm683_vm9, 1.0, %v10791_v53  ;;  %9036 = vmatmul.mubr.f32.gmra.mxu1 %v10846_v22  ;;  %v732_v57 = vsel %vm709_vm0, %v700_v51, 0  ;;  %v840_v63 = vsub.f32 %v10866_v32, %v10884_v45 }
  0xb0   : > { %14397 = vst [vmem:[#allocation29_spill] sm:$0xff] %v10890_v47  ;;  %14399 = vst [vmem:[#allocation31_spill] sm:$0xff] %v10896_v49  ;;  %v729_v62 = vsel %vm709_vm0, %v699_v54, 0  ;;  %9038 = vmatprep.mubr.f32.mxu1 %v10881_v42  ;;  %v860_v52 = vsub.f32 %v10863_v31, %v10887_v46  ;;  %v10914_v53 = vand.u32 4294901760, %v732_v57  ;;  %v645_v7 = vpop.permute.xlu1 %644  ;;  %v10926_v16 = vand.u32 4294901760, %v10896_v49 }
  0xb1   : > { %14400 = vst [vmem:[#allocation32_spill] sm:$0xff] %v10899_v50  ;;  %v10916_v6 = vand.u32 4294901760, %v729_v62  ;;  %v640_v9 = vpop.permute.xlu0 %639  ;;  %14403 = vst [vmem:[#allocation35_spill] sm:$0xff] %v10918_v13  ;;  %v10921_v14 = vand.u32 4294901760, %v10899_v50  ;;  %vm686_vm10 = vcmp.gt.f32.partialorder %v553_v55, %v645_v7  ;;  %v10923_v15 = vand.u32 4294901760, %v840_v63  ;;  %v556_v63 = vld [vmem:[%s10754_s28 + $0x60] sm:$0xff] }
  0xb2   : > { %14401 = vst [vmem:[#allocation33_spill] sm:$0xff] %v10914_v53  ;;  %vm685_vm11 = vcmp.gt.f32.partialorder %v552_v56, %v640_v9  ;;  %14406 = vst [vmem:[#allocation38_spill] sm:$0xff] %v10926_v16  ;;  %v10929_v17 = vsub.f32 %v732_v57, %v10914_v53  ;;  %v702_v19 = vsel %vm686_vm10, 1.0, %v10801_v58  ;;  %v10943_v36 = vand.u32 4294901760, %v860_v52 }
  0xb3   : > { %14402 = vst [vmem:[#allocation34_spill] sm:$0xff] %v10916_v6  ;;  %14404 = vst [vmem:[#allocation36_spill] sm:$0xff] %v10921_v14  ;;  %v10932_v18 = vsub.f32 %v729_v62, %v10916_v6  ;;  %v701_v24 = vsel %vm685_vm11, 1.0, %v10805_v59  ;;  %9039 = vmatmul.mubr.f32.gmra.mxu1 %v10879_v41  ;;  %v738_v34 = vsel %vm709_vm0, %v702_v19, 0  ;;  %9007 = vmatmul.mubr.f32.vlgmr.msra.gmra.mxu0 %v10923_v15  ;;  %v557_v62 = vld [vmem:[%s10754_s28 + $0x68] sm:$0xff] }
  0xb4   : > { %14405 = vst [vmem:[#allocation37_spill] sm:$0xff] %v10923_v15  ;;  %14407 = vst [vmem:[#allocation39_spill] sm:$0xff] %v10929_v17  ;;  %v735_v35 = vsel %vm709_vm0, %v701_v24, 0  ;;  %9041 = vmatprep.mubr.f32.mxu1 %v10916_v6  ;;  %v870_v37 = vsub.f32 %v10899_v50, %v10921_v14  ;;  %v10947_v58 = vand.u32 4294901760, %v738_v34  ;;  %9057 = vmatpush3.xpose.msra.mxu0 %v10703_v4  ;;  %v655_v38 = vpop.permute.xlu1 %654  ;;  %v10957_v43 = vand.u32 4294901760, %v10929_v17 }
  0xb5   : > { %14408 = vst [vmem:[#allocation40_spill] sm:$0xff] %v10932_v18  ;;  %14409 = vst [vmem:[#allocation41_spill] sm:$0xff] %v10943_v36  ;;  %v10949_v59 = vand.u32 4294901760, %v735_v35  ;;  %9009 = vmatprep.mubr.f32.mxu0 %v10918_v13  ;;  %v650_v39 = vpop.permute.xlu0 %649  ;;  %v10954_v40 = vand.u32 4294901760, %v10932_v18  ;;  %vm688_vm12 = vcmp.gt.f32.partialorder %v555_v26, %v655_v38  ;;  %v880_v51 = vsub.f32 %v10896_v49, %v10926_v16 }
  0xb6   : > { %14410 = vst [vmem:[#allocation42_spill] sm:$0xff] %v10947_v58  ;;  %14413 = vst [vmem:[#allocation45_spill] sm:$0xff] %v10957_v43  ;;  %vm687_vm13 = vcmp.gt.f32.partialorder %v554_v33, %v650_v39  ;;  %v10959_v44 = vand.u32 4294901760, %v870_v37  ;;  %9108 = vmatprep.subr.mxu0 %v10716_v5  ;;  %v10965_v54 = vsub.f32 %v738_v34, %v10947_v58  ;;  %v704_v56 = vsel %vm688_vm12, 1.0, %v10813_v0 }
  0xb7   : > { %14411 = vst [vmem:[#allocation43_spill] sm:$0xff] %v10949_v59  ;;  %14412 = vst [vmem:[#allocation44_spill] sm:$0xff] %v10954_v40  ;;  %v10968_v55 = vsub.f32 %v735_v35, %v10949_v59  ;;  %v703_v57 = vsel %vm687_vm13, 1.0, %v10817_v2  ;;  %9042 = vmatmul.mubr.f32.gmra.mxu1 %v10914_v53  ;;  %v744_v52 = vsel %vm709_vm0, %v704_v56, 0  ;;  %9010 = vmatmul.mubr.f32.gmra.mxu0 %v10943_v36  ;;  %v10994_v35 = vand.u32 4294901760, %v880_v51 }
  0xb8   : > { %14414 = vst [vmem:[#allocation46_spill] sm:$0xff] %v10959_v44  ;;  %14415 = vst [vmem:[#allocation47_spill] sm:$0xff] %v10965_v54  ;;  %v741_v7 = vsel %vm709_vm0, %v703_v57, 0  ;;  %9044 = vmatprep.mubr.f32.mxu1 %v10949_v59  ;;  %v890_v9 = vsub.f32 %v10932_v18, %v10954_v40  ;;  %v900_v0 = vsub.f32 %v10929_v17, %v10957_v43  ;;  %v10983_v19 = vand.u32 4294901760, %v744_v52  ;;  %v665_v24 = vpop.permute.xlu1 %664 }
  0xb9   : > { %14416 = vst [vmem:[#allocation48_spill] sm:$0xff] %v10968_v55  ;;  %v10985_v2 = vand.u32 4294901760, %v741_v7  ;;  %9012 = vmatprep.mubr.f32.mxu0 %v10959_v44  ;;  %v660_v26 = vpop.permute.xlu0 %659  ;;  %v10989_v33 = vand.u32 4294901760, %v10968_v55  ;;  %v10992_v34 = vand.u32 4294901760, %v10965_v54  ;;  %vm690_vm14 = vcmp.gt.f32.partialorder %v557_v62, %v665_v24  ;;  %14421 = vst [vmem:[#allocation53_spill] sm:$0xff] %v10994_v35 }
  0xba   : > { %14417 = vst [vmem:[#allocation49_spill] sm:$0xff] %v10983_v19  ;;  %vm689_vm15 = vcmp.gt.f32.partialorder %v556_v63, %v660_v26  ;;  %v10996_v37 = vand.u32 4294901760, %v890_v9  ;;  %v10999_v38 = vsub.f32 %v744_v52, %v10983_v19  ;;  %v706_v56 = vsel %vm690_vm14, 1.0, %v10823_v8 }
  0xbb   : > { %14418 = vst [vmem:[#allocation50_spill] sm:$0xff] %v10985_v2  ;;  %14419 = vst [vmem:[#allocation51_spill] sm:$0xff] %v10989_v33  ;;  %v11002_v39 = vsub.f32 %v741_v7, %v10985_v2  ;;  %v705_v57 = vsel %vm689_vm15, 1.0, %v10840_v20  ;;  %9045 = vmatmul.mubr.f32.gmra.mxu1 %v10947_v58  ;;  %v750_v62 = vsel %vm709_vm0, %v706_v56, 0  ;;  %9013 = vmatmul.mubr.f32.gmra.mxu0 %v10994_v35  ;;  %v11013_v63 = vand.u32 4294901760, %v900_v0 }
  0xbc   : > { %14420 = vst [vmem:[#allocation52_spill] sm:$0xff] %v10992_v34  ;;  %14422 = vst [vmem:[#allocation54_spill] sm:$0xff] %v10996_v37  ;;  %v747_v51 = vsel %vm709_vm0, %v705_v57, 0  ;;  %9047 = vmatprep.mubr.f32.mxu1 %v10985_v2  ;;  %v910_v52 = vsub.f32 %v10968_v55, %v10989_v33  ;;  %v11017_v8 = vand.u32 4294901760, %v750_v62  ;;  %9015 = vmatprep.mubr.f32.mxu0 %v10996_v37  ;;  %v675_v7 = vpop.permute.xlu1 %674  ;;  %v11030_v56 = vand.u32 4294901760, %v10999_v38 }
  0xbd   : > { %14423 = vst [vmem:[#allocation55_spill] sm:$0xff] %v10999_v38  ;;  %14424 = vst [vmem:[#allocation56_spill] sm:$0xff] %v11002_v39  ;;  %v11019_v20 = vand.u32 4294901760, %v747_v51  ;;  %v670_v9 = vpop.permute.xlu0 %669  ;;  %v920_v24 = vsub.f32 %v10965_v54, %v10992_v34  ;;  %v11025_v26 = vand.u32 4294901760, %v11002_v39  ;;  %vm692_vm1 = vcmp.gt.f32.partialorder %v559_v1, %v675_v7 }
  0xbe   : > { %14425 = vst [vmem:[#allocation57_spill] sm:$0xff] %v11013_v63  ;;  %14426 = vst [vmem:[#allocation58_spill] sm:$0xff] %v11017_v8  ;;  %vm691_vm2 = vcmp.gt.f32.partialorder %v558_v25, %v670_v9  ;;  %v11027_v0 = vand.u32 4294901760, %v910_v52  ;;  %v11033_v57 = vsub.f32 %v750_v62, %v11017_v8  ;;  %v708_v11 = vsel %vm692_vm1, 1.0, %v10844_v21 }
  0xbf   : > { %14427 = vst [vmem:[#allocation59_spill] sm:$0xff] %v11019_v20  ;;  %14428 = vst [vmem:[#allocation60_spill] sm:$0xff] %v11025_v26  ;;  %v11036_v4 = vsub.f32 %v747_v51, %v11019_v20  ;;  %v707_v37 = vsel %vm691_vm2, 1.0, %v10858_v29  ;;  %9048 = vmatmul.mubr.f32.gmra.mxu1 %v10983_v19  ;;  %v756_v1 = vsel %vm709_vm0, %v708_v11, 0  ;;  %9016 = vmatmul.mubr.f32.gmra.mxu0 %v11013_v63  ;;  %v11056_v11 = vand.u32 4294901760, %v10893_v48 }
  0xc0   : > { %14429 = vst [vmem:[#allocation61_spill] sm:$0xff] %v11027_v0  ;;  %14430 = vst [vmem:[#allocation62_spill] sm:$0xff] %v11030_v56  ;;  %v753_v25 = vsel %vm709_vm0, %v707_v37, 0  ;;  %9050 = vmatprep.mubr.f32.mxu1 %v11019_v20  ;;  %v930_v62 = vsub.f32 %v11002_v39, %v11025_v26  ;;  %v11047_v52 = vand.u32 4294901760, %v756_v1  ;;  %9018 = vmatprep.mubr.f32.mxu0 %v11027_v0  ;;  %v11058_v29 = vand.u32 4294901760, %v920_v24 }
  0xc1   : > { %14431 = vst [vmem:[#allocation63_spill] sm:$0xff] %v11033_v57  ;;  %14432 = vst [vmem:[#allocation64_spill] sm:$0xff] %v11036_v4  ;;  %v11049_v51 = vand.u32 4294901760, %v753_v25  ;;  %v11053_v21 = vand.u32 4294901760, %v11036_v4  ;;  %v940_v7 = vsub.f32 %v10999_v38, %v11030_v56  ;;  %v11065_v9 = vand.u32 4294901760, %v11033_v57 }
  0xc2   : > { %14435 = vst [vmem:[#allocation67_spill] sm:$0xff] %v11056_v11  ;;  %14436 = vst [vmem:[#allocation68_spill] sm:$0xff] %v11058_v29  ;;  %v11060_v37 = vand.u32 4294901760, %v930_v62  ;;  %v11068_v63 = vsub.f32 %v756_v1, %v11047_v52 }
  0xc3   : > { %14433 = vst [vmem:[#allocation65_spill] sm:$0xff] %v11049_v51  ;;  %14434 = vst [vmem:[#allocation66_spill] sm:$0xff] %v11053_v21  ;;  %v11071_v0 = vsub.f32 %v753_v25, %v11049_v51  ;;  %9051 = vmatmul.mubr.f32.gmra.mxu1 %v11017_v8  ;;  %v950_v24 = vsub.f32 %v11036_v4, %v11053_v21  ;;  %9019 = vmatmul.mubr.f32.gmra.mxu0 %v11058_v29  ;;  %v11084_v1 = vand.u32 4294901760, %v940_v7 }
  0xc4   : > { %14437 = vst [vmem:[#allocation69_spill] sm:$0xff] %v11060_v37  ;;  %14438 = vst [vmem:[#allocation70_spill] sm:$0xff] %v11065_v9  ;;  %9053 = vmatprep.mubr.f32.mxu1 %v11049_v51  ;;  %9021 = vmatprep.mubr.f32.mxu0 %v11060_v37  ;;  %v960_v25 = vsub.f32 %v11033_v57, %v11065_v9  ;;  %v11089_v44 = vand.u32 4294901760, %v11068_v63  ;;  %v2115_v29 = vsub.f32 %v10893_v48, %v11056_v11 }
  0xc5   : > { %14439 = vst [vmem:[#allocation71_spill] sm:$0xff] %v11068_v63  ;;  %14440 = vst [vmem:[#allocation72_spill] sm:$0xff] %v11071_v0  ;;  %v11079_v62 = vand.u32 4294901760, %v950_v24  ;;  %v11082_v35 = vand.u32 4294901760, %v11071_v0 }
  0xc6   : > { %14443 = vst [vmem:[#allocation75_spill] sm:$0xff] %v11084_v1  ;;  %14444 = vst [vmem:[#allocation76_spill] sm:$0xff] %v11089_v44  ;;  %v11101_v37 = vand.u32 4294901760, %v960_v25  ;;  %v980_v36 = vsub.f32 %v11068_v63, %v11089_v44  ;;  %v11105_v13 = vand.u32 4294901760, %v2115_v29  ;;  %v14450_v29 = vld [vmem:[#allocation41_spill] sm:$0xff]  ;;  %v14451_v25 = vld [vmem:[#allocation46_spill] sm:$0xff] }
  0xc7   : > { %14441 = vst [vmem:[#allocation73_spill] sm:$0xff] %v11079_v62  ;;  %14442 = vst [vmem:[#allocation74_spill] sm:$0xff] %v11082_v35  ;;  %9054 = vmatmul.mubr.f32.gmra.mxu1 %v11047_v52  ;;  %v970_v24 = vsub.f32 %v11071_v0, %v11082_v35  ;;  %9022 = vmatmul.mubr.f32.gmra.mxu0 %v11084_v1 }
  0xc8   : > { %9084 = vmatprep.mubr.f32.mxu1 %v10851_v27  ;;  %9024 = vmatprep.mubr.f32.mxu0 %v11079_v62  ;;  %14446 = vst [vmem:[#allocation78_spill] sm:$0xff] %v11101_v37  ;;  %14447 = vst [vmem:[#allocation79_spill] sm:$0xff] %v11105_v13  ;;  %v11112_v62 = vand.u32 4294901760, %v980_v36  ;;  %v14449_v36 = vld [vmem:[#allocation35_spill] sm:$0xff] }
  0xc9   : > { %v11099_v7 = vand.u32 4294901760, %v970_v24  ;;  %v14452_v24 = vld [vmem:[#allocation53_spill] sm:$0xff] }
  0xca   : > { %14448 = vst [vmem:[#allocation80_spill] sm:$0xff] %v11112_v62 }
  0xcb   : > { %14445 = vst [vmem:[#allocation77_spill] sm:$0xff] %v11099_v7  ;;  %9085 = vmatmul.mubr.f32.vlgmr.msra.gmra.mxu1 %v10884_v45  ;;  %9025 = vmatmul.mubr.f32.gmra.mxu0 %v11101_v37 }
  0xcc   : > { %9087 = vmatprep.mubr.f32.mxu1 %v10854_v28  ;;  %9027 = vmatprep.mubr.f32.mxu0 %v11099_v7 }
  0xcd   : > { %9135 = vmatpush3.xpose.msra.mxu1 %v10699_v3  ;;  %v14456_v3 = vld [vmem:[#allocation68_spill] sm:$0xff] }
  0xce   : > { %9186 = vmatprep.subr.mxu1 %v11105_v13 }
  0xcf   : > { %9088 = vmatmul.mubr.f32.gmra.mxu1 %v10887_v46  ;;  %9028 = vmatmul.mubr.f32.gmra.mxu0 %v11112_v62 }
  0xd0   : > { %9090 = vmatprep.mubr.f32.mxu1 %v10921_v14  ;;  %9058 = vmatprep.mubr.f32.mxu0 %v10830_v12 }
  0xd3   : > { %9091 = vmatmul.mubr.f32.gmra.mxu1 %v10926_v16  ;;  %9059 = vmatmul.mubr.f32.vlgmr.msra.gmra.mxu0 %v10866_v32 }
  0xd4   : > { %9093 = vmatprep.mubr.f32.mxu1 %v10954_v40  ;;  %9109 = vmatpush3.xpose.msra.mxu0 %v10716_v5  ;;  %v14455_v5 = vld [vmem:[#allocation61_spill] sm:$0xff] }
  0xd5   : > { %9061 = vmatprep.mubr.f32.mxu0 %v10827_v10  ;;  %9160 = vmatprep.subr.mxu0 %v10860_v30 }
  0xd7   : > { %9094 = vmatmul.mubr.f32.gmra.mxu1 %v10957_v43  ;;  %9062 = vmatmul.mubr.f32.gmra.mxu0 %v10863_v31 }
  0xd8   : > { %9096 = vmatprep.mubr.f32.mxu1 %v10989_v33  ;;  %9064 = vmatprep.mubr.f32.mxu0 %v10899_v50 }
  0xdb   : > { %9097 = vmatmul.mubr.f32.gmra.mxu1 %v10992_v34  ;;  %9065 = vmatmul.mubr.f32.gmra.mxu0 %v10896_v49 }
  0xdc   : > { %9099 = vmatprep.mubr.f32.mxu1 %v11025_v26  ;;  %9067 = vmatprep.mubr.f32.mxu0 %v10932_v18 }
  0xdf   : > { %9100 = vmatmul.mubr.f32.gmra.mxu1 %v11030_v56  ;;  %9068 = vmatmul.mubr.f32.gmra.mxu0 %v10929_v17 }
  0xe0   : > { %9102 = vmatprep.mubr.f32.mxu1 %v11053_v21  ;;  %9070 = vmatprep.mubr.f32.mxu0 %v10968_v55 }
  0xe3   : > { %9103 = vmatmul.mubr.f32.gmra.mxu1 %v11065_v9  ;;  %9071 = vmatmul.mubr.f32.gmra.mxu0 %v10965_v54 }
  0xe4   : > { %9105 = vmatprep.mubr.f32.mxu1 %v11082_v35  ;;  %9073 = vmatprep.mubr.f32.mxu0 %v11002_v39 }
  0xe7   : > { %9106 = vmatmul.mubr.f32.gmra.mxu1 %v11089_v44  ;;  %9074 = vmatmul.mubr.f32.gmra.mxu0 %v10999_v38 }
  0xe8   : > { %9136 = vmatprep.mubr.f32.mxu1 %v10809_v61  ;;  %9076 = vmatprep.mubr.f32.mxu0 %v11036_v4 }
  0xeb   : > { %9137 = vmatmul.mubr.f32.vlgmr.msra.gmra.mxu1 %v10848_v23  ;;  %9077 = vmatmul.mubr.f32.gmra.mxu0 %v11033_v57 }
  0xec   : > { %9139 = vmatprep.mubr.f32.mxu1 %v10807_v60  ;;  %9079 = vmatprep.mubr.f32.mxu0 %v11071_v0 }
  0xed   : > { %9187 = vmatpush3.xpose.msra.mxu1 %v11105_v13  ;;  %v14453_v13 = vld [vmem:[#allocation54_spill] sm:$0xff] }
  0xee   : > { %9238 = vmatprep.subr.mxu1 %v10860_v30 }
  0xef   : > { %9140 = vmatmul.mubr.f32.gmra.mxu1 %v10846_v22  ;;  %9080 = vmatmul.mubr.f32.gmra.mxu0 %v11068_v63 }
  0xf0   : > { %9142 = vmatprep.mubr.f32.mxu1 %v10881_v42  ;;  %9110 = vmatprep.mubr.f32.mxu0 %v10809_v61 }
  0xf3   : > { %9143 = vmatmul.mubr.f32.gmra.mxu1 %v10879_v41  ;;  %9111 = vmatmul.mubr.f32.vlgmr.msra.gmra.mxu0 %v10848_v23 }
  0xf4   : > { %9145 = vmatprep.mubr.f32.mxu1 %v10916_v6  ;;  %9161 = vmatpush3.xpose.msra.mxu0 %v10860_v30 }
  0xf5   : > { %9113 = vmatprep.mubr.f32.mxu0 %v10807_v60  ;;  %9212 = vmatprep.subr.mxu0 %v10893_v48 }
  0xf7   : > { %9146 = vmatmul.mubr.f32.gmra.mxu1 %v10914_v53  ;;  %9114 = vmatmul.mubr.f32.gmra.mxu0 %v10846_v22 }
  0xf8   : > { %9148 = vmatprep.mubr.f32.mxu1 %v10949_v59  ;;  %9116 = vmatprep.mubr.f32.mxu0 %v10881_v42 }
  0xfb   : > { %9149 = vmatmul.mubr.f32.gmra.mxu1 %v10947_v58  ;;  %9117 = vmatmul.mubr.f32.gmra.mxu0 %v10879_v41 }
  0xfc   : > { %9151 = vmatprep.mubr.f32.mxu1 %v10985_v2  ;;  %9119 = vmatprep.mubr.f32.mxu0 %v10916_v6 }
  0xff   : > { %9152 = vmatmul.mubr.f32.gmra.mxu1 %v10983_v19  ;;  %9120 = vmatmul.mubr.f32.gmra.mxu0 %v10914_v53 }
 0x100   : > { %9154 = vmatprep.mubr.f32.mxu1 %v11019_v20  ;;  %9122 = vmatprep.mubr.f32.mxu0 %v10949_v59 }
 0x103   : > { %9155 = vmatmul.mubr.f32.gmra.mxu1 %v11017_v8  ;;  %9123 = vmatmul.mubr.f32.gmra.mxu0 %v10947_v58 }
 0x104   : > { %9157 = vmatprep.mubr.f32.mxu1 %v11049_v51  ;;  %9125 = vmatprep.mubr.f32.mxu0 %v10985_v2 }
 0x107   : > { %9158 = vmatmul.mubr.f32.gmra.mxu1 %v11047_v52  ;;  %9126 = vmatmul.mubr.f32.gmra.mxu0 %v10983_v19 }
 0x108   : > { %9188 = vmatprep.mubr.f32.mxu1 %v10809_v61  ;;  %9128 = vmatprep.mubr.f32.mxu0 %v11019_v20 }
 0x10b   : > { %9189 = vmatmul.mubr.f32.vlgmr.msra.gmra.mxu1 %v10848_v23  ;;  %9129 = vmatmul.mubr.f32.gmra.mxu0 %v11017_v8 }
 0x10c   : > { %9191 = vmatprep.mubr.f32.mxu1 %v10807_v60  ;;  %9131 = vmatprep.mubr.f32.mxu0 %v11049_v51 }
 0x10d   : > { %9239 = vmatpush3.xpose.msra.mxu1 %v10860_v30 }
 0x10e   : > { %9290 = vmatprep.subr.mxu1 %v10860_v30 }
 0x10f   : > { %9192 = vmatmul.mubr.f32.gmra.mxu1 %v10846_v22  ;;  %9132 = vmatmul.mubr.f32.gmra.mxu0 %v11047_v52 }
 0x110   : > { %9194 = vmatprep.mubr.f32.mxu1 %v10881_v42  ;;  %9162 = vmatprep.mubr.f32.mxu0 %v10890_v47  ;;  %v14457_v47 = vld [vmem:[#allocation69_spill] sm:$0xff] }
 0x113   : > { %9195 = vmatmul.mubr.f32.gmra.mxu1 %v10879_v41  ;;  %9163 = vmatmul.mubr.f32.vlgmr.msra.gmra.mxu0 %v10923_v15  ;;  %v14458_v15 = vld [vmem:[#allocation73_spill] sm:$0xff] }
 0x114   : > { %9197 = vmatprep.mubr.f32.mxu1 %v10916_v6  ;;  %9213 = vmatpush3.xpose.msra.mxu0 %v10893_v48  ;;  %v14454_v48 = vld [vmem:[#allocation57_spill] sm:$0xff] }
 0x115   : > { %9165 = vmatprep.mubr.f32.mxu0 %v14449_v36  ;;  %9264 = vmatprep.subr.mxu0 %v11056_v11  ;;  %v14293_v36 = vmov 0.0  }
 0x117   : > { %9198 = vmatmul.mubr.f32.gmra.mxu1 %v10914_v53  ;;  %9166 = vmatmul.mubr.f32.gmra.mxu0 %v14450_v29 }
 0x118   : > { %9200 = vmatprep.mubr.f32.mxu1 %v10949_v59  ;;  %9168 = vmatprep.mubr.f32.mxu0 %v14451_v25 }
 0x11b   : > { %9201 = vmatmul.mubr.f32.gmra.mxu1 %v10947_v58  ;;  %9169 = vmatmul.mubr.f32.gmra.mxu0 %v14452_v24 }
 0x11c   : > { %9203 = vmatprep.mubr.f32.mxu1 %v10985_v2  ;;  %9171 = vmatprep.mubr.f32.mxu0 %v14453_v13 }
 0x11f   : > { %9204 = vmatmul.mubr.f32.gmra.mxu1 %v10983_v19  ;;  %9172 = vmatmul.mubr.f32.gmra.mxu0 %v14454_v48 }
 0x120   : > { %9206 = vmatprep.mubr.f32.mxu1 %v11019_v20  ;;  %9174 = vmatprep.mubr.f32.mxu0 %v14455_v5 }
 0x123   : > { %9207 = vmatmul.mubr.f32.gmra.mxu1 %v11017_v8  ;;  %9175 = vmatmul.mubr.f32.gmra.mxu0 %v14456_v3 }
 0x124   : > { %9209 = vmatprep.mubr.f32.mxu1 %v11049_v51  ;;  %9177 = vmatprep.mubr.f32.mxu0 %v14457_v47 }
 0x127   : > { %9210 = vmatmul.mubr.f32.gmra.mxu1 %v11047_v52  ;;  %9178 = vmatmul.mubr.f32.gmra.mxu0 %v11084_v1 }
 0x128   : > { %9240 = vmatprep.mubr.f32.mxu1 %v10851_v27  ;;  %9180 = vmatprep.mubr.f32.mxu0 %v14458_v15 }
 0x12b   : > { %9241 = vmatmul.mubr.f32.vlgmr.msra.gmra.mxu1 %v10884_v45  ;;  %9181 = vmatmul.mubr.f32.gmra.mxu0 %v11101_v37 }
 0x12c   : > { %9243 = vmatprep.mubr.f32.mxu1 %v10854_v28  ;;  %9183 = vmatprep.mubr.f32.mxu0 %v11099_v7 }
 0x12d   : > { %9291 = vmatpush3.xpose.msra.mxu1 %v10860_v30 }
 0x12e   : > { %9351 = vmatprep.subr.mxu1 %v14293_v36 }
 0x12f   : > { %9244 = vmatmul.mubr.f32.gmra.mxu1 %v10887_v46  ;;  %9184 = vmatmul.mubr.f32.gmra.mxu0 %v11112_v62  ;;  %v14465_v46 = vld [vmem:[#allocation35_spill] sm:$0xff] }
 0x130   : > { %9246 = vmatprep.mubr.f32.mxu1 %v10921_v14  ;;  %9214 = vmatprep.mubr.f32.mxu0 %v10830_v12 }
 0x133   : > { %9247 = vmatmul.mubr.f32.gmra.mxu1 %v10926_v16  ;;  %9215 = vmatmul.mubr.f32.vlgmr.msra.gmra.mxu0 %v10866_v32 }
 0x134   : > { %9249 = vmatprep.mubr.f32.mxu1 %v10954_v40  ;;  %9265 = vmatpush3.xpose.msra.mxu0 %v11056_v11 }
 0x135   : > { %9217 = vmatprep.mubr.f32.mxu0 %v10827_v10  ;;  %9316 = vmatprep.subr.mxu0 %v14293_v36 }
 0x137   : > { %9250 = vmatmul.mubr.f32.gmra.mxu1 %v10957_v43  ;;  %9218 = vmatmul.mubr.f32.gmra.mxu0 %v10863_v31 }
 0x138   : > { %9252 = vmatprep.mubr.f32.mxu1 %v10989_v33  ;;  %9220 = vmatprep.mubr.f32.mxu0 %v10899_v50 }
 0x13b   : > { %9253 = vmatmul.mubr.f32.gmra.mxu1 %v10992_v34  ;;  %9221 = vmatmul.mubr.f32.gmra.mxu0 %v10896_v49 }
 0x13c   : > { %9255 = vmatprep.mubr.f32.mxu1 %v11025_v26  ;;  %9223 = vmatprep.mubr.f32.mxu0 %v10932_v18 }
 0x13f   : > { %9256 = vmatmul.mubr.f32.gmra.mxu1 %v11030_v56  ;;  %9224 = vmatmul.mubr.f32.gmra.mxu0 %v10929_v17 }
 0x140   : > { %9258 = vmatprep.mubr.f32.mxu1 %v11053_v21  ;;  %9226 = vmatprep.mubr.f32.mxu0 %v10968_v55 }
 0x143   : > { %9259 = vmatmul.mubr.f32.gmra.mxu1 %v11065_v9  ;;  %9227 = vmatmul.mubr.f32.gmra.mxu0 %v10965_v54 }
 0x144   : > { %9261 = vmatprep.mubr.f32.mxu1 %v11082_v35  ;;  %9229 = vmatprep.mubr.f32.mxu0 %v11002_v39 }
 0x147   : > { %9262 = vmatmul.mubr.f32.gmra.mxu1 %v11089_v44  ;;  %9230 = vmatmul.mubr.f32.gmra.mxu0 %v10999_v38 }
 0x148   : > { %9292 = vmatprep.mubr.f32.mxu1 %v10809_v61  ;;  %9232 = vmatprep.mubr.f32.mxu0 %v11036_v4 }
 0x14b   : > { %9293 = vmatmul.mubr.f32.vlgmr.msra.gmra.mxu1 %v10848_v23  ;;  %9233 = vmatmul.mubr.f32.gmra.mxu0 %v11033_v57 }
 0x14c   : > { %9352 = vmatpush3.xpose.msra.mxu1 %v11112_v62  ;;  %9235 = vmatprep.mubr.f32.mxu0 %v11071_v0 }
 0x14d   : > { %9295 = vmatprep.mubr.f32.mxu1 %v10807_v60  ;;  %9353 = vmatprep.subr.mxu1 %v14293_v36 }
 0x14f   : > { %9296 = vmatmul.mubr.f32.gmra.mxu1 %v10846_v22  ;;  %9236 = vmatmul.mubr.f32.gmra.mxu0 %v11068_v63 }
 0x150   : > { %9354 = vmatpush3.xpose.msra.mxu1 %v11099_v7  ;;  %9266 = vmatprep.mubr.f32.mxu0 %v10809_v61 }
 0x151   : > { %9298 = vmatprep.mubr.f32.mxu1 %v10881_v42  ;;  %9355 = vmatprep.subr.mxu1 %v14293_v36 }
 0x153   : > { %9299 = vmatmul.mubr.f32.gmra.mxu1 %v10879_v41  ;;  %9267 = vmatmul.mubr.f32.vlgmr.msra.gmra.mxu0 %v10848_v23 }
 0x154   : > { %9356 = vmatpush3.xpose.msra.mxu1 %v11101_v37  ;;  %9317 = vmatpush3.xpose.msra.mxu0 %v11047_v52 }
 0x155   : > { %9269 = vmatprep.mubr.f32.mxu0 %v10807_v60  ;;  %9301 = vmatprep.mubr.f32.mxu1 %v10916_v6 }
 0x156   : > { %9318 = vmatprep.subr.mxu0 %v14293_v36  ;;  %9357 = vmatprep.subr.mxu1 %v14293_v36 }
 0x157   : > { %9302 = vmatmul.mubr.f32.gmra.mxu1 %v10914_v53  ;;  %9270 = vmatmul.mubr.f32.gmra.mxu0 %v10846_v22 }
 0x158   : > { %9358 = vmatpush3.xpose.msra.mxu1 %v14458_v15  ;;  %9319 = vmatpush3.xpose.msra.mxu0 %v11049_v51 }
 0x159   : > { %9272 = vmatprep.mubr.f32.mxu0 %v10881_v42  ;;  %9304 = vmatprep.mubr.f32.mxu1 %v10949_v59 }
 0x15a   : > { %9320 = vmatprep.subr.mxu0 %v14293_v36  ;;  %9359 = vmatprep.subr.mxu1 %v14293_v36 }
 0x15b   : > { %9305 = vmatmul.mubr.f32.gmra.mxu1 %v10947_v58  ;;  %9273 = vmatmul.mubr.f32.gmra.mxu0 %v10879_v41 }
 0x15c   : > { %9360 = vmatpush3.xpose.msra.mxu1 %v11084_v1  ;;  %9321 = vmatpush3.xpose.msra.mxu0 %v11017_v8 }
 0x15d   : > { %9275 = vmatprep.mubr.f32.mxu0 %v10916_v6  ;;  %9307 = vmatprep.mubr.f32.mxu1 %v10985_v2 }
 0x15e   : > { %9322 = vmatprep.subr.mxu0 %v14293_v36  ;;  %9361 = vmatprep.subr.mxu1 %v14293_v36 }
 0x15f   : > { %9308 = vmatmul.mubr.f32.gmra.mxu1 %v10983_v19  ;;  %9276 = vmatmul.mubr.f32.gmra.mxu0 %v10914_v53 }
 0x160   : > { %9362 = vmatpush3.xpose.msra.mxu1 %v14457_v47  ;;  %9323 = vmatpush3.xpose.msra.mxu0 %v11019_v20 }
 0x161   : > { %9278 = vmatprep.mubr.f32.mxu0 %v10949_v59  ;;  %9310 = vmatprep.mubr.f32.mxu1 %v11019_v20 }
 0x162   : > { %9324 = vmatprep.subr.mxu0 %v14293_v36  ;;  %9363 = vmatprep.subr.mxu1 %v14293_v36 }
 0x163   : > { %9311 = vmatmul.mubr.f32.gmra.mxu1 %v11017_v8  ;;  %9279 = vmatmul.mubr.f32.gmra.mxu0 %v10947_v58 }
 0x164   : > { %9364 = vmatpush3.xpose.msra.mxu1 %v14456_v3  ;;  %9325 = vmatpush3.xpose.msra.mxu0 %v10983_v19 }
 0x165   : > { %9281 = vmatprep.mubr.f32.mxu0 %v10985_v2  ;;  %9313 = vmatprep.mubr.f32.mxu1 %v11049_v51 }
 0x166   : > { %9326 = vmatprep.subr.mxu0 %v14293_v36  ;;  %9365 = vmatprep.subr.mxu1 %v14293_v36 }
 0x167   : > { %9314 = vmatmul.mubr.f32.gmra.mxu1 %v11047_v52  ;;  %9282 = vmatmul.mubr.f32.gmra.mxu0 %v10983_v19 }
 0x168   : > { %9366 = vmatpush3.xpose.msra.mxu1 %v14455_v5  ;;  %9327 = vmatpush3.xpose.msra.mxu0 %v10985_v2 }
 0x169   : > { %9284 = vmatprep.mubr.f32.mxu0 %v11019_v20  ;;  %9328 = vmatprep.subr.mxu0 %v14293_v36 }
 0x16a   : > { %9367 = vmatprep.subr.mxu1 %v14293_v36  ;;  %9383 = vmatprep.mubr.msk.f32.mxu1 %vm10582_vm3, %v14293_v36 }
 0x16b   : > { %v9034_v11 = vpop.f32.mrf.mxu1  ;;  %9285 = vmatmul.mubr.f32.gmra.mxu0 %v11017_v8 }
 0x16c   : > { %9368 = vmatpush3.xpose.msra.mxu1 %v14454_v48  ;;  %9329 = vmatpush3.xpose.msra.mxu0 %v10947_v58 }
 0x16d   : > { %9287 = vmatprep.mubr.f32.mxu0 %v11049_v51  ;;  %v11318_v30 = vpop.f32.mrf.mxu1  ;;  %9330 = vmatprep.subr.mxu0 %v14293_v36 }
 0x16e   : > { %9369 = vmatprep.subr.mxu1 %v14293_v36 }
 0x16f   : > { %v9037_v5 = vpop.f32.mrf.mxu1  ;;  %9288 = vmatmul.mubr.f32.gmra.mxu0 %v11047_v52 }
 0x170   : > { %9370 = vmatpush3.xpose.msra.mxu1 %v14453_v13  ;;  %9331 = vmatpush3.xpose.msra.mxu0 %v10949_v59 }
 0x171   : > { %v11325_v3 = vpop.f32.mrf.mxu1  ;;  %9371 = vmatprep.subr.mxu1 %v14293_v36  ;;  %9332 = vmatprep.subr.mxu0 %v14293_v36 }
 0x172   : > { %14459 = vst [vmem:[#allocation81_spill] sm:$0xff] %v11325_v3  ;;  %9348 = vmatprep.mubr.msk.f32.mxu0 %vm10582_vm3, %v14293_v36 }
 0x173   : > { %v9040_v48 = vpop.f32.mrf.mxu1  ;;  %v9008_v47 = vpop.f32.mrf.mxu0 }
 0x174   : > { %9372 = vmatpush3.xpose.msra.mxu1 %v14452_v24  ;;  %v11332_v1 = vadd.f32 %v9034_v11, %v9008_v47  ;;  %9333 = vmatpush3.xpose.msra.mxu0 %v10914_v53 }
 0x175   : > { %v11335_v13 = vpop.f32.mrf.mxu1  ;;  %9373 = vmatprep.subr.mxu1 %v14293_v36  ;;  %v11338_v15 = vpop.f32.mrf.mxu0  ;;  %9334 = vmatprep.subr.mxu0 %v14293_v36 }
 0x176   : > { %14460 = vst [vmem:[#allocation82_spill] sm:$0xff] %v11335_v13  ;;  %v14468_v13 = vld [vmem:[#allocation37_spill] sm:$0xff] }
 0x177   : > { %v9043_v37 = vpop.f32.mrf.mxu1  ;;  %v9011_v27 = vpop.f32.mrf.mxu0 }
 0x178   : > { %9374 = vmatpush3.xpose.msra.mxu1 %v14451_v25  ;;  %v11342_v7 = vadd.f32 %v9037_v5, %v9011_v27  ;;  %9335 = vmatpush3.xpose.msra.mxu0 %v10916_v6 }
 0x179   : > { %v11345_v47 = vpop.f32.mrf.mxu1  ;;  %9375 = vmatprep.subr.mxu1 %v14293_v36  ;;  %v11348_v11 = vpop.f32.mrf.mxu0  ;;  %9336 = vmatprep.subr.mxu0 %v14293_v36 }
 0x17a   : > { %14461 = vst [vmem:[#allocation83_spill] sm:$0xff] %v11345_v47  ;;  %14462 = vst [vmem:[#allocation84_spill] sm:$0xff] %v11348_v11  ;;  %v14479_v11 = vld [vmem:[#allocation12_spill] sm:$0xff] }
 0x17b   : > { %v9046_v24 = vpop.f32.mrf.mxu1  ;;  %v9014_v45 = vpop.f32.mrf.mxu0 }
 0x17c   : > { %9376 = vmatpush3.xpose.msra.mxu1 %v14450_v29  ;;  %v11352_v62 = vadd.f32 %v9040_v48, %v9014_v45  ;;  %9337 = vmatpush3.xpose.msra.mxu0 %v10879_v41 }
 0x17d   : > { %v11355_v5 = vpop.f32.mrf.mxu1  ;;  %9377 = vmatprep.subr.mxu1 %v14293_v36  ;;  %v11358_v27 = vpop.f32.mrf.mxu0  ;;  %9338 = vmatprep.subr.mxu0 %v14293_v36 }
 0x17e   : > { %14463 = vst [vmem:[#allocation85_spill] sm:$0xff] %v11355_v5  ;;  %14464 = vst [vmem:[#allocation86_spill] sm:$0xff] %v11358_v27 }
 0x17f   : > { %v9049_v25 = vpop.f32.mrf.mxu1  ;;  %v9017_v28 = vpop.f32.mrf.mxu0 }
 0x180   : > { %9378 = vmatpush3.xpose.msra.mxu1 %v14465_v46  ;;  %v11362_v47 = vadd.f32 %v9043_v37, %v9017_v28  ;;  %9339 = vmatpush3.xpose.msra.mxu0 %v10881_v42 }
 0x181   : > { %v11365_v45 = vpop.f32.mrf.mxu1  ;;  %9379 = vmatprep.subr.mxu1 %v14293_v36  ;;  %v11368_v48 = vpop.f32.mrf.mxu0  ;;  %9340 = vmatprep.subr.mxu0 %v14293_v36 }
 0x182   : > { %14466 = vst [vmem:[#allocation87_spill] sm:$0xff] %v11365_v45  ;;  %14467 = vst [vmem:[#allocation88_spill] sm:$0xff] %v11368_v48  ;;  %v14471_v48 = vld [vmem:[#allocation29_spill] sm:$0xff] }
 0x183   : > { %v9052_v29 = vpop.f32.mrf.mxu1  ;;  %v9020_v5 = vpop.f32.mrf.mxu0 }
 0x184   : > { %9380 = vmatpush3.xpose.msra.mxu1 %v14468_v13  ;;  %v11372_v27 = vadd.f32 %v9046_v24, %v9020_v5  ;;  %9341 = vmatpush3.xpose.msra.mxu0 %v10846_v22 }
 0x185   : > { %v11375_v28 = vpop.f32.mrf.mxu1  ;;  %9381 = vmatprep.subr.mxu1 %v14293_v36  ;;  %v11378_v37 = vpop.f32.mrf.mxu0  ;;  %9342 = vmatprep.subr.mxu0 %v14293_v36 }
 0x186   : > { %14469 = vst [vmem:[#allocation89_spill] sm:$0xff] %v11375_v28  ;;  %14470 = vst [vmem:[#allocation90_spill] sm:$0xff] %v11378_v37  ;;  %v14474_v28 = vld [vmem:[#allocation9_spill] sm:$0xff] }
 0x187   : > { %v9055_v46 = vpop.f32.mrf.mxu1  ;;  %v9023_v45 = vpop.f32.mrf.mxu0 }
 0x188   : > { %9382 = vmatpush3.xpose.msra.mxu1 %v14471_v48  ;;  %v11382_v3 = vadd.f32 %v9049_v25, %v9023_v45  ;;  %9343 = vmatpush3.xpose.msra.mxu0 %v10807_v60 }
 0x189   : > { %v11385_v24 = vpop.f32.mrf.mxu1  ;;  %9421 = vmatprep.subr.mxu1 %v14293_v36  ;;  %v11388_v5 = vpop.f32.mrf.mxu0  ;;  %9344 = vmatprep.subr.mxu0 %v14293_v36 }
 0x18a   : > { %14472 = vst [vmem:[#allocation91_spill] sm:$0xff] %v11385_v24  ;;  %14473 = vst [vmem:[#allocation92_spill] sm:$0xff] %v11388_v5 }
 0x18b   : > { %v9086_v13 = vpop.f32.mrf.mxu1  ;;  %9384 = vmatmul.mubr.f32.vlgmr.msra.gmra.mxu1 %v14474_v28  ;;  %v9026_v37 = vpop.f32.mrf.mxu0 }
 0x18c   : > { %9422 = vmatpush3.xpose.msra.mxu1 %v11047_v52  ;;  %9453 = vmatprep.mubr.msk.f32.mxu1 %vm10582_vm3, %v14293_v36  ;;  %v11395_v25 = vadd.f32 %v9052_v29, %v9026_v37 }
 0x18d   : > { %9345 = vmatpush3.xpose.msra.mxu0 %v10848_v23  ;;  %v11398_v45 = vpop.f32.mrf.mxu1  ;;  %9423 = vmatprep.subr.mxu1 %v14293_v36  ;;  %v11401_v48 = vpop.f32.mrf.mxu0 }
 0x18e   : > { %14475 = vst [vmem:[#allocation93_spill] sm:$0xff] %v11398_v45  ;;  %14476 = vst [vmem:[#allocation94_spill] sm:$0xff] %v11401_v48  ;;  %9346 = vmatprep.subr.mxu0 %v14293_v36 }
 0x18f   : > { %v9089_v24 = vpop.f32.mrf.mxu1  ;;  %v9029_v28 = vpop.f32.mrf.mxu0 }
 0x190   : > { %9424 = vmatpush3.xpose.msra.mxu1 %v11049_v51  ;;  %v11405_v5 = vadd.f32 %v9055_v46, %v9029_v28 }
 0x191   : > { %9347 = vmatpush3.xpose.msra.mxu0 %v10809_v61  ;;  %v11408_v29 = vpop.f32.mrf.mxu1  ;;  %9425 = vmatprep.subr.mxu1 %v14293_v36  ;;  %v11411_v37 = vpop.f32.mrf.mxu0 }
 0x192   : > { %14477 = vst [vmem:[#allocation95_spill] sm:$0xff] %v11408_v29  ;;  %14478 = vst [vmem:[#allocation96_spill] sm:$0xff] %v11411_v37  ;;  %9386 = vmatprep.subr.mxu0 %v14293_v36 }
 0x193   : > { %v9092_v45 = vpop.f32.mrf.mxu1  ;;  %v9060_v48 = vpop.f32.mrf.mxu0 }
 0x194   : > { %9349 = vmatmul.mubr.f32.vlgmr.msra.gmra.mxu0 %v14479_v11  ;;  %9426 = vmatpush3.xpose.msra.mxu1 %v11017_v8  ;;  %v1231_v14 = vadd.f32 %v9060_v48, %v11332_v1 }
 0x195   : > { %9387 = vmatpush3.xpose.msra.mxu0 %v11068_v63  ;;  %v11418_v46 = vpop.f32.mrf.mxu1  ;;  %9427 = vmatprep.subr.mxu1 %v14293_v36  ;;  %v11421_v28 = vpop.f32.mrf.mxu0 }
 0x196   : > { %14480 = vst [vmem:[#allocation12_spill] sm:$0xff] %v11418_v46  ;;  %14481 = vst [vmem:[#allocation97_spill] sm:$0xff] %v11421_v28  ;;  %9388 = vmatprep.subr.mxu0 %v14293_v36  ;;  %9418 = vmatprep.mubr.msk.f32.mxu0 %vm10582_vm3, %v14293_v36  ;;  %v11426_v29 = vadd.f32 %v9086_v13, %v1231_v14 }
 0x197   : > { %v9095_v37 = vpop.f32.mrf.mxu1  ;;  %v9063_v11 = vpop.f32.mrf.mxu0 }
 0x198   : > { %9428 = vmatpush3.xpose.msra.mxu1 %v11019_v20  ;;  %v1245_v1 = vadd.f32 %v9063_v11, %v11342_v7 }
 0x199   : > { %9389 = vmatpush3.xpose.msra.mxu0 %v11071_v0  ;;  %v11431_v48 = vpop.f32.mrf.mxu1  ;;  %9429 = vmatprep.subr.mxu1 %v14293_v36  ;;  %v11434_v63 = vpop.f32.mrf.mxu0 }
 0x19a   : > { %14482 = vst [vmem:[#allocation98_spill] sm:$0xff] %v11431_v48  ;;  %9390 = vmatprep.subr.mxu0 %v14293_v36  ;;  %v11437_v28 = vadd.f32 %v9089_v24, %v1245_v1 }
 0x19b   : > { %v9098_v46 = vpop.f32.mrf.mxu1  ;;  %v9066_v13 = vpop.f32.mrf.mxu0 }
 0x19c   : > { %9430 = vmatpush3.xpose.msra.mxu1 %v10983_v19  ;;  %v1259_v14 = vadd.f32 %v9066_v13, %v11352_v62 }
 0x19d   : > { %9391 = vmatpush3.xpose.msra.mxu0 %v11033_v57  ;;  %v11442_v7 = vpop.f32.mrf.mxu1  ;;  %9431 = vmatprep.subr.mxu1 %v14293_v36  ;;  %v11445_v11 = vpop.f32.mrf.mxu0 }
 0x19e   : > { %14483 = vst [vmem:[#allocation99_spill] sm:$0xff] %v11442_v7  ;;  %9392 = vmatprep.subr.mxu0 %v14293_v36  ;;  %v11448_v48 = vadd.f32 %v9092_v45, %v1259_v14 }
 0x19f   : > { %v9101_v0 = vpop.f32.mrf.mxu1  ;;  %v9069_v24 = vpop.f32.mrf.mxu0 }
 0x1a0   : > { %9432 = vmatpush3.xpose.msra.mxu1 %v10985_v2  ;;  %v1273_v1 = vadd.f32 %v9069_v24, %v11362_v47 }
 0x1a1   : > { %9393 = vmatpush3.xpose.msra.mxu0 %v11036_v4  ;;  %v11453_v62 = vpop.f32.mrf.mxu1  ;;  %9433 = vmatprep.subr.mxu1 %v14293_v36  ;;  %v11456_v13 = vpop.f32.mrf.mxu0 }
 0x1a2   : > { %14484 = vst [vmem:[#allocation100_spill] sm:$0xff] %v11453_v62  ;;  %9394 = vmatprep.subr.mxu0 %v14293_v36  ;;  %v11459_v7 = vadd.f32 %v9095_v37, %v1273_v1 }
 0x1a3   : > { %v9104_v57 = vpop.f32.mrf.mxu1  ;;  %v9072_v45 = vpop.f32.mrf.mxu0 }
 0x1a4   : > { %9434 = vmatpush3.xpose.msra.mxu1 %v10947_v58  ;;  %v1287_v14 = vadd.f32 %v9072_v45, %v11372_v27 }
 0x1a5   : > { %9395 = vmatpush3.xpose.msra.mxu0 %v10999_v38  ;;  %v11464_v47 = vpop.f32.mrf.mxu1  ;;  %9435 = vmatprep.subr.mxu1 %v14293_v36  ;;  %v11467_v24 = vpop.f32.mrf.mxu0 }
 0x1a6   : > { %14485 = vst [vmem:[#allocation101_spill] sm:$0xff] %v11464_v47  ;;  %9396 = vmatprep.subr.mxu0 %v14293_v36  ;;  %v11470_v62 = vadd.f32 %v9098_v46, %v1287_v14 }
 0x1a7   : > { %v9107_v4 = vpop.f32.mrf.mxu1  ;;  %v9075_v37 = vpop.f32.mrf.mxu0 }
 0x1a8   : > { %9436 = vmatpush3.xpose.msra.mxu1 %v10949_v59  ;;  %v1301_v1 = vadd.f32 %v9075_v37, %v11382_v3 }
 0x1a9   : > { %9397 = vmatpush3.xpose.msra.mxu0 %v11002_v39  ;;  %v11475_v27 = vpop.f32.mrf.mxu1  ;;  %9437 = vmatprep.subr.mxu1 %v14293_v36  ;;  %v11478_v45 = vpop.f32.mrf.mxu0 }
 0x1aa   : > { %14486 = vst [vmem:[#allocation102_spill] sm:$0xff] %v11475_v27  ;;  %9398 = vmatprep.subr.mxu0 %v14293_v36  ;;  %v11481_v47 = vadd.f32 %v9101_v0, %v1301_v1 }
 0x1ab   : > { %v9138_v38 = vpop.f32.mrf.mxu1  ;;  %v9078_v46 = vpop.f32.mrf.mxu0 }
 0x1ac   : > { %9438 = vmatpush3.xpose.msra.mxu1 %v10914_v53  ;;  %v1315_v14 = vadd.f32 %v9078_v46, %v11395_v25 }
 0x1ad   : > { %9399 = vmatpush3.xpose.msra.mxu0 %v10965_v54  ;;  %v11486_v3 = vpop.f32.mrf.mxu1  ;;  %9439 = vmatprep.subr.mxu1 %v14293_v36  ;;  %v11489_v37 = vpop.f32.mrf.mxu0 }
 0x1ae   : > { %14487 = vst [vmem:[#allocation103_spill] sm:$0xff] %v11486_v3  ;;  %9400 = vmatprep.subr.mxu0 %v14293_v36  ;;  %v11492_v27 = vadd.f32 %v9104_v57, %v1315_v14 }
 0x1af   : > { %v9141_v39 = vpop.f32.mrf.mxu1  ;;  %v9081_v0 = vpop.f32.mrf.mxu0 }
 0x1b0   : > { %9440 = vmatpush3.xpose.msra.mxu1 %v10916_v6  ;;  %v1329_v1 = vadd.f32 %v9081_v0, %v11405_v5 }
 0x1b1   : > { %9401 = vmatpush3.xpose.msra.mxu0 %v10968_v55  ;;  %v11497_v25 = vpop.f32.mrf.mxu1  ;;  %9441 = vmatprep.subr.mxu1 %v14293_v36  ;;  %v11500_v46 = vpop.f32.mrf.mxu0 }
 0x1b2   : > { %14488 = vst [vmem:[#allocation104_spill] sm:$0xff] %v11497_v25  ;;  %9402 = vmatprep.subr.mxu0 %v14293_v36  ;;  %v11503_v3 = vadd.f32 %v9107_v4, %v1329_v1 }
 0x1b3   : > { %v9144_v54 = vpop.f32.mrf.mxu1  ;;  %v9112_v57 = vpop.f32.mrf.mxu0 }
 0x1b4   : > { %9442 = vmatpush3.xpose.msra.mxu1 %v10879_v41  ;;  %v1603_v14 = vadd.f32 %v9112_v57, %v11426_v29 }
 0x1b5   : > { %9403 = vmatpush3.xpose.msra.mxu0 %v10929_v17  ;;  %v11508_v5 = vpop.f32.mrf.mxu1  ;;  %9443 = vmatprep.subr.mxu1 %v14293_v36  ;;  %v11511_v0 = vpop.f32.mrf.mxu0 }
 0x1b6   : > { %9404 = vmatprep.subr.mxu0 %v14293_v36  ;;  %v11514_v55 = vadd.f32 %v9138_v38, %v1603_v14 }
 0x1b7   : > { %v9147_v25 = vpop.f32.mrf.mxu1  ;;  %v9115_v4 = vpop.f32.mrf.mxu0 }
 0x1b8   : > { %14489 = vst [vmem:[#allocation105_spill] sm:$0xff] %v11514_v55  ;;  %9444 = vmatpush3.xpose.msra.mxu1 %v10881_v42  ;;  %v1615_v1 = vadd.f32 %v9115_v4, %v11437_v28 }
 0x1b9   : > { %9405 = vmatpush3.xpose.msra.mxu0 %v10932_v18  ;;  %v11519_v29 = vpop.f32.mrf.mxu1  ;;  %9445 = vmatprep.subr.mxu1 %v14293_v36  ;;  %v11522_v57 = vpop.f32.mrf.mxu0 }
 0x1ba   : > { %9406 = vmatprep.subr.mxu0 %v14293_v36  ;;  %v11525_v17 = vadd.f32 %v9141_v39, %v1615_v1 }
 0x1bb   : > { %v9150_v38 = vpop.f32.mrf.mxu1  ;;  %v9118_v14 = vpop.f32.mrf.mxu0 }
 0x1bc   : > { %14490 = vst [vmem:[#allocation106_spill] sm:$0xff] %v11525_v17  ;;  %9446 = vmatpush3.xpose.msra.mxu1 %v10846_v22  ;;  %v1627_v55 = vadd.f32 %v9118_v14, %v11448_v48 }
 0x1bd   : > { %9407 = vmatpush3.xpose.msra.mxu0 %v10896_v49  ;;  %v11530_v28 = vpop.f32.mrf.mxu1  ;;  %9447 = vmatprep.subr.mxu1 %v14293_v36  ;;  %v11533_v4 = vpop.f32.mrf.mxu0 }
 0x1be   : > { %9408 = vmatprep.subr.mxu0 %v14293_v36  ;;  %v11536_v18 = vadd.f32 %v9144_v54, %v1627_v55 }
 0x1bf   : > { %v9153_v39 = vpop.f32.mrf.mxu1  ;;  %v9121_v1 = vpop.f32.mrf.mxu0 }
 0x1c0   : > { %14491 = vst [vmem:[#allocation107_spill] sm:$0xff] %v11536_v18  ;;  %9448 = vmatpush3.xpose.msra.mxu1 %v10807_v60  ;;  %v1639_v17 = vadd.f32 %v9121_v1, %v11459_v7 }
 0x1c1   : > { %9409 = vmatpush3.xpose.msra.mxu0 %v10899_v50  ;;  %v11541_v48 = vpop.f32.mrf.mxu1  ;;  %9449 = vmatprep.subr.mxu1 %v14293_v36  ;;  %v11544_v14 = vpop.f32.mrf.mxu0 }
 0x1c2   : > { %9410 = vmatprep.subr.mxu0 %v14293_v36  ;;  %v11547_v49 = vadd.f32 %v9147_v25, %v1639_v17 }
 0x1c3   : > { %v9156_v54 = vpop.f32.mrf.mxu1  ;;  %v9124_v55 = vpop.f32.mrf.mxu0 }
 0x1c4   : > { %14492 = vst [vmem:[#allocation108_spill] sm:$0xff] %v11547_v49  ;;  %9450 = vmatpush3.xpose.msra.mxu1 %v10848_v23  ;;  %v1651_v18 = vadd.f32 %v9124_v55, %v11470_v62 }
 0x1c5   : > { %9411 = vmatpush3.xpose.msra.mxu0 %v10863_v31  ;;  %v11552_v7 = vpop.f32.mrf.mxu1  ;;  %9451 = vmatprep.subr.mxu1 %v14293_v36  ;;  %v11555_v1 = vpop.f32.mrf.mxu0 }
 0x1c6   : > { %14493 = vst [vmem:[#allocation109_spill] sm:$0xff] %v11552_v7  ;;  %9412 = vmatprep.subr.mxu0 %v14293_v36  ;;  %v11558_v50 = vadd.f32 %v9150_v38, %v1651_v18  ;;  %v14495_v38 = vld [vmem:[#allocation11_spill] sm:$0xff] }
 0x1c7   : > { %v9159_v17 = vpop.f32.mrf.mxu1  ;;  %v9127_v25 = vpop.f32.mrf.mxu0 }
 0x1c8   : > { %9452 = vmatpush3.xpose.msra.mxu1 %v10809_v61  ;;  %v1663_v49 = vadd.f32 %v9127_v25, %v11481_v47 }
 0x1c9   : > { %9413 = vmatpush3.xpose.msra.mxu0 %v10827_v10  ;;  %v11563_v62 = vpop.f32.mrf.mxu1  ;;  %9491 = vmatprep.subr.mxu1 %v14293_v36  ;;  %v11566_v55 = vpop.f32.mrf.mxu0 }
 0x1ca   : > { %14494 = vst [vmem:[#allocation110_spill] sm:$0xff] %v11563_v62  ;;  %9414 = vmatprep.subr.mxu0 %v14293_v36  ;;  %v11569_v31 = vadd.f32 %v9153_v39, %v1663_v49 }
 0x1cb   : > { %v11571_v18 = vpop.f32.mrf.mxu1  ;;  %9454 = vmatmul.mubr.f32.vlgmr.msra.gmra.mxu1 %v14495_v38  ;;  %v9130_v7 = vpop.f32.mrf.mxu0 }
 0x1cc   : > { %9492 = vmatpush3.xpose.msra.mxu1 %v11047_v52  ;;  %9523 = vmatprep.mubr.msk.f32.mxu1 %vm10582_vm3, %v14293_v36  ;;  %v1675_v47 = vadd.f32 %v9130_v7, %v11492_v27 }
 0x1cd   : > { %9415 = vmatpush3.xpose.msra.mxu0 %v10866_v32  ;;  %v11579_v25 = vpop.f32.mrf.mxu1  ;;  %9493 = vmatprep.subr.mxu1 %v14293_v36  ;;  %v11582_v49 = vpop.f32.mrf.mxu0 }
 0x1ce   : > { %9416 = vmatprep.subr.mxu0 %v14293_v36  ;;  %v11585_v39 = vadd.f32 %v9156_v54, %v1675_v47 }
 0x1cf   : > { %v11587_v38 = vpop.f32.mrf.mxu1  ;;  %v9133_v10 = vpop.f32.mrf.mxu0 }
 0x1d0   : > { %14496 = vst [vmem:[#allocation11_spill] sm:$0xff] %v11585_v39  ;;  %9494 = vmatpush3.xpose.msra.mxu1 %v11049_v51  ;;  %v1687_v62 = vadd.f32 %v9133_v10, %v11503_v3  ;;  %v14499_v39 = vld [vmem:[#allocation10_spill] sm:$0xff] }
 0x1d1   : > { %9417 = vmatpush3.xpose.msra.mxu0 %v10830_v12  ;;  %v11592_v27 = vpop.f32.mrf.mxu1  ;;  %9495 = vmatprep.subr.mxu1 %v14293_v36  ;;  %v11595_v7 = vpop.f32.mrf.mxu0 }
 0x1d2   : > { %14497 = vst [vmem:[#allocation111_spill] sm:$0xff] %v11595_v7  ;;  %9456 = vmatprep.subr.mxu0 %v14293_v36  ;;  %v11598_v32 = vadd.f32 %v9159_v17, %v1687_v62 }
 0x1d3   : > { %v11600_v54 = vpop.f32.mrf.mxu1  ;;  %v11602_v47 = vpop.f32.mrf.mxu0 }
 0x1d4   : > { %14498 = vst [vmem:[#allocation112_spill] sm:$0xff] %v11598_v32  ;;  %9419 = vmatmul.mubr.f32.vlgmr.msra.gmra.mxu0 %v14499_v39  ;;  %9496 = vmatpush3.xpose.msra.mxu1 %v11017_v8 }
 0x1d5   : > { %9457 = vmatpush3.xpose.msra.mxu0 %v11089_v44  ;;  %v11607_v10 = vpop.f32.mrf.mxu1  ;;  %9497 = vmatprep.subr.mxu1 %v14293_v36  ;;  %v11610_v3 = vpop.f32.mrf.mxu0 }
 0x1d6   : > { %9458 = vmatprep.subr.mxu0 %v14293_v36  ;;  %9488 = vmatprep.mubr.msk.f32.mxu0 %vm10582_vm3, %v14293_v36 }
 0x1d7   : > { %v11615_v17 = vpop.f32.mrf.mxu1  ;;  %v11617_v62 = vpop.f32.mrf.mxu0 }
 0x1d8   : > { %9498 = vmatpush3.xpose.msra.mxu1 %v11019_v20 }
 0x1d9   : > { %9459 = vmatpush3.xpose.msra.mxu0 %v11082_v35  ;;  %v11621_v39 = vpop.f32.mrf.mxu1  ;;  %9499 = vmatprep.subr.mxu1 %v14293_v36  ;;  %v11624_v44 = vpop.f32.mrf.mxu0 }
 0x1da   : > { %14500 = vst [vmem:[#allocation10_spill] sm:$0xff] %v11621_v39  ;;  %9460 = vmatprep.subr.mxu0 %v14293_v36 }
 0x1db   : > { %v11627_v12 = vpop.f32.mrf.mxu1  ;;  %v11629_v32 = vpop.f32.mrf.mxu0 }
 0x1dc   : > { %14501 = vst [vmem:[#allocation113_spill] sm:$0xff] %v11627_v12  ;;  %9500 = vmatpush3.xpose.msra.mxu1 %v10983_v19  ;;  %v14540_v12 = vld [vmem:[#allocation85_spill] sm:$0xff] }
 0x1dd   : > { %9461 = vmatpush3.xpose.msra.mxu0 %v11065_v9  ;;  %v11633_v7 = vpop.f32.mrf.mxu1  ;;  %9501 = vmatprep.subr.mxu1 %v14293_v36  ;;  %v11636_v35 = vpop.f32.mrf.mxu0 }
 0x1de   : > { %14502 = vst [vmem:[#allocation114_spill] sm:$0xff] %v11633_v7  ;;  %9462 = vmatprep.subr.mxu0 %v14293_v36 }
 0x1df   : > { %v11639_v20 = vpop.f32.mrf.mxu1  ;;  %v11641_v8 = vpop.f32.mrf.mxu0 }
 0x1e0   : > { %14503 = vst [vmem:[#allocation115_spill] sm:$0xff] %v11639_v20  ;;  %9502 = vmatpush3.xpose.msra.mxu1 %v10985_v2 }
 0x1e1   : > { %9463 = vmatpush3.xpose.msra.mxu0 %v11053_v21  ;;  %v11645_v51 = vpop.f32.mrf.mxu1  ;;  %9503 = vmatprep.subr.mxu1 %v14293_v36  ;;  %v11648_v9 = vpop.f32.mrf.mxu0 }
 0x1e2   : > { %14504 = vst [vmem:[#allocation116_spill] sm:$0xff] %v11645_v51  ;;  %9464 = vmatprep.subr.mxu0 %v14293_v36 }
 0x1e3   : > { %v11651_v19 = vpop.f32.mrf.mxu1  ;;  %v11653_v7 = vpop.f32.mrf.mxu0 }
 0x1e4   : > { %14505 = vst [vmem:[#allocation117_spill] sm:$0xff] %v11651_v19  ;;  %14506 = vst [vmem:[#allocation118_spill] sm:$0xff] %v11653_v7  ;;  %9504 = vmatpush3.xpose.msra.mxu1 %v10947_v58 }
 0x1e5   : > { %9465 = vmatpush3.xpose.msra.mxu0 %v11030_v56  ;;  %v11657_v20 = vpop.f32.mrf.mxu1  ;;  %9505 = vmatprep.subr.mxu1 %v14293_v36  ;;  %v11660_v21 = vpop.f32.mrf.mxu0 }
 0x1e6   : > { %14507 = vst [vmem:[#allocation119_spill] sm:$0xff] %v11657_v20  ;;  %14508 = vst [vmem:[#allocation120_spill] sm:$0xff] %v11660_v21  ;;  %9466 = vmatprep.subr.mxu0 %v14293_v36 }
 0x1e7   : > { %v11663_v2 = vpop.f32.mrf.mxu1  ;;  %v11665_v51 = vpop.f32.mrf.mxu0 }
 0x1e8   : > { %14509 = vst [vmem:[#allocation121_spill] sm:$0xff] %v11663_v2  ;;  %14510 = vst [vmem:[#allocation122_spill] sm:$0xff] %v11665_v51  ;;  %9506 = vmatpush3.xpose.msra.mxu1 %v10949_v59 }
 0x1e9   : > { %9467 = vmatpush3.xpose.msra.mxu0 %v11025_v26  ;;  %v11669_v19 = vpop.f32.mrf.mxu1  ;;  %9507 = vmatprep.subr.mxu1 %v14293_v36  ;;  %v11672_v56 = vpop.f32.mrf.mxu0 }
 0x1ea   : > { %14511 = vst [vmem:[#allocation123_spill] sm:$0xff] %v11669_v19  ;;  %14512 = vst [vmem:[#allocation124_spill] sm:$0xff] %v11672_v56  ;;  %9468 = vmatprep.subr.mxu0 %v14293_v36  ;;  %v14531_v56 = vld [vmem:[#allocation81_spill] sm:$0xff] }
 0x1eb   : > { %v11675_v58 = vpop.f32.mrf.mxu1  ;;  %v11677_v20 = vpop.f32.mrf.mxu0 }
 0x1ec   : > { %14513 = vst [vmem:[#allocation125_spill] sm:$0xff] %v11677_v20  ;;  %9508 = vmatpush3.xpose.msra.mxu1 %v10914_v53 }
 0x1ed   : > { %9469 = vmatpush3.xpose.msra.mxu0 %v10992_v34  ;;  %v11681_v2 = vpop.f32.mrf.mxu1  ;;  %9509 = vmatprep.subr.mxu1 %v14293_v36  ;;  %v11684_v26 = vpop.f32.mrf.mxu0 }
 0x1ee   : > { %14514 = vst [vmem:[#allocation126_spill] sm:$0xff] %v11684_v26  ;;  %9470 = vmatprep.subr.mxu0 %v14293_v36 }
 0x1ef   : > { %v11687_v59 = vpop.f32.mrf.mxu1  ;;  %v11689_v19 = vpop.f32.mrf.mxu0 }
 0x1f0   : > { %14515 = vst [vmem:[#allocation127_spill] sm:$0xff] %v11689_v19  ;;  %9510 = vmatpush3.xpose.msra.mxu1 %v10916_v6 }
 0x1f1   : > { %9471 = vmatpush3.xpose.msra.mxu0 %v10989_v33  ;;  %v11693_v20 = vpop.f32.mrf.mxu1  ;;  %9511 = vmatprep.subr.mxu1 %v14293_v36  ;;  %v11696_v34 = vpop.f32.mrf.mxu0 }
 0x1f2   : > { %14516 = vst [vmem:[#allocation128_spill] sm:$0xff] %v11693_v20  ;;  %14517 = vst [vmem:[#allocation129_spill] sm:$0xff] %v11696_v34  ;;  %9472 = vmatprep.subr.mxu0 %v14293_v36 }
 0x1f3   : > { %v11699_v53 = vpop.f32.mrf.mxu1  ;;  %v11701_v26 = vpop.f32.mrf.mxu0 }
 0x1f4   : > { %14518 = vst [vmem:[#allocation130_spill] sm:$0xff] %v11699_v53  ;;  %9512 = vmatpush3.xpose.msra.mxu1 %v10879_v41 }
 0x1f5   : > { %9473 = vmatpush3.xpose.msra.mxu0 %v10957_v43  ;;  %v11705_v19 = vpop.f32.mrf.mxu1  ;;  %9513 = vmatprep.subr.mxu1 %v14293_v36  ;;  %v11708_v33 = vpop.f32.mrf.mxu0 }
 0x1f6   : > { %14519 = vst [vmem:[#allocation131_spill] sm:$0xff] %v11705_v19  ;;  %9474 = vmatprep.subr.mxu0 %v14293_v36 }
 0x1f7   : > { %v11711_v6 = vpop.f32.mrf.mxu1  ;;  %v11713_v34 = vpop.f32.mrf.mxu0 }
 0x1f8   : > { %14520 = vst [vmem:[#allocation132_spill] sm:$0xff] %v11711_v6  ;;  %9514 = vmatpush3.xpose.msra.mxu1 %v10881_v42 }
 0x1f9   : > { %9475 = vmatpush3.xpose.msra.mxu0 %v10954_v40  ;;  %v11717_v53 = vpop.f32.mrf.mxu1  ;;  %9515 = vmatprep.subr.mxu1 %v14293_v36  ;;  %v11720_v43 = vpop.f32.mrf.mxu0 }
 0x1fa   : > { %14521 = vst [vmem:[#allocation133_spill] sm:$0xff] %v11717_v53  ;;  %9476 = vmatprep.subr.mxu0 %v14293_v36 }
 0x1fb   : > { %v11723_v41 = vpop.f32.mrf.mxu1  ;;  %v11725_v19 = vpop.f32.mrf.mxu0 }
 0x1fc   : > { %14522 = vst [vmem:[#allocation134_spill] sm:$0xff] %v11723_v41  ;;  %14523 = vst [vmem:[#allocation135_spill] sm:$0xff] %v11725_v19  ;;  %9516 = vmatpush3.xpose.msra.mxu1 %v10846_v22  ;;  %v1060_v41 = vadd.f32 %v11318_v30, %v11338_v15  ;;  %v14528_v22 = vld [vmem:[#allocation36_spill] sm:$0xff]  ;;  %v14538_v15 = vld [vmem:[#allocation83_spill] sm:$0xff] }
 0x1fd   : > { %9477 = vmatpush3.xpose.msra.mxu0 %v10926_v16  ;;  %v11729_v6 = vpop.f32.mrf.mxu1  ;;  %9517 = vmatprep.subr.mxu1 %v14293_v36  ;;  %v11732_v40 = vpop.f32.mrf.mxu0  ;;  %v14537_v30 = vld [vmem:[#allocation88_spill] sm:$0xff] }
 0x1fe   : > { %14524 = vst [vmem:[#allocation136_spill] sm:$0xff] %v11729_v6  ;;  %14525 = vst [vmem:[#allocation137_spill] sm:$0xff] %v11732_v40  ;;  %9478 = vmatprep.subr.mxu0 %v14293_v36  ;;  %v14530_v6 = vld [vmem:[#allocation84_spill] sm:$0xff] }
 0x1ff   : > { %v11735_v42 = vpop.f32.mrf.mxu1  ;;  %v11737_v53 = vpop.f32.mrf.mxu0  ;;  %v1072_v40 = vadd.f32 %v14531_v56, %v14530_v6  ;;  %v14541_v56 = vld [vmem:[#allocation92_spill] sm:$0xff] }
 0x200   : > { %14526 = vst [vmem:[#allocation138_spill] sm:$0xff] %v11735_v42  ;;  %14527 = vst [vmem:[#allocation139_spill] sm:$0xff] %v11737_v53  ;;  %9518 = vmatpush3.xpose.msra.mxu1 %v10807_v60  ;;  %v14533_v42 = vld [vmem:[#allocation86_spill] sm:$0xff]  ;;  %v14535_v60 = vld [vmem:[#allocation97_spill] sm:$0xff] }
 0x201   : > { %9479 = vmatpush3.xpose.msra.mxu0 %v14528_v22  ;;  %v11743_v16 = vpop.f32.mrf.mxu1  ;;  %9519 = vmatprep.subr.mxu1 %v14293_v36  ;;  %v11748_v51 = vpop.f32.mrf.mxu0  ;;  %v14534_v53 = vld [vmem:[#allocation82_spill] sm:$0xff]  ;;  %v1224_v19 = vadd.f32 %v14535_v60, %v1060_v41  ;;  %v1096_v22 = vadd.f32 %v14538_v15, %v14537_v30  ;;  %v1238_v39 = vadd.f32 %v11434_v63, %v1072_v40  ;;  %v14543_v60 = vld [vmem:[#allocation28_spill] sm:$0xff]  ;;  %v14546_v63 = vld [vmem:[#allocation93_spill] sm:$0xff] }
 0x202   : > { %14529 = vst [vmem:[#allocation140_spill] sm:$0xff] %v11743_v16  ;;  %14532 = vst [vmem:[#allocation84_spill] sm:$0xff] %v11748_v51  ;;  %9480 = vmatprep.subr.mxu0 %v14293_v36  ;;  %v1084_v20 = vadd.f32 %v14534_v53, %v14533_v42  ;;  %v14539_v16 = vld [vmem:[#allocation90_spill] sm:$0xff]  ;;  %v14542_v36 = vld [vmem:[#allocation87_spill] sm:$0xff]  ;;  %v14545_v53 = vmov 0.0  }
 0x203   : > { %v11754_v21 = vpop.f32.mrf.mxu1  ;;  %v1108_v7 = vadd.f32 %v14540_v12, %v14539_v16  ;;  %v11761_v6 = vpop.f32.mrf.mxu0  ;;  %v1120_v51 = vadd.f32 %v14542_v36, %v14541_v56  ;;  %v1266_v30 = vadd.f32 %v11456_v13, %v1096_v22  ;;  %v1403_v36 = vadd.f32 %v14546_v63, %v1224_v19  ;;  %v14550_v22 = vld [vmem:[#allocation89_spill] sm:$0xff]  ;;  %v14553_v19 = vld [vmem:[#allocation96_spill] sm:$0xff] }
 0x204   : > { %14536 = vst [vmem:[#allocation81_spill] sm:$0xff] %v11754_v21  ;;  %9520 = vmatpush3.xpose.msra.mxu1 %v10848_v23  ;;  %v1252_v42 = vadd.f32 %v11445_v11, %v1084_v20  ;;  %v14548_v20 = vld [vmem:[#allocation95_spill] sm:$0xff] }
 0x205   : > { %9481 = vmatpush3.xpose.msra.mxu0 %v14543_v60  ;;  %v11768_v41 = vpop.f32.mrf.mxu1  ;;  %9521 = vmatprep.subr.mxu1 %v14545_v53  ;;  %v1280_v12 = vadd.f32 %v11467_v24, %v1108_v7  ;;  %v11773_v16 = vpop.f32.mrf.mxu0  ;;  %v1294_v40 = vadd.f32 %v11478_v45, %v1120_v51  ;;  %v1419_v11 = vadd.f32 %v14548_v20, %v1238_v39  ;;  %v14549_v60 = vld [vmem:[#allocation94_spill] sm:$0xff]  ;;  %v14551_v7 = vld [vmem:[#allocation12_spill] sm:$0xff]  ;;  %v14554_v45 = vld [vmem:[#allocation91_spill] sm:$0xff] }
 0x206   : > { %14544 = vst [vmem:[#allocation86_spill] sm:$0xff] %v11768_v41  ;;  %9482 = vmatprep.subr.mxu0 %v14545_v53  ;;  %v1132_v13 = vadd.f32 %v14550_v22, %v14549_v60  ;;  %v1597_v24 = vadd.f32 %v11511_v0, %v1403_v36  ;;  %v1435_v23 = vadd.f32 %v14551_v7, %v1252_v42  ;;  %v14552_v41 = vld [vmem:[#allocation21_spill] sm:$0xff]  ;;  %v14555_v20 = vld [vmem:[#allocation98_spill] sm:$0xff]  ;;  %v14557_v36 = vld [vmem:[#allocation100_spill] sm:$0xff] }
 0x207   : > { %v11778_v15 = vpop.f32.mrf.mxu1  ;;  %v11781_v56 = vpop.f32.mrf.mxu0  ;;  %v1144_v39 = vadd.f32 %v14554_v45, %v14553_v19  ;;  %v1609_v63 = vadd.f32 %v11522_v57, %v1419_v11  ;;  %v1483_v22 = vadd.f32 %v14557_v36, %v1294_v40  ;;  %v14559_v11 = vld [vmem:[#allocation80_spill] sm:$0xff]  ;;  %v14561_v40 = vld [vmem:[#allocation27_spill] sm:$0xff]  ;;  %v14565_v36 = vld [vmem:[#allocation102_spill] sm:$0xff] }
 0x208   : > { %14547 = vst [vmem:[#allocation82_spill] sm:$0xff] %v11778_v15  ;;  %9522 = vmatpush3.xpose.msra.mxu1 %v10809_v61  ;;  %v1451_v61 = vadd.f32 %v14555_v20, %v1266_v30  ;;  %v14556_v15 = vld [vmem:[#allocation99_spill] sm:$0xff]  ;;  %v1308_v0 = vadd.f32 %v11489_v37, %v1132_v13  ;;  %v1621_v42 = vadd.f32 %v11533_v4, %v1435_v23 }
 0x209   : > { %9483 = vmatpush3.xpose.msra.mxu0 %v14552_v41  ;;  %v11789_v51 = vpop.f32.mrf.mxu1  ;;  %9561 = vmatprep.subr.mxu1 %v14545_v53  ;;  %v1467_v21 = vadd.f32 %v14556_v15, %v1280_v12  ;;  %v11797_v60 = vpop.f32.mrf.mxu0  ;;  %v14558_v41 = vld [vmem:[#allocation9_spill] sm:$0xff]  ;;  %v1322_v57 = vadd.f32 %v11500_v46, %v1144_v39  ;;  %v14560_v23 = vld [vmem:[#allocation103_spill] sm:$0xff]  ;;  %v2160_v4 = vadd.f32 %v11571_v18, %v11602_v47 }
 0x20a   : > { %9484 = vmatprep.subr.mxu0 %v14545_v53  ;;  %v1633_v30 = vadd.f32 %v11544_v14, %v1451_v61  ;;  %v11815_v37 = vadd.f32 %v14560_v23, %v1597_v24  ;;  %v14562_v61 = vld [vmem:[#allocation104_spill] sm:$0xff]  ;;  %v1657_v14 = vadd.f32 %v11566_v55, %v1483_v22  ;;  %v11831_v13 = vadd.f32 %v11508_v5, %v1621_v42  ;;  %v14563_v24 = vld [vmem:[#allocation101_spill] sm:$0xff] }
 0x20b   : > { %v11803_v7 = vpop.f32.mrf.mxu1  ;;  %9524 = vmatmul.mubr.f32.vlgmr.msra.gmra.mxu1 %v14558_v41  ;;  %v1645_v12 = vadd.f32 %v11555_v1, %v1467_v21  ;;  %v11809_v15 = vpop.f32.mrf.mxu0  ;;  %v11824_v21 = vadd.f32 %v14562_v61, %v1609_v63  ;;  %v1499_v18 = vadd.f32 %v14563_v24, %v1308_v0  ;;  %v2154_v47 = vadd.f32 %v11579_v25, %v11610_v3  ;;  %v14564_v39 = vld [vmem:[#allocation105_spill] sm:$0xff] }
 0x20c   : > { %9562 = vmatpush3.xpose.msra.mxu1 %v14559_v11  ;;  %9593 = vmatprep.mubr.msk.f32.mxu1 %vm10582_vm3, %v14545_v53  ;;  %v2325_v19 = vadd.f32 %v11701_v26, %v2160_v4  ;;  %v2947_v63 = vmin.f32 %v14564_v39, 1.0  ;;  %v11841_v55 = vadd.f32 %v11519_v29, %v1633_v30  ;;  %v11847_v5 = vadd.f32 %v14565_v36, %v1322_v57  ;;  %v14566_v0 = vld [vmem:[#allocation77_spill] sm:$0xff]  ;;  %v14567_v26 = vld [vmem:[#allocation106_spill] sm:$0xff]  ;;  %v14568_v30 = vld [vmem:[#allocation20_spill] sm:$0xff] }
 0x20d   : > { %9485 = vmatpush3.xpose.msra.mxu0 %v14561_v40  ;;  %v11820_v46 = vpop.f32.mrf.mxu1  ;;  %9563 = vmatprep.subr.mxu1 %v14545_v53  ;;  %v11827_v1 = vpop.f32.mrf.mxu0  ;;  %v11844_v20 = vadd.f32 %v11530_v28, %v1645_v12  ;;  %v2172_v22 = vadd.f32 %v11587_v38, %v11617_v62  ;;  %v2318_v29 = vadd.f32 %v11708_v33, %v2154_v47  ;;  %v14569_v12 = vld [vmem:[#allocation107_spill] sm:$0xff]  ;;  %v14570_v36 = vld [vmem:[#allocation108_spill] sm:$0xff]  ;;  %v14571_v33 = vld [vmem:[#allocation78_spill] sm:$0xff] }
 0x20e   : > { %9486 = vmatprep.subr.mxu0 %v14545_v53  ;;  %v11864_v23 = vadd.f32 %v11541_v48, %v1657_v14  ;;  %v1669_v4 = vadd.f32 %v11582_v49, %v1499_v18  ;;  %v2166_v38 = vadd.f32 %v11592_v27, %v11624_v44  ;;  %v2505_v24 = vadd.f32 %v11675_v58, %v2325_v19  ;;  %v14572_v18 = vld [vmem:[#allocation109_spill] sm:$0xff]  ;;  %v14577_v44 = vld [vmem:[#allocation114_spill] sm:$0xff]  ;;  %v14578_v14 = vld [vmem:[#allocation135_spill] sm:$0xff] }
 0x20f   : > { %v11837_v45 = vpop.f32.mrf.mxu1  ;;  %v11849_v42 = vpop.f32.mrf.mxu0  ;;  %v2339_v62 = vadd.f32 %v11713_v34, %v2172_v22  ;;  %v2497_v27 = vadd.f32 %v11681_v2, %v2318_v29  ;;  %v2196_v2 = vadd.f32 %v11615_v17, %v11641_v8  ;;  %v14576_v22 = vld [vmem:[#allocation120_spill] sm:$0xff]  ;;  %v14579_v8 = vld [vmem:[#allocation73_spill] sm:$0xff]  ;;  %v14594_v39 = vld [vmem:[#allocation75_spill] sm:$0xff] }
 0x210   : > { %9564 = vmatpush3.xpose.msra.mxu1 %v14566_v0  ;;  %v2332_v34 = vadd.f32 %v11720_v43, %v2166_v38  ;;  %v2178_v43 = vadd.f32 %v11607_v10, %v11636_v35  ;;  %v14574_v35 = vld [vmem:[#allocation118_spill] sm:$0xff]  ;;  %v14575_v10 = vld [vmem:[#allocation113_spill] sm:$0xff]  ;;  %v2202_v49 = vadd.f32 %v14577_v44, %v14576_v22  ;;  %v14584_v22 = vld [vmem:[#allocation124_spill] sm:$0xff] }
 0x211   : > { %9487 = vmatpush3.xpose.msra.mxu0 %v14568_v30  ;;  %v11858_v28 = vpop.f32.mrf.mxu1  ;;  %9565 = vmatprep.subr.mxu1 %v14545_v53  ;;  %v11867_v61 = vpop.f32.mrf.mxu0 }
 0x212   : > { %9526 = vmatprep.subr.mxu0 %v14545_v53 }
 0x213   : > { %v11875_v47 = vpop.f32.mrf.mxu1  ;;  %v9268_v0 = vpop.f32.mrf.mxu0 }
 0x214   : > { %9489 = vmatmul.mubr.f32.vlgmr.msra.gmra.mxu0 %v14558_v41  ;;  %9566 = vmatpush3.xpose.msra.mxu1 %v14571_v33  ;;  %v2697_v58 = vadd.f32 %v9268_v0, %v2505_v24  ;;  %v11892_v41 = vadd.f32 %v14572_v18, %v1669_v4  ;;  %v2184_v33 = vadd.f32 %v11600_v54, %v11629_v32  ;;  %v14573_v32 = vld [vmem:[#allocation10_spill] sm:$0xff] }
 0x215   : > { %9527 = vmatpush3.xpose.msra.mxu0 %v11047_v52  ;;  %v11887_v19 = vpop.f32.mrf.mxu1  ;;  %9567 = vmatprep.subr.mxu1 %v14545_v53  ;;  %v2690_v38 = vpop.f32.mrf.mxu0  ;;  %v2521_v4 = vadd.f32 %v11687_v59, %v2339_v62  ;;  %v2190_v54 = vadd.f32 %v14573_v32, %v11648_v9  ;;  %v2208_v0 = vadd.f32 %v14575_v10, %v14574_v35  ;;  %v14580_v62 = vld [vmem:[#allocation65_spill] sm:$0xff]  ;;  %v14583_v32 = vld [vmem:[#allocation115_spill] sm:$0xff] }
 0x216   : > { %9528 = vmatprep.subr.mxu0 %v14545_v53  ;;  %9558 = vmatprep.mubr.msk.f32.mxu0 %vm10582_vm3, %v14545_v53  ;;  %v2859_v29 = vadd.f32 %v11803_v7, %v2697_v58  ;;  %v2691_v24 = vadd.f32 %v2690_v38, %v2497_v27  ;;  %v2353_v48 = vadd.f32 %v14578_v14, %v2184_v33  ;;  %v14581_v58 = vld [vmem:[#allocation128_spill] sm:$0xff]  ;;  %v14582_v38 = vld [vmem:[#allocation122_spill] sm:$0xff]  ;;  %v14586_v35 = vld [vmem:[#allocation137_spill] sm:$0xff] }
 0x217   : > { %v11905_v18 = vpop.f32.mrf.mxu1  ;;  %v9271_v11 = vpop.f32.mrf.mxu0  ;;  %v2513_v27 = vadd.f32 %v14581_v58, %v2332_v34  ;;  %v2220_v44 = vadd.f32 %v14583_v32, %v14582_v38  ;;  %v14585_v14 = vld [vmem:[#allocation116_spill] sm:$0xff]  ;;  %v2346_v10 = vadd.f32 %v14586_v35, %v2178_v43  ;;  %v14588_v38 = vld [vmem:[#allocation125_spill] sm:$0xff] }
 0x218   : > { %9568 = vmatpush3.xpose.msra.mxu1 %v14579_v8  ;;  %v2963_v17 = vmin.f32 %v2859_v29, 1.0  ;;  %v2853_v7 = vadd.f32 %v11820_v46, %v2691_v24  ;;  %v2709_v59 = vadd.f32 %v9271_v11, %v2521_v4  ;;  %v2214_v33 = vadd.f32 %v14585_v14, %v14584_v22  ;;  %v14587_v29 = vld [vmem:[#allocation139_spill] sm:$0xff]  ;;  %v14589_v32 = vld [vmem:[#allocation117_spill] sm:$0xff]  ;;  %v14590_v22 = vld [vmem:[#allocation126_spill] sm:$0xff] }
 0x219   : > { %9529 = vmatpush3.xpose.msra.mxu0 %v14580_v62  ;;  %v11918_v9 = vpop.f32.mrf.mxu1  ;;  %9569 = vmatprep.subr.mxu1 %v14545_v53  ;;  %v2367_v8 = vadd.f32 %v14587_v29, %v2196_v2  ;;  %v2702_v46 = vpop.f32.mrf.mxu0  ;;  %v2232_v57 = vadd.f32 %v14589_v32, %v14588_v38  ;;  %v14591_v14 = vld [vmem:[#allocation119_spill] sm:$0xff]  ;;  %v14592_v2 = vld [vmem:[#allocation84_spill] sm:$0xff]  ;;  %v14593_v29 = vld [vmem:[#allocation130_spill] sm:$0xff] }
 0x21a   : > { %9530 = vmatprep.subr.mxu0 %v14545_v53  ;;  %v2979_v11 = vsub.f32 %v2947_v63, %v2963_v17  ;;  %v2962_v34 = vmin.f32 %v2853_v7, 1.0  ;;  %v2871_v24 = vadd.f32 %v11837_v45, %v2709_v59  ;;  %v2703_v4 = vadd.f32 %v2702_v46, %v2513_v27  ;;  %v14597_v27 = vld [vmem:[#allocation58_spill] sm:$0xff]  ;;  %v14599_v38 = vld [vmem:[#allocation121_spill] sm:$0xff] }
 0x21b   : > { %v11931_v58 = vpop.f32.mrf.mxu1  ;;  %v11937_v43 = vadd.f32 %v14591_v14, %v14590_v22  ;;  %v2360_v35 = vadd.f32 %v14592_v2, %v2190_v54  ;;  %v2537_v3 = vadd.f32 %v14593_v29, %v2353_v48  ;;  %v9274_v25 = vpop.f32.mrf.mxu0  ;;  %v14596_v45 = vmin.f32 %v11815_v37, 1.0  ;;  %v14598_v54 = vld [vmem:[#allocation127_spill] sm:$0xff]  ;;  %v14601_v37 = vld [vmem:[#allocation132_spill] sm:$0xff] }
 0x21c   : > { %9570 = vmatpush3.xpose.msra.mxu1 %v14594_v39  ;;  %v11942_v63 = vmax.f32 %v2979_v11, 0.0  ;;  %v2965_v7 = vmin.f32 %v2871_v24, 1.0  ;;  %v2865_v59 = vadd.f32 %v11858_v28, %v2703_v4  ;;  %v11953_v48 = vadd.f32 %v14599_v38, %v14598_v54  ;;  %v14600_v22 = vld [vmem:[#allocation131_spill] sm:$0xff] }
 0x21d   : > { %v2978_v17 = vsub.f32 %v14596_v45, %v2962_v34  ;;  %9531 = vmatpush3.xpose.msra.mxu0 %v14597_v27  ;;  %v11948_v46 = vpop.f32.mrf.mxu1  ;;  %9571 = vmatprep.subr.mxu1 %v14545_v53  ;;  %v2721_v32 = vadd.f32 %v9274_v25, %v2537_v3  ;;  %v2529_v11 = vadd.f32 %v14600_v22, %v2346_v10  ;;  %v2714_v14 = vpop.f32.mrf.mxu0  ;;  %v14603_v4 = vmin.f32 %v14567_v26, 1.0  ;;  %v14604_v25 = vld [vmem:[#allocation69_spill] sm:$0xff]  ;;  %v14610_v22 = vld [vmem:[#allocation123_spill] sm:$0xff] }
 0x21e   : > { %14595 = vst [vmem:[#allocation97_spill] sm:$0xff] %v11942_v63  ;;  %9532 = vmatprep.subr.mxu0 %v14545_v53  ;;  %v2553_v34 = vadd.f32 %v14601_v37, %v2367_v8  ;;  %v2381_v28 = vadd.f32 %v11761_v6, %v2208_v0  ;;  %v2964_v29 = vmin.f32 %v2865_v59, 1.0  ;;  %v5013_v3 = vsel %vm709_vm0, %v11942_v63, -inf  ;;  %v14605_v8 = vld [vmem:[#allocation133_spill] sm:$0xff]  ;;  %v14606_v6 = vld [vmem:[#allocation11_spill] sm:$0xff] }
 0x21f   : > { %v11959_v24 = vmax.f32 %v2978_v17, 0.0  ;;  %v2981_v2 = vsub.f32 %v14603_v4, %v2965_v7  ;;  %v2883_v39 = vadd.f32 %v11875_v47, %v2721_v32  ;;  %v2715_v45 = vadd.f32 %v2714_v14, %v2529_v11  ;;  %v11964_v54 = vpop.f32.mrf.mxu1  ;;  %v9277_v10 = vpop.f32.mrf.mxu0  ;;  %v14608_v59 = vld [vmem:[#allocation59_spill] sm:$0xff]  ;;  %5014 = vmax.xlane.f32.xlu1 %v5013_v3  ;;  %v14609_v32 = vld [vmem:[#allocation129_spill] sm:$0xff] }
 0x220   : > { %9572 = vmatpush3.xpose.msra.mxu1 %v14604_v25  ;;  %v2545_v38 = vadd.f32 %v14605_v8, %v2360_v35  ;;  %v2959_v0 = vmin.f32 %v14606_v6, 1.0  ;;  %v2374_v17 = vadd.f32 %v11773_v16, %v2202_v49  ;;  %v14607_v26 = vmin.f32 %v11824_v21, 1.0 }
 0x221   : > { %14602 = vst [vmem:[#allocation88_spill] sm:$0xff] %v11959_v24  ;;  %9533 = vmatpush3.xpose.msra.mxu0 %v14608_v59  ;;  %v2733_v47 = vadd.f32 %v9277_v10, %v2553_v34  ;;  %v11977_v11 = vadd.f32 %v14610_v22, %v14609_v32  ;;  %v2967_v14 = vmin.f32 %v2883_v39, 1.0  ;;  %v2877_v37 = vadd.f32 %v11887_v19, %v2715_v45  ;;  %v2726_v4 = vpop.f32.mrf.mxu0  ;;  %v14612_v34 = vld [vmem:[#allocation134_spill] sm:$0xff]  ;;  %v2912_v10 = vpop.f32.mrf.mxu1 }
 0x222   : > { %v2980_v7 = vsub.f32 %v14607_v26, %v2964_v29  ;;  %v5010_v35 = vsel %vm709_vm0, %v11959_v24, -inf  ;;  %9534 = vmatprep.subr.mxu0 %v14545_v53  ;;  %9573 = vmatprep.subr.mxu1 %v14545_v53  ;;  %v2727_v49 = vadd.f32 %v2726_v4, %v2545_v38  ;;  %v2569_v29 = vadd.f32 %v14612_v34, %v2381_v28  ;;  %v14614_v26 = vld [vmem:[#allocation68_spill] sm:$0xff]  ;;  %v14615_v38 = vld [vmem:[#allocation49_spill] sm:$0xff] }
 0x223   : > { %v2895_v21 = vadd.f32 %v11905_v18, %v2733_v47  ;;  %5011 = vmax.xlane.f32.xlu0 %v5010_v35  ;;  %v2395_v39 = vadd.f32 %v11781_v56, %v2220_v44  ;;  %v2388_v19 = vadd.f32 %v11797_v60, %v2214_v33  ;;  %v14613_v45 = vmin.f32 %v14569_v12, 1.0  ;;  %v9280_v8 = vpop.f32.mrf.mxu0  ;;  %v14616_v47 = vld [vmem:[#allocation136_spill] sm:$0xff] }
 0x224   : > { %v11984_v16 = vmax.f32 %v2980_v7, 0.0  ;;  %v2966_v3 = vmin.f32 %v2877_v37, 1.0  ;;  %9574 = vmatpush3.xpose.msra.mxu1 %v14614_v26  ;;  %v2889_v32 = vadd.f32 %v11918_v9, %v2727_v49  ;;  %v2745_v18 = vadd.f32 %v9280_v8, %v2569_v29  ;;  %v14622_v49 = vld [vmem:[#allocation61_spill] sm:$0xff]  ;;  %v14623_v34 = vld [vmem:[#allocation140_spill] sm:$0xff]  ;;  %v14626_v26 = vld [vmem:[#allocation50_spill] sm:$0xff] }
 0x225   : > { %v2983_v25 = vsub.f32 %v14613_v45, %v2967_v14  ;;  %v2969_v7 = vmin.f32 %v2895_v21, 1.0  ;;  %9535 = vmatpush3.xpose.msra.mxu0 %v14615_v38  ;;  %v2561_v28 = vadd.f32 %v14616_v47, %v2374_v17  ;;  %9575 = vmatprep.subr.mxu1 %v14545_v53  ;;  %v2409_v56 = vadd.f32 %v11809_v15, %v2232_v57  ;;  %v2738_v33 = vpop.f32.mrf.mxu0 }
 0x226   : > { %14611 = vst [vmem:[#allocation83_spill] sm:$0xff] %v11984_v16  ;;  %v11998_v60 = vmax.f32 %v2981_v2, 0.0  ;;  %v14618_v12 = vmin.f32 %v11831_v13, 1.0  ;;  %v5016_v22 = vsel %vm709_vm0, %v11984_v16, -inf  ;;  %9536 = vmatprep.subr.mxu0 %v14545_v53  ;;  %v14619_v9 = vmin.f32 %v14570_v36, 1.0  ;;  %v9312_v13 = vpop.f32.mrf.mxu1  ;;  %v14621_v2 = vld [vmem:[#allocation138_spill] sm:$0xff] }
 0x227   : > { %v2968_v37 = vmin.f32 %v2889_v32, 1.0  ;;  %v2907_v17 = vadd.f32 %v11931_v58, %v2745_v18  ;;  %v2739_v4 = vadd.f32 %v2738_v33, %v2561_v28  ;;  %5017 = vmax.xlane.f32.xlu0 %v5016_v22  ;;  %v2402_v15 = vadd.f32 %v11827_v1, %v11937_v43  ;;  %v9283_v21 = vpop.f32.mrf.mxu0  ;;  %v14630_v28 = vld [vmem:[#allocation111_spill] sm:$0xff] }
 0x228   : > { %14617 = vst [vmem:[#allocation90_spill] sm:$0xff] %v11998_v60  ;;  %v2982_v44 = vsub.f32 %v14618_v12, %v2966_v3  ;;  %v2985_v14 = vsub.f32 %v14619_v9, %v2969_v7  ;;  %v2585_v35 = vadd.f32 %v14621_v2, %v2395_v39  ;;  %9576 = vmatpush3.xpose.msra.mxu1 %v14622_v49  ;;  %v12015_v36 = vmax.f32 %v2983_v25, 0.0  ;;  %v14627_v25 = vld [vmem:[#allocation81_spill] sm:$0xff]  ;;  %v14634_v2 = vld [vmem:[#allocation42_spill] sm:$0xff] }
 0x229   : > { %v2577_v29 = vadd.f32 %v14623_v34, %v2388_v19  ;;  %v14625_v45 = vmin.f32 %v11841_v55, 1.0  ;;  %v2971_v3 = vmin.f32 %v2907_v17, 1.0  ;;  %v2901_v8 = vadd.f32 %v11948_v46, %v2739_v4  ;;  %9537 = vmatpush3.xpose.msra.mxu0 %v14626_v26  ;;  %9577 = vmatprep.subr.mxu1 %v14545_v53  ;;  %v2750_v43 = vpop.f32.mrf.mxu0  ;;  %v14637_v34 = vld [vmem:[#allocation82_spill] sm:$0xff] }
 0x22a   : > { %v12010_v57 = vmax.f32 %v2982_v44, 0.0  ;;  %14624 = vst [vmem:[#allocation92_spill] sm:$0xff] %v12015_v36  ;;  %v2757_v1 = vadd.f32 %v9283_v21, %v2585_v35  ;;  %v5019_v19 = vsel %vm709_vm0, %v11998_v60, -inf  ;;  %9538 = vmatprep.subr.mxu0 %v14545_v53  ;;  %v2601_v55 = vadd.f32 %v14627_v25, %v2409_v56  ;;  %v2924_v44 = vpop.f32.mrf.mxu1  ;;  %v14631_v56 = vld [vmem:[#allocation57_spill] sm:$0xff] }
 0x22b   : > { %v2984_v58 = vsub.f32 %v14625_v45, %v2968_v37  ;;  %v2423_v7 = vadd.f32 %v11849_v42, %v11953_v48  ;;  %v14629_v32 = vmin.f32 %v11558_v50, 1.0  ;;  %v2970_v47 = vmin.f32 %v2901_v8, 1.0  ;;  %5020 = vmax.xlane.f32.xlu0 %v5019_v19  ;;  %v9286_v9 = vpop.f32.mrf.mxu0  ;;  %v14632_v37 = vld [vmem:[#allocation86_spill] sm:$0xff] }
 0x22c   : > { %14620 = vst [vmem:[#allocation85_spill] sm:$0xff] %v12010_v57  ;;  %v5022_v39 = vsel %vm709_vm0, %v12010_v57, -inf  ;;  %v1681_v12 = vadd.f32 %v14630_v28, %v11847_v5  ;;  %v2919_v33 = vadd.f32 %v11964_v54, %v2757_v1  ;;  %v2751_v22 = vadd.f32 %v2750_v43, %v2577_v29  ;;  %9578 = vmatpush3.xpose.msra.mxu1 %v14631_v56  ;;  %v9315_v8 = vpop.f32.mrf.mxu1  ;;  %v14646_v56 = vld [vmem:[#allocation112_spill] sm:$0xff] }
 0x22d   : > { %v12030_v46 = vmax.f32 %v2984_v58, 0.0  ;;  %v2987_v18 = vsub.f32 %v14629_v32, %v2971_v3  ;;  %5023 = vmax.xlane.f32.xlu1 %v5022_v39  ;;  %v2593_v42 = vadd.f32 %v14632_v37, %v2402_v15  ;;  %v2416_v48 = vadd.f32 %v11867_v61, %v11977_v11  ;;  %9539 = vmatpush3.xpose.msra.mxu0 %v14634_v2  ;;  %v2762_v49 = vpop.f32.mrf.mxu0  ;;  %v14640_v39 = vld [vmem:[#allocation54_spill] sm:$0xff] }
 0x22e   : > { %v14633_v50 = vmin.f32 %v11844_v20, 1.0  ;;  %v2769_v4 = vadd.f32 %v9286_v9, %v2601_v55  ;;  %v5025_v5 = vsel %vm709_vm0, %v12015_v36, -inf  ;;  %9579 = vmatprep.subr.mxu1 %v14545_v53  ;;  %v12047_v54 = vmax.f32 %v2985_v14, 0.0  ;;  %9540 = vmatprep.subr.mxu0 %v14545_v53  ;;  %v14638_v14 = vld [vmem:[#allocation110_spill] sm:$0xff]  ;;  %v14641_v55 = vld [vmem:[#allocation43_spill] sm:$0xff]  ;;  %v14645_v9 = vld [vmem:[#allocation53_spill] sm:$0xff] }
 0x22f   : > { %14628 = vst [vmem:[#allocation87_spill] sm:$0xff] %v12030_v46  ;;  %v2973_v35 = vmin.f32 %v2919_v33, 1.0  ;;  %v2913_v21 = vadd.f32 %v2912_v10, %v2751_v22  ;;  %v5028_v15 = vsel %vm709_vm0, %v12030_v46, -inf  ;;  %v2763_v11 = vadd.f32 %v2762_v49, %v2593_v42  ;;  %5026 = vmax.xlane.f32.xlu0 %v5025_v5  ;;  %v9289_v43 = vpop.f32.mrf.mxu0 }
 0x230   : > { %v2986_v17 = vsub.f32 %v14633_v50, %v2970_v47  ;;  %14635 = vst [vmem:[#allocation93_spill] sm:$0xff] %v12047_v54  ;;  %v2931_v61 = vadd.f32 %v9312_v13, %v2769_v4  ;;  %v2617_v29 = vadd.f32 %v14637_v34, %v2423_v7  ;;  %v2958_v45 = vmin.f32 %v11892_v41, 1.0  ;;  %9580 = vmatpush3.xpose.msra.mxu1 %v14640_v39  ;;  %v14658_v39 = vld [vmem:[#allocation26_spill] sm:$0xff] }
 0x231   : > { %5029 = vmax.xlane.f32.xlu1 %v5028_v15  ;;  %v1843_v58 = vadd.f32 %v14638_v14, %v1681_v12  ;;  %v14639_v10 = vmin.f32 %v11569_v31, 1.0  ;;  %v2972_v1 = vmin.f32 %v2913_v21, 1.0  ;;  %v2925_v25 = vadd.f32 %v2924_v44, %v2763_v11  ;;  %9541 = vmatpush3.xpose.msra.mxu0 %v14641_v55  ;;  %v2774_v47 = vpop.f32.mrf.mxu0  ;;  %v14650_v15 = vld [vmem:[#allocation46_spill] sm:$0xff] }
 0x232   : > { %v12052_v20 = vmax.f32 %v2986_v17, 0.0  ;;  %v2975_v19 = vmin.f32 %v2931_v61, 1.0  ;;  %v2781_v13 = vadd.f32 %v9289_v43, %v2617_v29  ;;  %v2609_v32 = vadd.f32 %v11789_v51, %v2416_v48  ;;  %9581 = vmatprep.subr.mxu1 %v14545_v53  ;;  %9542 = vmatprep.subr.mxu0 %v14545_v53  ;;  %v14647_v17 = vld [vmem:[#allocation33_spill] sm:$0xff]  ;;  %v14651_v11 = vld [vmem:[#allocation34_spill] sm:$0xff]  ;;  %v14657_v43 = vld [vmem:[#allocation35_spill] sm:$0xff] }
 0x233   : > { %v2989_v3 = vsub.f32 %v14639_v10, %v2973_v35  ;;  %v12063_v41 = vmax.f32 %v2987_v18, 0.0  ;;  %v14643_v7 = vmin.f32 %v11864_v23, 1.0  ;;  %v5031_v12 = vsel %vm709_vm0, %v12047_v54, -inf  ;;  %v2936_v23 = vpop.f32.mrf.mxu1  ;;  %v14655_v10 = vld [vmem:[#allocation25_spill] sm:$0xff] }
 0x234   : > { %14636 = vst [vmem:[#allocation95_spill] sm:$0xff] %v12052_v20  ;;  %v5034_v28 = vsel %vm709_vm0, %v12052_v20, -inf  ;;  %v2991_v44 = vsub.f32 %v2959_v0, %v2975_v19  ;;  %v2974_v51 = vmin.f32 %v2925_v25, 1.0  ;;  %v2943_v33 = vadd.f32 %v9315_v8, %v2781_v13  ;;  %5032 = vmax.xlane.f32.xlu0 %v5031_v12  ;;  %9582 = vmatpush3.xpose.msra.mxu1 %v14645_v9  ;;  %v14659_v25 = vld [vmem:[#allocation37_spill] sm:$0xff]  ;;  %v14660_v13 = vld [vmem:[#allocation18_spill] sm:$0xff] }
 0x235   : > { %14642 = vst [vmem:[#allocation94_spill] sm:$0xff] %v12063_v41  ;;  %v2988_v31 = vsub.f32 %v14643_v7, %v2972_v1  ;;  %v2775_v22 = vadd.f32 %v2774_v47, %v2609_v32  ;;  %5035 = vmax.xlane.f32.xlu1 %v5034_v28  ;;  %v2961_v37 = vmin.f32 %v14646_v56, 1.0  ;;  %9543 = vmatpush3.xpose.msra.mxu0 %v14647_v17  ;;  %v12080_v6 = vmax.f32 %v2989_v3, 0.0  ;;  %v14661_v32 = vld [vmem:[#allocation29_spill] sm:$0xff]  ;;  %v14662_v7 = vld [vmem:[#allocation14_spill] sm:$0xff]  ;;  %v14664_v28 = vld [vmem:[#allocation19_spill] sm:$0xff] }
 0x236   : > { %v2990_v42 = vsub.f32 %v2958_v45, %v2974_v51  ;;  %v2977_v48 = vmin.f32 %v2943_v33, 1.0  ;;  %9583 = vmatprep.subr.mxu1 %v14545_v53  ;;  %v5037_v4 = vsel %vm709_vm0, %v12063_v41, -inf  ;;  %9544 = vmatprep.subr.mxu0 %v14545_v53  ;;  %v2960_v5 = vmin.f32 %v1843_v58, 1.0  ;;  %v14654_v58 = vld [vmem:[#allocation41_spill] sm:$0xff]  ;;  %v14666_v51 = vld [vmem:[#allocation79_spill] sm:$0xff]  ;;  %v14668_v56 = vld [vmem:[#allocation72_spill] sm:$0xff] }
 0x237   : > { %v12074_v18 = vmax.f32 %v2988_v31, 0.0  ;;  %v2937_v50 = vadd.f32 %v2936_v23, %v2775_v22  ;;  %14648 = vst [vmem:[#allocation12_spill] sm:$0xff] %v12080_v6  ;;  %v12094_v29 = vmax.f32 %v2991_v44, 0.0  ;;  %v5043_v45 = vsel %vm709_vm0, %v12080_v6, -inf  ;;  %v14663_v31 = vld [vmem:[#allocation22_spill] sm:$0xff]  ;;  %v14665_v44 = vld [vmem:[#allocation15_spill] sm:$0xff] }
 0x238   : > { %v12087_v35 = vmax.f32 %v2990_v42, 0.0  ;;  %v2993_v21 = vsub.f32 %v2961_v37, %v2977_v48  ;;  %5038 = vmax.xlane.f32.xlu0 %v5037_v4  ;;  %9584 = vmatpush3.xpose.msra.mxu1 %v14650_v15  ;;  %v14667_v22 = vld [vmem:[#allocation71_spill] sm:$0xff]  ;;  %v14670_v42 = vld [vmem:[#allocation64_spill] sm:$0xff] }
 0x239   : > { %14644 = vst [vmem:[#allocation89_spill] sm:$0xff] %v12074_v18  ;;  %v5040_v0 = vsel %vm709_vm0, %v12074_v18, -inf  ;;  %v2976_v49 = vmin.f32 %v2937_v50, 1.0  ;;  %9545 = vmatpush3.xpose.msra.mxu0 %v14651_v11  ;;  %9585 = vmatprep.subr.mxu1 %v14545_v53  ;;  %14652 = vst [vmem:[#allocation91_spill] sm:$0xff] %v12094_v29  ;;  %v5049_v1 = vsel %vm709_vm0, %v12094_v29, -inf  ;;  %v14669_v37 = vld [vmem:[#allocation63_spill] sm:$0xff] }
 0x23a   : > { %14649 = vst [vmem:[#allocation96_spill] sm:$0xff] %v12087_v35  ;;  %5041 = vmax.xlane.f32.xlu1 %v5040_v0  ;;  %v5046_v34 = vsel %vm709_vm0, %v12087_v35, -inf  ;;  %9546 = vmatprep.subr.mxu0 %v14545_v53  ;;  %v12106_v8 = vmax.f32 %v2993_v21, 0.0  ;;  %v14671_v48 = vld [vmem:[#allocation55_spill] sm:$0xff]  ;;  %v14672_v50 = vld [vmem:[#allocation56_spill] sm:$0xff] }
 0x23b   : > { %v2992_v61 = vsub.f32 %v2960_v5, %v2976_v49  ;;  %v14673_v0 = vld [vmem:[#allocation47_spill] sm:$0xff]  ;;  %v14674_v4 = vld [vmem:[#allocation48_spill] sm:$0xff] }
 0x23c   : > { %5044 = vmax.xlane.f32.xlu0 %v5043_v45  ;;  %9586 = vmatpush3.xpose.msra.mxu1 %v14654_v58  ;;  %14656 = vst [vmem:[#allocation99_spill] sm:$0xff] %v12106_v8  ;;  %v5055_v19 = vsel %vm709_vm0, %v12106_v8, -inf  ;;  %v14675_v5 = vld [vmem:[#allocation39_spill] sm:$0xff]  ;;  %v14676_v21 = vld [vmem:[#allocation40_spill] sm:$0xff] }
 0x23d   : > { %v12099_v14 = vmax.f32 %v2992_v61, 0.0  ;;  %9547 = vmatpush3.xpose.msra.mxu0 %v14655_v10  ;;  %9587 = vmatprep.subr.mxu1 %v14545_v53  ;;  %v14677_v49 = vld [vmem:[#allocation31_spill] sm:$0xff]  ;;  %v14678_v15 = vld [vmem:[#allocation32_spill] sm:$0xff] }
 0x23e   : > { %5047 = vmax.xlane.f32.xlu1 %v5046_v34  ;;  %9548 = vmatprep.subr.mxu0 %v14545_v53  ;;  %v14679_v61 = vld [vmem:[#allocation23_spill] sm:$0xff]  ;;  %v14680_v34 = vld [vmem:[#allocation16_spill] sm:$0xff] }
 0x23f   : > { %14653 = vst [vmem:[#allocation98_spill] sm:$0xff] %v12099_v14  ;;  %v5052_v3 = vsel %vm709_vm0, %v12099_v14, -inf  ;;  %v14681_v45 = vld [vmem:[#allocation67_spill] sm:$0xff] }
 0x240   : > { %5050 = vmax.xlane.f32.xlu0 %v5049_v1  ;;  %9588 = vmatpush3.xpose.msra.mxu1 %v14657_v43  ;;  %v14683_v43 = vld [vmem:[#allocation17_spill] sm:$0xff] }
 0x241   : > { %9549 = vmatpush3.xpose.msra.mxu0 %v14658_v39  ;;  %9589 = vmatprep.subr.mxu1 %v14545_v53 }
 0x242   : > { %5053 = vmax.xlane.f32.xlu1 %v5052_v3  ;;  %9550 = vmatprep.subr.mxu0 %v14545_v53  ;;  %v14682_v3 = vld [vmem:[#allocation24_spill] sm:$0xff] }
 0x244   : > { %5056 = vmax.xlane.f32.xlu0 %v5055_v19  ;;  %9590 = vmatpush3.xpose.msra.mxu1 %v14659_v25  ;;  %v14684_v19 = vld [vmem:[#allocation30_spill] sm:$0xff]  ;;  %v14685_v25 = vld [vmem:[#allocation76_spill] sm:$0xff] }
 0x245   : > { %9551 = vmatpush3.xpose.msra.mxu0 %v14660_v13  ;;  %9591 = vmatprep.subr.mxu1 %v14545_v53 }
 0x246   : > { %9552 = vmatprep.subr.mxu0 %v14545_v53 }
 0x248   : > { %9592 = vmatpush3.xpose.msra.mxu1 %v14661_v32 }
 0x249   : > { %9553 = vmatpush3.xpose.msra.mxu0 %v14662_v7  ;;  %9631 = vmatprep.subr.mxu1 %v14545_v53 }
 0x24a   : > { %9554 = vmatprep.subr.mxu0 %v14545_v53 }
 0x24b   : > { %9594 = vmatmul.mubr.f32.vlgmr.msra.gmra.mxu1 %v14663_v31  ;;  %v3248_v47 = vpop.f32.mrf.mxu1 }
 0x24c   : > { %9632 = vmatpush3.xpose.msra.mxu1 %v11047_v52  ;;  %9663 = vmatprep.mubr.msk.f32.mxu1 %vm10582_vm3, %v14545_v53 }
 0x24d   : > { %9555 = vmatpush3.xpose.msra.mxu0 %v14664_v28  ;;  %9633 = vmatprep.subr.mxu1 %v14545_v53  ;;  %v9385_v12 = vpop.f32.mrf.mxu1 }
 0x24e   : > { %9556 = vmatprep.subr.mxu0 %v14545_v53  ;;  %v14686_v12 = vld [vmem:[#allocation74_spill] sm:$0xff] }
 0x250   : > { %9634 = vmatpush3.xpose.msra.mxu1 %v14580_v62 }
 0x251   : > { %9557 = vmatpush3.xpose.msra.mxu0 %v14665_v44  ;;  %9635 = vmatprep.subr.mxu1 %v14545_v53 }
 0x252   : > { %9596 = vmatprep.subr.mxu0 %v14545_v53 }
 0x254   : > { %9559 = vmatmul.mubr.f32.vlgmr.msra.gmra.mxu0 %v14666_v51  ;;  %9636 = vmatpush3.xpose.msra.mxu1 %v14597_v27  ;;  %v3097_v33 = vpop.f32.mrf.mxu0  ;;  %v14688_v51 = vld [vmem:[#allocation66_spill] sm:$0xff] }
 0x255   : > { %9597 = vmatpush3.xpose.msra.mxu0 %v14667_v22  ;;  %9637 = vmatprep.subr.mxu1 %v14545_v53  ;;  %v12140_v23 = vadd.f32 %v3248_v47, %v3097_v33  ;;  %v14691_v33 = vld [vmem:[#allocation13_spill] sm:$0xff] }
 0x256   : > { %9598 = vmatprep.subr.mxu0 %v14545_v53  ;;  %9628 = vmatprep.mubr.msk.f32.mxu0 %vm10582_vm3, %v14545_v53  ;;  %v9350_v9 = vpop.f32.mrf.mxu0 }
 0x258   : > { %9638 = vmatpush3.xpose.msra.mxu1 %v14608_v59 }
 0x259   : > { %9599 = vmatpush3.xpose.msra.mxu0 %v14668_v56  ;;  %9639 = vmatprep.subr.mxu1 %v14545_v53 }
 0x25a   : > { %9600 = vmatprep.subr.mxu0 %v14545_v53 }
 0x25c   : > { %9640 = vmatpush3.xpose.msra.mxu1 %v14615_v38 }
 0x25d   : > { %9601 = vmatpush3.xpose.msra.mxu0 %v14669_v37  ;;  %9641 = vmatprep.subr.mxu1 %v14545_v53 }
 0x25e   : > { %9602 = vmatprep.subr.mxu0 %v14545_v53 }
 0x260   : > { %9642 = vmatpush3.xpose.msra.mxu1 %v14626_v26 }
 0x261   : > { %9603 = vmatpush3.xpose.msra.mxu0 %v14670_v42  ;;  %9643 = vmatprep.subr.mxu1 %v14545_v53 }
 0x262   : > { %9604 = vmatprep.subr.mxu0 %v14545_v53 }
 0x264   : > { %9644 = vmatpush3.xpose.msra.mxu1 %v14634_v2 }
 0x265   : > { %9605 = vmatpush3.xpose.msra.mxu0 %v14671_v48  ;;  %9645 = vmatprep.subr.mxu1 %v14545_v53 }
 0x266   : > { %9606 = vmatprep.subr.mxu0 %v14545_v53 }
 0x268   : > { %9646 = vmatpush3.xpose.msra.mxu1 %v14641_v55 }
 0x269   : > { %9607 = vmatpush3.xpose.msra.mxu0 %v14672_v50  ;;  %9647 = vmatprep.subr.mxu1 %v14545_v53  ;;  %v14693_v50 = vld [vmem:[#allocation51_spill] sm:$0xff] }
 0x26a   : > { %9608 = vmatprep.subr.mxu0 %v14545_v53 }
 0x26c   : > { %9648 = vmatpush3.xpose.msra.mxu1 %v14647_v17 }
 0x26d   : > { %9609 = vmatpush3.xpose.msra.mxu0 %v14673_v0  ;;  %9649 = vmatprep.subr.mxu1 %v14545_v53 }
 0x26e   : > { %9610 = vmatprep.subr.mxu0 %v14545_v53 }
 0x270   : > { %9650 = vmatpush3.xpose.msra.mxu1 %v14651_v11 }
 0x271   : > { %9611 = vmatpush3.xpose.msra.mxu0 %v14674_v4  ;;  %9651 = vmatprep.subr.mxu1 %v14545_v53 }
 0x272   : > { %9612 = vmatprep.subr.mxu0 %v14545_v53 }
 0x274   : > { %9652 = vmatpush3.xpose.msra.mxu1 %v14655_v10 }
 0x275   : > { %9613 = vmatpush3.xpose.msra.mxu0 %v14675_v5  ;;  %9653 = vmatprep.subr.mxu1 %v14545_v53 }
 0x276   : > { %9614 = vmatprep.subr.mxu0 %v14545_v53 }
 0x278   : > { %9654 = vmatpush3.xpose.msra.mxu1 %v14658_v39 }
 0x279   : > { %9615 = vmatpush3.xpose.msra.mxu0 %v14676_v21  ;;  %9655 = vmatprep.subr.mxu1 %v14545_v53 }
 0x27a   : > { %9616 = vmatprep.subr.mxu0 %v14545_v53 }
 0x27c   : > { %9656 = vmatpush3.xpose.msra.mxu1 %v14660_v13 }
 0x27d   : > { %9617 = vmatpush3.xpose.msra.mxu0 %v14677_v49  ;;  %9657 = vmatprep.subr.mxu1 %v14545_v53 }
 0x27e   : > { %9618 = vmatprep.subr.mxu0 %v14545_v53 }
 0x280   : > { %9658 = vmatpush3.xpose.msra.mxu1 %v14662_v7 }
 0x281   : > { %9619 = vmatpush3.xpose.msra.mxu0 %v14678_v15  ;;  %9659 = vmatprep.subr.mxu1 %v14545_v53  ;;  %v10408_v15 = vld [vmem:[%s10754_s28 + $0x78] sm:$0xff] }
 0x282   : > { %9620 = vmatprep.subr.mxu0 %v14545_v53 }
 0x284   : > { %9660 = vmatpush3.xpose.msra.mxu1 %v14664_v28 }
 0x285   : > { %9621 = vmatpush3.xpose.msra.mxu0 %v14679_v61  ;;  %9661 = vmatprep.subr.mxu1 %v14545_v53  ;;  %v4311_v61 = vmul.f32 %v10408_v15, %v12106_v8 }
 0x286   : > { %9622 = vmatprep.subr.mxu0 %v14545_v53 }
 0x288   : > { %9662 = vmatpush3.xpose.msra.mxu1 %v14665_v44 }
 0x289   : > { %9623 = vmatpush3.xpose.msra.mxu0 %v14680_v34  ;;  %9701 = vmatprep.subr.mxu1 %v14545_v53  ;;  %v14694_v34 = vld [vmem:[#allocation45_spill] sm:$0xff] }
 0x28a   : > { %9624 = vmatprep.subr.mxu0 %v14545_v53 }
 0x28b   : > { %9664 = vmatmul.mubr.f32.vlgmr.msra.gmra.mxu1 %v14681_v45  ;;  %v3441_v58 = vpop.f32.mrf.mxu1 }
 0x28c   : > { %9702 = vmatpush3.xpose.msra.mxu1 %v11047_v52  ;;  %9733 = vmatprep.mubr.msk.f32.mxu1 %vm10582_vm3, %v14545_v53 }
 0x28d   : > { %9625 = vmatpush3.xpose.msra.mxu0 %v14682_v3  ;;  %9703 = vmatprep.subr.mxu1 %v14545_v53  ;;  %v9455_v1 = vpop.f32.mrf.mxu1 }
 0x28e   : > { %9626 = vmatprep.subr.mxu0 %v14545_v53 }
 0x290   : > { %9704 = vmatpush3.xpose.msra.mxu1 %v14580_v62 }
 0x291   : > { %9627 = vmatpush3.xpose.msra.mxu0 %v14683_v43  ;;  %9705 = vmatprep.subr.mxu1 %v14545_v53 }
 0x292   : > { %9666 = vmatprep.subr.mxu0 %v14545_v53 }
 0x294   : > { %9629 = vmatmul.mubr.f32.vlgmr.msra.gmra.mxu0 %v14684_v19  ;;  %9706 = vmatpush3.xpose.msra.mxu1 %v14597_v27  ;;  %v3352_v52 = vpop.f32.mrf.mxu0  ;;  %v14687_v27 = vld [vmem:[#allocation70_spill] sm:$0xff] }
 0x295   : > { %9667 = vmatpush3.xpose.msra.mxu0 %v14685_v25  ;;  %9707 = vmatprep.subr.mxu1 %v14545_v53  ;;  %v3353_v32 = vadd.f32 %v3352_v52, %v12140_v23 }
 0x296   : > { %9668 = vmatprep.subr.mxu0 %v14545_v53  ;;  %v9420_v62 = vpop.f32.mrf.mxu0  ;;  %9698 = vmatprep.mubr.msk.f32.mxu0 %vm10582_vm3, %v14545_v53 }
 0x297   : > { %v12216_v47 = vadd.f32 %v3441_v58, %v3353_v32  ;;  %v10409_v32 = vld [vmem:[%s10754_s28 + $0x70] sm:$0xff] }
 0x298   : > { %9708 = vmatpush3.xpose.msra.mxu1 %v14608_v59  ;;  %v14689_v59 = vld [vmem:[#allocation62_spill] sm:$0xff]  ;;  %v4310_v62 = vmul.f32 %v10409_v32, %v12099_v14 }
 0x299   : > { %9669 = vmatpush3.xpose.msra.mxu0 %v14686_v12  ;;  %9709 = vmatprep.subr.mxu1 %v14545_v53  ;;  %v14695_v12 = vld [vmem:[#allocation44_spill] sm:$0xff] }
 0x29a   : > { %9670 = vmatprep.subr.mxu0 %v14545_v53 }
 0x29c   : > { %9710 = vmatpush3.xpose.msra.mxu1 %v14615_v38  ;;  %v14690_v38 = vld [vmem:[#allocation60_spill] sm:$0xff] }
 0x29d   : > { %9671 = vmatpush3.xpose.msra.mxu0 %v14687_v27  ;;  %9711 = vmatprep.subr.mxu1 %v14545_v53  ;;  %v4361_v27 = vsel %vm709_vm0, %v4311_v61, 0 }
 0x29e   : > { %9672 = vmatprep.subr.mxu0 %v14545_v53 }
 0x2a0   : > { %9712 = vmatpush3.xpose.msra.mxu1 %v14626_v26 }
 0x2a1   : > { %9673 = vmatpush3.xpose.msra.mxu0 %v14688_v51  ;;  %9713 = vmatprep.subr.mxu1 %v14545_v53 }
 0x2a2   : > { %9674 = vmatprep.subr.mxu0 %v14545_v53 }
 0x2a4   : > { %9714 = vmatpush3.xpose.msra.mxu1 %v14634_v2 }
 0x2a5   : > { %9675 = vmatpush3.xpose.msra.mxu0 %v14689_v59  ;;  %9715 = vmatprep.subr.mxu1 %v14545_v53 }
 0x2a6   : > { %9676 = vmatprep.subr.mxu0 %v14545_v53 }
 0x2a8   : > { %9716 = vmatpush3.xpose.msra.mxu1 %v14641_v55  ;;  %v5015_v26 = vpop.xlane.xlu1 %5014  ;;  %v14692_v55 = vld [vmem:[#allocation52_spill] sm:$0xff] }
 0x2a9   : > { %9677 = vmatpush3.xpose.msra.mxu0 %v14690_v38  ;;  %9717 = vmatprep.subr.mxu1 %v14545_v53  ;;  %vm5059_vm4 = vcmp.eq.f32.partialorder %v11942_v63, %v5015_v26  ;;  %v10410_v26 = vld [vmem:[%s10754_s28 + $0x68] sm:$0xff] }
 0x2aa   : > { %9678 = vmatprep.subr.mxu0 %v14545_v53  ;;  %v5075_v22 = vsel %vm5059_vm4, %v14691_v33, 8 }
 0x2ab   : > { %v12242_v23 = vsel %vm709_vm0, %v5075_v22, 2147483647  ;;  %v4309_v22 = vmul.f32 %v10410_v26, %v12094_v29  ;;  %v10413_v26 = vld [vmem:[%s10754_s28 + $0x58] sm:$0xff] }
 0x2ac   : > { %v5012_v2 = vpop.xlane.xlu0 %5011  ;;  %9718 = vmatpush3.xpose.msra.mxu1 %v14647_v17  ;;  %v5107_v56 = vshra.s32 %v12242_v23, 16 }
 0x2ad   : > { %vm5058_vm5 = vcmp.eq.f32.partialorder %v11959_v24, %v5012_v2  ;;  %9679 = vmatpush3.xpose.msra.mxu0 %v14692_v55  ;;  %9719 = vmatprep.subr.mxu1 %v14545_v53 }
 0x2ae   : > { %v5074_v9 = vsel %vm5058_vm5, %v14691_v33, 8  ;;  %9680 = vmatprep.subr.mxu0 %v14545_v53  ;;  %v12254_v17 = vcvt.s32.f32 %v5107_v56 }
 0x2af   : > { %v12251_v37 = vsel %vm709_vm0, %v5074_v9, 2147483647 }
 0x2b0   : > { %v5018_v42 = vpop.xlane.xlu0 %5017  ;;  %9720 = vmatpush3.xpose.msra.mxu1 %v14651_v11  ;;  %v5092_v48 = vshra.s32 %v12251_v37, 16  ;;  %5110 = vmin.xlane.f32.xlu0 %v12254_v17 }
 0x2b1   : > { %vm5060_vm6 = vcmp.eq.f32.partialorder %v11984_v16, %v5018_v42  ;;  %9681 = vmatpush3.xpose.msra.mxu0 %v14693_v50  ;;  %9721 = vmatprep.subr.mxu1 %v14545_v53  ;;  %v12318_v50 = vand.u32 4294901760, %v4361_v27 }
 0x2b2   : > { %v5076_v0 = vsel %vm5060_vm6, %v14691_v33, 8  ;;  %9682 = vmatprep.subr.mxu0 %v14545_v53  ;;  %v12263_v4 = vcvt.s32.f32 %v5092_v48 }
 0x2b3   : > { %v12266_v11 = vsel %vm709_vm0, %v5076_v0, 2147483647  ;;  %v10411_v0 = vld [vmem:[%s10754_s28 + $0x48] sm:$0xff] }
 0x2b4   : > { %v5021_v21 = vpop.xlane.xlu0 %5020  ;;  %5095 = vmin.xlane.f32.xlu1 %v12263_v4  ;;  %9722 = vmatpush3.xpose.msra.mxu1 %v14655_v10  ;;  %v5122_v49 = vshra.s32 %v12266_v11, 16 }
 0x2b5   : > { %vm5061_vm8 = vcmp.eq.f32.partialorder %v11998_v60, %v5021_v21  ;;  %9683 = vmatpush3.xpose.msra.mxu0 %v14694_v34  ;;  %9723 = vmatprep.subr.mxu1 %v14545_v53  ;;  %v14696_v21 = vld [vmem:[#allocation38_spill] sm:$0xff] }
 0x2b6   : > { %v5024_v5 = vpop.xlane.xlu1 %5023  ;;  %v5077_v58 = vsel %vm5061_vm8, %v14691_v33, 8  ;;  %9684 = vmatprep.subr.mxu0 %v14545_v53  ;;  %v12280_v10 = vcvt.s32.f32 %v5122_v49  ;;  %v4358_v49 = vsel %vm709_vm0, %v4310_v62, 0 }
 0x2b7   : > { %vm5062_vm7 = vcmp.eq.f32.partialorder %v12010_v57, %v5024_v5  ;;  %v12286_v1 = vsel %vm709_vm0, %v5077_v58, 2147483647  ;;  %v12322_v5 = vmul.f32 %v10411_v0, %v12063_v41  ;;  %v10412_v58 = vld [vmem:[%s10754_s28 + $0x60] sm:$0xff] }
 0x2b8   : > { %v5078_v45 = vsel %vm5062_vm7, %v14691_v33, 8  ;;  %v5027_v19 = vpop.xlane.xlu0 %5026  ;;  %5125 = vmin.xlane.f32.xlu1 %v12280_v10  ;;  %9724 = vmatpush3.xpose.msra.mxu1 %v14658_v39  ;;  %v5137_v52 = vshra.s32 %v12286_v1, 16 }
 0x2b9   : > { %v12283_v3 = vsel %vm709_vm0, %v5078_v45, 2147483647  ;;  %vm5063_vm10 = vcmp.eq.f32.partialorder %v12015_v36, %v5027_v19  ;;  %9685 = vmatpush3.xpose.msra.mxu0 %v14695_v12  ;;  %9725 = vmatprep.subr.mxu1 %v14545_v53 }
 0x2ba   : > { %v5030_v43 = vpop.xlane.xlu1 %5029  ;;  %v5152_v25 = vshra.s32 %v12283_v3, 16  ;;  %v5079_v39 = vsel %vm5063_vm10, %v14691_v33, 8  ;;  %9686 = vmatprep.subr.mxu0 %v14545_v53  ;;  %v12302_v59 = vcvt.s32.f32 %v5137_v52  ;;  %v4355_v52 = vsel %vm709_vm0, %v4309_v22, 0  ;;  %v14697_v22 = vld [vmem:[#allocation36_spill] sm:$0xff] }
 0x2bb   : > { %vm5064_vm9 = vcmp.eq.f32.partialorder %v12030_v46, %v5030_v43  ;;  %v12312_v55 = vsel %vm709_vm0, %v5079_v39, 2147483647  ;;  %v4308_v43 = vmul.f32 %v10412_v58, %v12087_v35  ;;  %v12353_v39 = vand.u32 4294901760, %v4358_v49 }
 0x2bc   : > { %v5080_v51 = vsel %vm5064_vm9, %v14691_v33, 8  ;;  %v12304_v38 = vcvt.s32.f32 %v5152_v25  ;;  %5140 = vmin.xlane.f32.xlu0 %v12302_v59  ;;  %v5167_v42 = vshra.s32 %v12312_v55, 16  ;;  %9726 = vmatpush3.xpose.msra.mxu1 %v14660_v13 }
 0x2bd   : > { %v12309_v2 = vsel %vm709_vm0, %v5080_v51, 2147483647  ;;  %v5033_v56 = vpop.xlane.xlu0 %5032  ;;  %9687 = vmatpush3.xpose.msra.mxu0 %v14696_v21  ;;  %9727 = vmatprep.subr.mxu1 %v14545_v53  ;;  %v12351_v51 = vsub.f32 %v4361_v27, %v12318_v50 }
 0x2be   : > { %v5036_v9 = vpop.xlane.xlu1 %5035  ;;  %5155 = vmin.xlane.f32.xlu1 %v12304_v38  ;;  %v5182_v48 = vshra.s32 %v12309_v2, 16  ;;  %vm5065_vm12 = vcmp.eq.f32.partialorder %v12047_v54, %v5033_v56  ;;  %9688 = vmatprep.subr.mxu0 %v14545_v53  ;;  %v12333_v34 = vcvt.s32.f32 %v5167_v42 }
 0x2bf   : > { %vm5066_vm11 = vcmp.eq.f32.partialorder %v12052_v20, %v5036_v9  ;;  %v5081_v61 = vsel %vm5065_vm12, %v14691_v33, 8  ;;  %v4307_v9 = vmul.f32 %v10413_v26, %v12080_v6  ;;  %v10414_v26 = vld [vmem:[%s10754_s28 + $0x50] sm:$0xff] }
 0x2c0   : > { %v5082_v15 = vsel %vm5066_vm11, %v14691_v33, 8  ;;  %v12335_v45 = vcvt.s32.f32 %v5182_v48  ;;  %v12343_v19 = vsel %vm709_vm0, %v5081_v61, 2147483647  ;;  %5170 = vmin.xlane.f32.xlu0 %v12333_v34  ;;  %9728 = vmatpush3.xpose.msra.mxu1 %v14662_v7  ;;  %v12375_v7 = vand.u32 4294901760, %v4355_v52 }
 0x2c1   : > { %v12340_v13 = vsel %vm709_vm0, %v5082_v15, 2147483647  ;;  %v5039_v32 = vpop.xlane.xlu0 %5038  ;;  %v5197_v62 = vshra.s32 %v12343_v19, 16  ;;  %9689 = vmatpush3.xpose.msra.mxu0 %v14697_v22  ;;  %9729 = vmatprep.subr.mxu1 %v14545_v53  ;;  %v4352_v15 = vsel %vm709_vm0, %v4308_v43, 0  ;;  %v4306_v22 = vmul.f32 %v10414_v26, %v12074_v18  ;;  %v14698_v43 = vld [vmem:[#allocation28_spill] sm:$0xff] }
 0x2c2   : > { %5185 = vmin.xlane.f32.xlu1 %v12335_v45  ;;  %v5212_v12 = vshra.s32 %v12340_v13, 16  ;;  %vm5067_vm14 = vcmp.eq.f32.partialorder %v12063_v41, %v5039_v32  ;;  %9690 = vmatprep.subr.mxu0 %v14545_v53 }
 0x2c3   : > { %v5042_v25 = vpop.xlane.xlu1 %5041  ;;  %v5083_v42 = vsel %vm5067_vm14, %v14691_v33, 8  ;;  %v12365_v27 = vcvt.s32.f32 %v5197_v62  ;;  %v4346_v41 = vsel %vm709_vm0, %v4306_v22, 0 }
 0x2c4   : > { %vm5068_vm13 = vcmp.eq.f32.partialorder %v12074_v18, %v5042_v25  ;;  %v12367_v48 = vcvt.s32.f32 %v5212_v12  ;;  %v12373_v21 = vsel %vm709_vm0, %v5083_v42, 2147483647  ;;  %v12384_v12 = vsub.f32 %v4358_v49, %v12353_v39  ;;  %9730 = vmatpush3.xpose.msra.mxu1 %v14664_v28 }
 0x2c5   : > { %v5084_v56 = vsel %vm5068_vm13, %v14691_v33, 8  ;;  %5200 = vmin.xlane.f32.xlu0 %v12365_v27  ;;  %v5045_v58 = vpop.xlane.xlu0 %5044  ;;  %v5227_v25 = vshra.s32 %v12373_v21, 16  ;;  %9691 = vmatpush3.xpose.msra.mxu0 %v14698_v43  ;;  %v12408_v28 = vsub.f32 %v4355_v52, %v12375_v7  ;;  %v14702_v52 = vld [vmem:[#allocation21_spill] sm:$0xff] }
 0x2c6   : > { %v12370_v0 = vsel %vm709_vm0, %v5084_v56, 2147483647  ;;  %5215 = vmin.xlane.f32.xlu1 %v12367_v48  ;;  %vm5069_vm1 = vcmp.eq.f32.partialorder %v12080_v6, %v5045_v58  ;;  %v4349_v56 = vsel %vm709_vm0, %v4307_v9, 0  ;;  %9692 = vmatprep.subr.mxu0 %v14545_v53  ;;  %v12410_v9 = vand.u32 4294901760, %v4352_v15 }
 0x2c7   : > { %v5048_v61 = vpop.xlane.xlu1 %5047  ;;  %v5242_v32 = vshra.s32 %v12370_v0, 16  ;;  %v5085_v62 = vsel %vm5069_vm1, %v14691_v33, 8  ;;  %9731 = vmatprep.subr.mxu1 %v14545_v53  ;;  %v12397_v49 = vcvt.s32.f32 %v5227_v25  ;;  %v12424_v18 = vand.u32 4294901760, %v4349_v56 }
 0x2c8   : > { %vm5070_vm15 = vcmp.eq.f32.partialorder %v12087_v35, %v5048_v61  ;;  %v12405_v58 = vsel %vm709_vm0, %v5085_v62, 2147483647  ;;  %9732 = vmatpush3.xpose.msra.mxu1 %v14665_v44  ;;  %v12443_v6 = vsub.f32 %v4352_v15, %v12410_v9 }
 0x2c9   : > { %v5086_v42 = vsel %vm5070_vm15, %v14691_v33, 8  ;;  %14699 = vst [vmem:[#allocation100_spill] sm:$0xff] %v12397_v49  ;;  %v12399_v26 = vcvt.s32.f32 %v5242_v32  ;;  %5230 = vmin.xlane.f32.xlu0 %v12397_v49  ;;  %v5051_v43 = vpop.xlane.xlu0 %5050  ;;  %v5257_v32 = vshra.s32 %v12405_v58, 16  ;;  %9693 = vmatpush3.xpose.msra.mxu0 %v14702_v52 }
 0x2ca   : > { %v12402_v61 = vsel %vm709_vm0, %v5086_v42, 2147483647  ;;  %v14701_v42 = vand.u32 4294901760, %v12351_v51  ;;  %vm5071_vm2 = vcmp.eq.f32.partialorder %v12094_v29, %v5051_v43  ;;  %9694 = vmatprep.subr.mxu0 %v14545_v53  ;;  %9771 = vmatprep.subr.mxu1 %v14545_v53  ;;  %v14707_v29 = vand.u32 4294901760, %v12384_v12 }
 0x2cb   : > { %14700 = vst [vmem:[#allocation9_spill] sm:$0xff] %v12399_v26  ;;  %5245 = vmin.xlane.f32.xlu1 %v12399_v26  ;;  %v5054_v25 = vpop.xlane.xlu1 %5053  ;;  %v5272_v35 = vshra.s32 %v12402_v61, 16  ;;  %v5087_v26 = vsel %vm5071_vm2, %v14691_v33, 8  ;;  %v3647_v52 = vpop.f32.mrf.mxu1  ;;  %9734 = vmatmul.mubr.f32.vlgmr.msra.gmra.mxu1 %v14663_v31 }
 0x2cc   : > { %v4458_v62 = vsub.f32 %v12351_v51, %v14701_v42  ;;  %vm5072_vm4 = vcmp.eq.f32.partialorder %v12099_v14, %v5054_v25  ;;  %v12431_v42 = vcvt.s32.f32 %v5257_v32  ;;  %v12436_v25 = vsel %vm709_vm0, %v5087_v26, 2147483647  ;;  %9803 = vmatprep.mubr.msk.f32.mxu1 %vm10582_vm3, %v14545_v53 }
 0x2cd   : > { %v5088_v49 = vsel %vm5072_vm4, %v14691_v33, 8  ;;  %v12433_v43 = vcvt.s32.f32 %v5272_v35  ;;  %14705 = vst [vmem:[#allocation27_spill] sm:$0xff] %v12436_v25  ;;  %v5057_v14 = vpop.xlane.xlu0 %5056  ;;  %v5287_v35 = vshra.s32 %v12436_v25, 16  ;;  %9695 = vmatpush3.xpose.msra.mxu0 %v14561_v40  ;;  %v9525_v15 = vpop.f32.mrf.mxu1  ;;  %v12466_v40 = vsub.f32 %v4349_v56, %v12424_v18 }
 0x2ce   : > { %14703 = vst [vmem:[#allocation80_spill] sm:$0xff] %v12431_v42  ;;  %v12439_v44 = vsel %vm709_vm0, %v5088_v49, 2147483647  ;;  %5260 = vmin.xlane.f32.xlu0 %v12431_v42  ;;  %v4459_v32 = vand.u32 4294901760, %v4458_v62  ;;  %v4465_v49 = vsub.f32 %v12384_v12, %v14707_v29  ;;  %vm5073_vm5 = vcmp.eq.f32.partialorder %v12106_v8, %v5057_v14  ;;  %9696 = vmatprep.subr.mxu0 %v14545_v53  ;;  %v10415_v15 = vld [vmem:[%s10754_s28 + $0x40] sm:$0xff]  ;;  %v10416_v8 = vld [vmem:[%s10754_s28 + $0x38] sm:$0xff] }
 0x2cf   : > { %14704 = vst [vmem:[#allocation103_spill] sm:$0xff] %v12433_v43  ;;  %14706 = vst [vmem:[#allocation104_spill] sm:$0xff] %v12439_v44  ;;  %5275 = vmin.xlane.f32.xlu1 %v12433_v43  ;;  %v5302_v26 = vshra.s32 %v12439_v44, 16  ;;  %v5089_v22 = vsel %vm5073_vm5, %v14691_v33, 8  ;;  %v12457_v62 = vcvt.s32.f32 %v5287_v35  ;;  %v12468_v29 = vand.u32 4294901760, %v4346_v41 }
 0x2d0   : > { %9772 = vmatpush3.xpose.msra.mxu1 %v4459_v32  ;;  %v12462_v42 = vsel %vm709_vm0, %v5089_v22, 2147483647  ;;  %v4343_v14 = vsel %vm709_vm0, %v12322_v5, 0  ;;  %v4466_v22 = vand.u32 4294901760, %v4465_v49  ;;  %v14711_v35 = vand.u32 4294901760, %v12408_v28 }
 0x2d1   : > { %14708 = vst [vmem:[#allocation101_spill] sm:$0xff] %v12457_v62  ;;  %v12459_v43 = vcvt.s32.f32 %v5302_v26  ;;  %14710 = vst [vmem:[#allocation102_spill] sm:$0xff] %v12462_v42  ;;  %9773 = vmatprep.subr.mxu1 %v14545_v53  ;;  %v5317_v32 = vshra.s32 %v12462_v42, 16  ;;  %v14313_v26 = vand.u32 4294901760, %v12443_v6  ;;  %v4304_v33 = vmul.f32 %v10415_v15, %v12052_v20  ;;  %9697 = vmatpush3.xpose.msra.mxu0 %v14568_v30 }
 0x2d2   : > { %5290 = vmin.xlane.f32.xlu0 %v12457_v62  ;;  %v4472_v56 = vsub.f32 %v12408_v28, %v14711_v35  ;;  %9736 = vmatprep.subr.mxu0 %v14545_v53  ;;  %v4303_v49 = vmul.f32 %v10416_v8, %v12047_v54  ;;  %v10422_v62 = vld [vmem:[%s10754_s28 + $0x8] sm:$0xff] }
 0x2d3   : > { %14709 = vst [vmem:[#allocation105_spill] sm:$0xff] %v12459_v43  ;;  %5305 = vmin.xlane.f32.xlu1 %v12459_v43  ;;  %v12485_v5 = vcvt.s32.f32 %v5317_v32  ;;  %v12490_v43 = vand.u32 4294901760, %v4343_v14  ;;  %v4479_v30 = vsub.f32 %v12443_v6, %v14313_v26  ;;  %v12499_v32 = vsub.f32 %v4346_v41, %v12468_v29 }
 0x2d4   : > { %9774 = vmatpush3.xpose.msra.mxu1 %v4466_v22  ;;  %v3560_v35 = vpop.f32.mrf.mxu0  ;;  %9699 = vmatmul.mubr.f32.vlgmr.msra.gmra.mxu0 %v14663_v31  ;;  %v4473_v15 = vand.u32 4294901760, %v4472_v56  ;;  %v14314_v22 = vand.u32 4294901760, %v12466_v40  ;;  %v4340_v20 = vsel %vm709_vm0, %v4304_v33, 0 }
 0x2d5   : > { %14712 = vst [vmem:[#allocation77_spill] sm:$0xff] %v12485_v5  ;;  %9775 = vmatprep.subr.mxu1 %v14545_v53  ;;  %v3561_v8 = vadd.f32 %v3560_v35, %v12216_v47  ;;  %9737 = vmatpush3.xpose.msra.mxu0 %v12318_v50  ;;  %v12511_v41 = vsub.f32 %v4343_v14, %v12490_v43  ;;  %v4337_v47 = vsel %vm709_vm0, %v4303_v49, 0  ;;  %v4480_v35 = vand.u32 4294901760, %v4479_v30 }
 0x2d6   : > { %5320 = vmin.xlane.f32.xlu0 %v12485_v5  ;;  %9768 = vmatprep.mubr.msk.f32.mxu0 %vm10582_vm3, %v14545_v53  ;;  %v9490_v31 = vpop.f32.mrf.mxu0  ;;  %v4486_v33 = vsub.f32 %v12466_v40, %v14314_v22  ;;  %v12518_v26 = vand.u32 4294901760, %v4340_v20  ;;  %v12525_v14 = vand.u32 4294901760, %v4337_v47 }
 0x2d7   : > { %9738 = vmatprep.subr.mxu0 %v14545_v53  ;;  %v12507_v56 = vadd.f32 %v3647_v52, %v3561_v8  ;;  %v10417_v31 = vld [vmem:[%s10754_s28 + $0x30] sm:$0xff]  ;;  %v14319_v8 = vand.u32 4294901760, %v12511_v41 }
 0x2d8   : > { %9776 = vmatpush3.xpose.msra.mxu1 %v4473_v15  ;;  %v14316_v15 = vand.u32 4294901760, %v12499_v32  ;;  %v4302_v52 = vmul.f32 %v10417_v31, %v12030_v46  ;;  %v4487_v49 = vand.u32 4294901760, %v4486_v33  ;;  %v12532_v22 = vsub.f32 %v4340_v20, %v12518_v26  ;;  %v10418_v31 = vld [vmem:[%s10754_s28 + $0x28] sm:$0xff] }
 0x2d9   : > { %14713 = vst [vmem:[#allocation106_spill] sm:$0xff] %v12507_v56  ;;  %9777 = vmatprep.subr.mxu1 %v14545_v53  ;;  %9739 = vmatpush3.xpose.msra.mxu0 %v12353_v39  ;;  %v12541_v33 = vsub.f32 %v4337_v47, %v12525_v14  ;;  %v4500_v20 = vsub.f32 %v12511_v41, %v14319_v8  ;;  %v10420_v47 = vld [vmem:[%s10754_s28 + $0x18] sm:$0xff] }
 0x2da   : > { %9740 = vmatprep.subr.mxu0 %v14545_v53  ;;  %v4493_v30 = vsub.f32 %v12499_v32, %v14316_v15  ;;  %v4334_v54 = vsel %vm709_vm0, %v4302_v52, 0  ;;  %v14714_v56 = vand.u32 4294901760, %v12532_v22 }
 0x2db   : > { %v12547_v46 = vand.u32 4294901760, %v4334_v54  ;;  %v14324_v8 = vand.u32 4294901760, %v12541_v33 }
 0x2dc   : > { %9778 = vmatpush3.xpose.msra.mxu1 %v4480_v35  ;;  %v4301_v35 = vmul.f32 %v10418_v31, %v12015_v36  ;;  %v4494_v15 = vand.u32 4294901760, %v4493_v30  ;;  %v10419_v36 = vld [vmem:[%s10754_s28 + $0x20] sm:$0xff]  ;;  %v4299_v30 = vmul.f32 %v10420_v47, %v11998_v60  ;;  %v4501_v31 = vand.u32 4294901760, %v4500_v20 }
 0x2dd   : > { %9779 = vmatprep.subr.mxu1 %v14545_v53  ;;  %9741 = vmatpush3.xpose.msra.mxu0 %v12375_v7  ;;  %v4300_v52 = vmul.f32 %v10419_v36, %v12010_v57  ;;  %v4507_v36 = vsub.f32 %v12532_v22, %v14714_v56  ;;  %v12562_v57 = vsub.f32 %v4334_v54, %v12547_v46 }
 0x2de   : > { %9742 = vmatprep.subr.mxu0 %v14545_v53  ;;  %v4514_v20 = vsub.f32 %v12541_v33, %v14324_v8  ;;  %v4325_v56 = vsel %vm709_vm0, %v4299_v30, 0  ;;  %v4297_v8 = vmul.f32 %v10422_v62, %v11942_v63 }
 0x2df   : > { %v4508_v54 = vand.u32 4294901760, %v4507_v36  ;;  %v14326_v47 = vand.u32 4294901760, %v12562_v57  ;;  %v12587_v30 = vand.u32 4294901760, %v4325_v56 }
 0x2e0   : > { %9780 = vmatpush3.xpose.msra.mxu1 %v4487_v49  ;;  %v4331_v49 = vsel %vm709_vm0, %v4301_v35, 0 }
 0x2e1   : > { %9781 = vmatprep.subr.mxu1 %v14545_v53  ;;  %9743 = vmatpush3.xpose.msra.mxu0 %v12410_v9  ;;  %v12564_v35 = vand.u32 4294901760, %v4331_v49  ;;  %v4521_v36 = vsub.f32 %v12562_v57, %v14326_v47  ;;  %v12601_v62 = vsub.f32 %v4325_v56, %v12587_v30 }
 0x2e2   : > { %9744 = vmatprep.subr.mxu0 %v14545_v53 }
 0x2e3   : > { %v12576_v60 = vsub.f32 %v4331_v49, %v12564_v35  ;;  %v4515_v49 = vand.u32 4294901760, %v4514_v20  ;;  %v4319_v20 = vsel %vm709_vm0, %v4297_v8, 0  ;;  %v4522_v47 = vand.u32 4294901760, %v4521_v36 }
 0x2e4   : > { %9782 = vmatpush3.xpose.msra.mxu1 %v4494_v15  ;;  %v4328_v15 = vsel %vm709_vm0, %v4300_v52, 0  ;;  %v10421_v52 = vld [vmem:[%s10754_s28 + $0x10] sm:$0xff]  ;;  %v12615_v8 = vand.u32 4294901760, %v4319_v20 }
 0x2e5   : > { %9783 = vmatprep.subr.mxu1 %v14545_v53  ;;  %9745 = vmatpush3.xpose.msra.mxu0 %v12424_v18  ;;  %v12578_v5 = vand.u32 4294901760, %v4328_v15 }
 0x2e6   : > { %9746 = vmatprep.subr.mxu0 %v14545_v53 }
 0x2e8   : > { %9784 = vmatpush3.xpose.msra.mxu1 %v4501_v31  ;;  %v4298_v31 = vmul.f32 %v10421_v52, %v11984_v16  ;;  %v14329_v52 = vand.u32 4294901760, %v12576_v60  ;;  %v12594_v16 = vsub.f32 %v4328_v15, %v12578_v5 }
 0x2e9   : > { %9785 = vmatprep.subr.mxu1 %v14545_v53  ;;  %9747 = vmatpush3.xpose.msra.mxu0 %v12468_v29 }
 0x2ea   : > { %9748 = vmatprep.subr.mxu0 %v14545_v53  ;;  %v4528_v15 = vsub.f32 %v12576_v60, %v14329_v52  ;;  %v14331_v63 = vand.u32 4294901760, %v12594_v16  ;;  %v14333_v52 = vand.u32 4294901760, %v12601_v62 }
 0x2ec   : > { %9786 = vmatpush3.xpose.msra.mxu1 %v4508_v54  ;;  %v4322_v54 = vsel %vm709_vm0, %v4298_v31, 0  ;;  %v10423_v31 = vld [vmem:[%s10754_s28] sm:$0xff]  ;;  %v4529_v56 = vand.u32 4294901760, %v4528_v15  ;;  %v4535_v36 = vsub.f32 %v12594_v16, %v14331_v63  ;;  %v12629_v15 = vsub.f32 %v4319_v20, %v12615_v8  ;;  %s13338_s28 = scalar_lea.vmem [#allocation2], %s8218_s27 }
 0x2ed   : > { %9787 = vmatprep.subr.mxu1 %v14545_v53  ;;  %9749 = vmatpush3.xpose.msra.mxu0 %v12490_v43  ;;  %v12608_v42 = vand.u32 4294901760, %v4322_v54  ;;  %v4542_v63 = vsub.f32 %v12601_v62, %v14333_v52  ;;  %s7825_s18 = sshll.u32 %s13338_s28, 4  ;;  %s7826_s18 = int_to_ptr.vmem [resolvable:$true] %s7825_s18 }
 0x2ee   : > { %9750 = vmatprep.subr.mxu0 %v14545_v53  ;;  %p10431_p0 = scmp.lt.s32.totalorder %s7826_s18, %s10429_s1 }
 0x2ef   : > { %v12622_v44 = vsub.f32 %v4322_v54, %v12608_v42 }
 0x2f0   : > { %9788 = vmatpush3.xpose.msra.mxu1 %v4515_v49  ;;  %v4296_v49 = vmul.f32 %v10423_v31, %v11959_v24  ;;  %v4536_v31 = vand.u32 4294901760, %v4535_v36 }
 0x2f1   : > { %9789 = vmatprep.subr.mxu1 %v14545_v53  ;;  %9751 = vmatpush3.xpose.msra.mxu0 %v12518_v26  ;;  %v14334_v54 = vand.u32 4294901760, %v12622_v44 }
 0x2f2   : > { %9752 = vmatprep.subr.mxu0 %v14545_v53 }
 0x2f3   : > { %v4549_v20 = vsub.f32 %v12622_v44, %v14334_v54  ;;  %v14715_v54 = vmov 0  }
 0x2f4   : > { %9790 = vmatpush3.xpose.msra.mxu1 %v4522_v47  ;;  %v4316_v47 = vsel %vm709_vm0, %v4296_v49, 0  ;;  %v4543_v49 = vand.u32 4294901760, %v4542_v63  ;;  %v4313_v25 = vsel %vm709_vm0, 1.0, %v14715_v54 }
 0x2f5   : > { %9791 = vmatprep.subr.mxu1 %v14545_v53  ;;  %9753 = vmatpush3.xpose.msra.mxu0 %v12525_v14  ;;  %v12635_v24 = vand.u32 4294901760, %v4316_v47 }
 0x2f6   : > { %9754 = vmatprep.subr.mxu0 %v14545_v53 }
 0x2f7   : > { %v12645_v36 = vsub.f32 %v4316_v47, %v12635_v24  ;;  %v12659_v47 = vsub.f32 %v4313_v25, %v4313_v25 }
 0x2f8   : > { %9792 = vmatpush3.xpose.msra.mxu1 %v4529_v56  ;;  %v14337_v56 = vand.u32 4294901760, %v12629_v15 }
 0x2f9   : > { %9793 = vmatprep.subr.mxu1 %v14545_v53  ;;  %9755 = vmatpush3.xpose.msra.mxu0 %v12547_v46  ;;  %v14336_v52 = vand.u32 4294901760, %v12645_v36  ;;  %v14340_v54 = vand.u32 4294901760, %v12659_v47 }
 0x2fa   : > { %9756 = vmatprep.subr.mxu0 %v14545_v53  ;;  %v4556_v63 = vsub.f32 %v12629_v15, %v14337_v56 }
 0x2fc   : > { %9794 = vmatpush3.xpose.msra.mxu1 %v4536_v31  ;;  %v4550_v31 = vand.u32 4294901760, %v4549_v20  ;;  %v4563_v20 = vsub.f32 %v12645_v36, %v14336_v52 }
 0x2fd   : > { %9795 = vmatprep.subr.mxu1 %v14545_v53  ;;  %9757 = vmatpush3.xpose.msra.mxu0 %v12564_v35 }
 0x2fe   : > { %9758 = vmatprep.subr.mxu0 %v14545_v53 }
 0x300   : > { %9796 = vmatpush3.xpose.msra.mxu1 %v4543_v49  ;;  %v4557_v49 = vand.u32 4294901760, %v4556_v63  ;;  %v4447_v63 = vsub.f32 %v12659_v47, %v14340_v54 }
 0x301   : > { %9797 = vmatprep.subr.mxu1 %v14545_v53  ;;  %9759 = vmatpush3.xpose.msra.mxu0 %v12578_v5 }
 0x302   : > { %9760 = vmatprep.subr.mxu0 %v14545_v53 }
 0x304   : > { %9798 = vmatpush3.xpose.msra.mxu1 %v4550_v31  ;;  %v4564_v31 = vand.u32 4294901760, %v4563_v20  ;;  %v4448_v20 = vand.u32 4294901760, %v4447_v63 }
 0x305   : > { %9799 = vmatprep.subr.mxu1 %v14545_v53  ;;  %9761 = vmatpush3.xpose.msra.mxu0 %v12587_v30 }
 0x306   : > { %9762 = vmatprep.subr.mxu0 %v14545_v53 }
 0x308   : > { %9800 = vmatpush3.xpose.msra.mxu1 %v4557_v49  ;;  %v14338_v49 = vmov 1.0  }
 0x309   : > { %9801 = vmatprep.subr.mxu1 %v14545_v53  ;;  %9763 = vmatpush3.xpose.msra.mxu0 %v12608_v42 }
 0x30a   : > { %9764 = vmatprep.subr.mxu0 %v14545_v53 }
 0x30b   : > { %v3889_v25 = vpop.f32.mrf.mxu1 }
 0x30c   : > { %9802 = vmatpush3.xpose.msra.mxu1 %v4564_v31 }
 0x30d   : > { %9841 = vmatprep.subr.mxu1 %v14545_v53  ;;  %9765 = vmatpush3.xpose.msra.mxu0 %v12615_v8  ;;  %v9595_v52 = vpop.f32.mrf.mxu1 }
 0x30e   : > { %9766 = vmatprep.subr.mxu0 %v14545_v53 }
 0x30f   : > { %9804 = vmatmul.mubr.msk.f32.vlgmr.msra.gmra.mxu1 %vm709_vm0, %v14338_v49 }
 0x310   : > { %9842 = vmatpush3.xpose.msra.mxu1 %v12318_v50  ;;  %9873 = vmatprep.mubr.msk.f32.mxu1 %vm10582_vm3, %v14545_v53 }
 0x311   : > { %9843 = vmatprep.subr.mxu1 %v14545_v53  ;;  %9767 = vmatpush3.xpose.msra.mxu0 %v12635_v24 }
 0x312   : > { %9806 = vmatprep.subr.mxu0 %v14545_v53 }
 0x314   : > { %9844 = vmatpush3.xpose.msra.mxu1 %v12353_v39  ;;  %9769 = vmatmul.mubr.f32.vlgmr.msra.gmra.mxu0 %v4448_v20  ;;  %v3738_v52 = vpop.f32.mrf.mxu0  ;;  %v5091_v20 = vand.u32 65535, %v12251_v37  ;;  %v5121_v37 = vand.u32 65535, %v12266_v11  ;;  %v5151_v11 = vand.u32 65535, %v12283_v3  ;;  %v5166_v3 = vand.u32 65535, %v12312_v55 }
 0x315   : > { %9845 = vmatprep.subr.mxu1 %v14545_v53  ;;  %9807 = vmatpush3.xpose.msra.mxu0 %v12351_v51  ;;  %v12689_v31 = vadd.f32 %v3889_v25, %v3738_v52  ;;  %v5106_v25 = vand.u32 65535, %v12242_v23 }
 0x316   : > { %9838 = vmatprep.mubr.msk.f32.mxu0 %vm10582_vm3, %v14545_v53  ;;  %9808 = vmatprep.subr.mxu0 %v14545_v53  ;;  %v9560_v63 = vpop.f32.mrf.mxu0  ;;  %v5093_v49 = vcvt.s32.f32 %v5091_v20  ;;  %v5136_v20 = vand.u32 65535, %v12286_v1 }
 0x317   : > { %v5108_v63 = vcvt.s32.f32 %v5106_v25  ;;  %v5123_v25 = vcvt.s32.f32 %v5121_v37 }
 0x318   : > { %9846 = vmatpush3.xpose.msra.mxu1 %v12375_v7  ;;  %v5138_v1 = vcvt.s32.f32 %v5136_v20 }
 0x319   : > { %9847 = vmatprep.subr.mxu1 %v14545_v53  ;;  %9809 = vmatpush3.xpose.msra.mxu0 %v12384_v12 }
 0x31a   : > { %9810 = vmatprep.subr.mxu0 %v14545_v53 }
 0x31c   : > { %9848 = vmatpush3.xpose.msra.mxu1 %v12410_v9 }
 0x31d   : > { %9849 = vmatprep.subr.mxu1 %v14545_v53  ;;  %9811 = vmatpush3.xpose.msra.mxu0 %v12408_v28 }
 0x31e   : > { %9812 = vmatprep.subr.mxu0 %v14545_v53 }
 0x320   : > { %9850 = vmatpush3.xpose.msra.mxu1 %v12424_v18 }
 0x321   : > { %9851 = vmatprep.subr.mxu1 %v14545_v53  ;;  %9813 = vmatpush3.xpose.msra.mxu0 %v12443_v6 }
 0x322   : > { %9814 = vmatprep.subr.mxu0 %v14545_v53 }
 0x324   : > { %9852 = vmatpush3.xpose.msra.mxu1 %v12468_v29 }
 0x325   : > { %9853 = vmatprep.subr.mxu1 %v14545_v53  ;;  %9815 = vmatpush3.xpose.msra.mxu0 %v12466_v40 }
 0x326   : > { %9816 = vmatprep.subr.mxu0 %v14545_v53 }
 0x328   : > { %9854 = vmatpush3.xpose.msra.mxu1 %v12490_v43 }
 0x329   : > { %9855 = vmatprep.subr.mxu1 %v14545_v53  ;;  %9817 = vmatpush3.xpose.msra.mxu0 %v12499_v32 }
 0x32a   : > { %9818 = vmatprep.subr.mxu0 %v14545_v53 }
 0x32c   : > { %9856 = vmatpush3.xpose.msra.mxu1 %v12518_v26 }
 0x32d   : > { %9857 = vmatprep.subr.mxu1 %v14545_v53  ;;  %9819 = vmatpush3.xpose.msra.mxu0 %v12511_v41 }
 0x32e   : > { %9820 = vmatprep.subr.mxu0 %v14545_v53 }
 0x330   : > { %9858 = vmatpush3.xpose.msra.mxu1 %v12525_v14 }
 0x331   : > { %9859 = vmatprep.subr.mxu1 %v14545_v53  ;;  %9821 = vmatpush3.xpose.msra.mxu0 %v12532_v22 }
 0x332   : > { %9822 = vmatprep.subr.mxu0 %v14545_v53 }
 0x334   : > { %9860 = vmatpush3.xpose.msra.mxu1 %v12547_v46 }
 0x335   : > { %9861 = vmatprep.subr.mxu1 %v14545_v53  ;;  %9823 = vmatpush3.xpose.msra.mxu0 %v12541_v33 }
 0x336   : > { %9824 = vmatprep.subr.mxu0 %v14545_v53 }
 0x338   : > { %9862 = vmatpush3.xpose.msra.mxu1 %v12564_v35 }
 0x339   : > { %9863 = vmatprep.subr.mxu1 %v14545_v53  ;;  %9825 = vmatpush3.xpose.msra.mxu0 %v12562_v57  ;;  %v12734_v52 = vpop.xlane.xlu0 %5110 }
 0x33a   : > { %9826 = vmatprep.subr.mxu0 %v14545_v53  ;;  %vm5112_vm6 = vcmp.eq.f32.partialorder %v12254_v17, %v12734_v52 }
 0x33b   : > { %v5113_v23 = vsel %vm5112_vm6, %v5108_v63, inf  ;;  %v5153_v63 = vcvt.s32.f32 %v5151_v11 }
 0x33c   : > { %9864 = vmatpush3.xpose.msra.mxu1 %v12578_v5  ;;  %5114 = vmin.xlane.f32.xlu0 %v5113_v23  ;;  %v5181_v23 = vand.u32 65535, %v12309_v2  ;;  %v5168_v2 = vcvt.s32.f32 %v5166_v3  ;;  %v5226_v3 = vand.u32 65535, %v12373_v21 }
 0x33d   : > { %9865 = vmatprep.subr.mxu1 %v14545_v53  ;;  %v12739_v56 = vpop.xlane.xlu1 %5095  ;;  %9827 = vmatpush3.xpose.msra.mxu0 %v12576_v60 }
 0x33e   : > { %vm5097_vm7 = vcmp.eq.f32.partialorder %v12263_v4, %v12739_v56  ;;  %9828 = vmatprep.subr.mxu0 %v14545_v53  ;;  %v5183_v20 = vcvt.s32.f32 %v5181_v23  ;;  %v5241_v23 = vand.u32 65535, %v12370_v0 }
 0x33f   : > { %v5098_v54 = vsel %vm5097_vm7, %v5093_v49, inf }
 0x340   : > { %9866 = vmatpush3.xpose.msra.mxu1 %v12587_v30  ;;  %5099 = vmin.xlane.f32.xlu1 %v5098_v54  ;;  %v5243_v21 = vcvt.s32.f32 %v5241_v23  ;;  %v14720_v23 = vld [vmem:[#allocation104_spill] sm:$0xff] }
 0x341   : > { %9867 = vmatprep.subr.mxu1 %v14545_v53  ;;  %v12748_v17 = vpop.xlane.xlu1 %5125  ;;  %9829 = vmatpush3.xpose.msra.mxu0 %v12594_v16 }
 0x342   : > { %vm5127_vm8 = vcmp.eq.f32.partialorder %v12280_v10, %v12748_v17  ;;  %9830 = vmatprep.subr.mxu0 %v14545_v53 }
 0x343   : > { %v5128_v4 = vsel %vm5127_vm8, %v5123_v25, inf }
 0x344   : > { %9868 = vmatpush3.xpose.msra.mxu1 %v12608_v42  ;;  %5129 = vmin.xlane.f32.xlu1 %v5128_v4 }
 0x345   : > { %9869 = vmatprep.subr.mxu1 %v14545_v53  ;;  %v12758_v54 = vpop.xlane.xlu0 %5140  ;;  %9831 = vmatpush3.xpose.msra.mxu0 %v12601_v62 }
 0x346   : > { %vm5142_vm9 = vcmp.eq.f32.partialorder %v12302_v59, %v12758_v54  ;;  %9832 = vmatprep.subr.mxu0 %v14545_v53  ;;  %v5196_v59 = vand.u32 65535, %v12343_v19 }
 0x347   : > { %v12760_v49 = vpop.xlane.xlu1 %5155  ;;  %v5143_v10 = vsel %vm5142_vm9, %v5138_v1, inf }
 0x348   : > { %9870 = vmatpush3.xpose.msra.mxu1 %v12615_v8  ;;  %vm5157_vm10 = vcmp.eq.f32.partialorder %v12304_v38, %v12760_v49  ;;  %5144 = vmin.xlane.f32.xlu0 %v5143_v10  ;;  %v5211_v38 = vand.u32 65535, %v12340_v13 }
 0x349   : > { %v5158_v37 = vsel %vm5157_vm10, %v5153_v63, inf  ;;  %9871 = vmatprep.subr.mxu1 %v14545_v53  ;;  %v12772_v25 = vpop.xlane.xlu0 %5170  ;;  %9833 = vmatpush3.xpose.msra.mxu0 %v12622_v44  ;;  %v5198_v63 = vcvt.s32.f32 %v5196_v59  ;;  %v14717_v59 = vld [vmem:[#allocation100_spill] sm:$0xff] }
 0x34a   : > { %5159 = vmin.xlane.f32.xlu1 %v5158_v37  ;;  %vm5172_vm11 = vcmp.eq.f32.partialorder %v12333_v34, %v12772_v25  ;;  %9834 = vmatprep.subr.mxu0 %v14545_v53  ;;  %v14716_v34 = vand.u32 4294901760, %v12659_v47 }
 0x34b   : > { %v12774_v55 = vpop.xlane.xlu1 %5185  ;;  %v5173_v11 = vsel %vm5172_vm11, %v5168_v2, inf  ;;  %v4082_v1 = vpop.f32.mrf.mxu1 }
 0x34c   : > { %9872 = vmatpush3.xpose.msra.mxu1 %v12635_v24  ;;  %vm5187_vm12 = vcmp.eq.f32.partialorder %v12335_v45, %v12774_v55  ;;  %5174 = vmin.xlane.f32.xlu0 %v5173_v11  ;;  %v5213_v45 = vcvt.s32.f32 %v5211_v38  ;;  %v14718_v38 = vld [vmem:[#allocation9_spill] sm:$0xff] }
 0x34d   : > { %v5188_v4 = vsel %vm5187_vm12, %v5183_v20, inf  ;;  %9911 = vmatprep.subr.mxu1 %v14545_v53  ;;  %9835 = vmatpush3.xpose.msra.mxu0 %v12629_v15  ;;  %v9665_v10 = vpop.f32.mrf.mxu1  ;;  %v5271_v20 = vand.u32 65535, %v12402_v61 }
 0x34e   : > { %5189 = vmin.xlane.f32.xlu1 %v5188_v4  ;;  %v12786_v19 = vpop.xlane.xlu0 %5200  ;;  %9836 = vmatprep.subr.mxu0 %v14545_v53  ;;  %v5301_v10 = vand.u32 65535, %v14720_v23  ;;  %v14728_v23 = vand.u32 4294901760, %v12408_v28  ;;  %v14732_v28 = vand.u32 4294901760, %v12499_v32  ;;  %v14738_v32 = vand.u32 4294901760, %v12576_v60 }
 0x34f   : > { %v12788_v13 = vpop.xlane.xlu1 %5215  ;;  %9874 = vmatmul.mubr.f32.vlgmr.msra.gmra.mxu1 %v14716_v34  ;;  %vm5202_vm13 = vcmp.eq.f32.partialorder %v12365_v27, %v12786_v19 }
 0x350   : > { %9912 = vmatpush3.xpose.msra.mxu1 %v12318_v50  ;;  %vm5217_vm14 = vcmp.eq.f32.partialorder %v12367_v48, %v12788_v13  ;;  %v5203_v37 = vsel %vm5202_vm13, %v5198_v63, inf  ;;  %9943 = vmatprep.mubr.msk.f32.mxu1 %vm10582_vm3, %v14545_v53  ;;  %v5256_v50 = vand.u32 65535, %v12405_v58  ;;  %v5228_v48 = vcvt.s32.f32 %v5226_v3 }
 0x351   : > { %v5218_v2 = vsel %vm5217_vm14, %v5213_v45, inf  ;;  %9913 = vmatprep.subr.mxu1 %v14545_v53  ;;  %5204 = vmin.xlane.f32.xlu0 %v5203_v37  ;;  %v14719_v45 = vld [vmem:[#allocation27_spill] sm:$0xff] }
 0x352   : > { %5219 = vmin.xlane.f32.xlu1 %v5218_v2  ;;  %v12805_v0 = vpop.xlane.xlu0 %5230  ;;  %9837 = vmatpush3.xpose.msra.mxu0 %v12645_v36  ;;  %v5258_v4 = vcvt.s32.f32 %v5256_v50  ;;  %v5286_v3 = vand.u32 65535, %v14719_v45  ;;  %v14721_v2 = vand.u32 4294901760, %v12351_v51  ;;  %v14722_v50 = vld [vmem:[#allocation80_spill] sm:$0xff] }
 0x353   : > { %vm5232_vm15 = vcmp.eq.f32.partialorder %v14717_v59, %v12805_v0  ;;  %9876 = vmatprep.subr.mxu0 %v14545_v53 }
 0x354   : > { %v12807_v27 = vpop.xlane.xlu1 %5245  ;;  %9914 = vmatpush3.xpose.msra.mxu1 %v12353_v39  ;;  %v5233_v58 = vsel %vm5232_vm15, %v5228_v48, inf  ;;  %v3993_v34 = vpop.f32.mrf.mxu0  ;;  %v5273_v39 = vcvt.s32.f32 %v5271_v20  ;;  %v14723_v48 = vld [vmem:[#allocation103_spill] sm:$0xff] }
 0x355   : > { %vm5247_vm1 = vcmp.eq.f32.partialorder %v14718_v38, %v12807_v27  ;;  %9915 = vmatprep.subr.mxu1 %v14545_v53  ;;  %5234 = vmin.xlane.f32.xlu0 %v5233_v58  ;;  %v3994_v37 = vadd.f32 %v3993_v34, %v12689_v31  ;;  %v5288_v31 = vcvt.s32.f32 %v5286_v3  ;;  %v5303_v38 = vcvt.s32.f32 %v5301_v10  ;;  %v14724_v58 = vld [vmem:[#allocation102_spill] sm:$0xff]  ;;  %v14727_v34 = vld [vmem:[#allocation105_spill] sm:$0xff] }
 0x356   : > { %v5248_v11 = vsel %vm5247_vm1, %v5243_v21, inf  ;;  %9839 = vmatmul.mubr.f32.vlgmr.msra.gmra.mxu0 %v12659_v47  ;;  %v9630_v21 = vpop.f32.mrf.mxu0 }
 0x357   : > { %5249 = vmin.xlane.f32.xlu1 %v5248_v11  ;;  %v12818_v63 = vpop.xlane.xlu0 %5260  ;;  %9877 = vmatpush3.xpose.msra.mxu0 %v14721_v2  ;;  %v12835_v59 = vadd.f32 %v4082_v1, %v3994_v37  ;;  %v5316_v11 = vand.u32 65535, %v14724_v58  ;;  %v14726_v1 = vld [vmem:[#allocation101_spill] sm:$0xff]  ;;  %v14730_v37 = vand.u32 4294901760, %v12443_v6  ;;  %v14733_v6 = vand.u32 4294901760, %v12511_v41  ;;  %v14745_v2 = vld [vmem:[#allocation106_spill] sm:$0xff] }
 0x358   : > { %v12820_v61 = vpop.xlane.xlu1 %5275  ;;  %9916 = vmatpush3.xpose.msra.mxu1 %v12375_v7  ;;  %vm5262_vm2 = vcmp.eq.f32.partialorder %v14722_v50, %v12818_v63  ;;  %9878 = vmatprep.subr.mxu0 %v14545_v53  ;;  %v14740_v41 = vand.u32 4294901760, %v12601_v62  ;;  %v4292_v50 = vmin.f32 %v14745_v2, 1.0 }
 0x359   : > { %vm5277_vm4 = vcmp.eq.f32.partialorder %v14723_v48, %v12820_v61  ;;  %v5263_v47 = vsel %vm5262_vm2, %v5258_v4, inf  ;;  %9917 = vmatprep.subr.mxu1 %v14545_v53  ;;  %9908 = vmatprep.mubr.msk.f32.mxu0 %vm10582_vm3, %v14545_v53  ;;  %v14725_v4 = vand.u32 4294901760, %v12384_v12  ;;  %v5318_v12 = vcvt.s32.f32 %v5316_v11 }
 0x35a   : > { %v5278_v20 = vsel %vm5277_vm4, %v5273_v39, inf  ;;  %5264 = vmin.xlane.f32.xlu0 %v5263_v47  ;;  %v14746_v47 = vld [vmem:[#allocation97_spill] sm:$0xff]  ;;  %v5117_v11 = vcvt.f32.s32 %v12734_v52  ;;  %v5147_v52 = vcvt.f32.s32 %v12758_v54 }
 0x35b   : > { %5279 = vmin.xlane.f32.xlu1 %v5278_v20  ;;  %v12837_v51 = vpop.xlane.xlu0 %5290  ;;  %9879 = vmatpush3.xpose.msra.mxu0 %v14725_v4  ;;  %v5379_v20 = vmul.f32 0.5, %v14746_v47  ;;  %v14749_v4 = vld [vmem:[#allocation90_spill] sm:$0xff] }
 0x35c   : > { %v12839_v7 = vpop.xlane.xlu1 %5305  ;;  %9918 = vmatpush3.xpose.msra.mxu1 %v12410_v9  ;;  %vm5292_vm5 = vcmp.eq.f32.partialorder %v14726_v1, %v12837_v51  ;;  %9880 = vmatprep.subr.mxu0 %v14545_v53  ;;  %v14729_v9 = vld [vmem:[#allocation77_spill] sm:$0xff]  ;;  %v12960_v1 = vmul.f32 0.5, %v14749_v4  ;;  %v5118_v54 = vshll.u32 %v5117_v11, 16  ;;  %v5148_v2 = vshll.u32 %v5147_v52, 16 }
 0x35d   : > { %vm5307_vm6 = vcmp.eq.f32.partialorder %v14727_v34, %v12839_v7  ;;  %v5293_v39 = vsel %vm5292_vm5, %v5288_v31, inf  ;;  %9919 = vmatprep.subr.mxu1 %v14545_v53  ;;  %v14750_v34 = vld [vmem:[#allocation85_spill] sm:$0xff]  ;;  %v5252_v4 = vcvt.f32.s32 %v12807_v27 }
 0x35e   : > { %v5308_v45 = vsel %vm5307_vm6, %v5303_v38, inf  ;;  %5294 = vmin.xlane.f32.xlu0 %v5293_v39  ;;  %v14748_v38 = vld [vmem:[#allocation83_spill] sm:$0xff]  ;;  %v12963_v39 = vmul.f32 0.5, %v14750_v34  ;;  %v14762_v34 = vld [vmem:[#allocation13_spill] sm:$0xff] }
 0x35f   : > { %5309 = vmin.xlane.f32.xlu1 %v5308_v45  ;;  %v12853_v3 = vpop.xlane.xlu0 %5320  ;;  %9881 = vmatpush3.xpose.msra.mxu0 %v14728_v23  ;;  %v12956_v58 = vmul.f32 0.5, %v14748_v38  ;;  %v14751_v45 = vld [vmem:[#allocation92_spill] sm:$0xff]  ;;  %v5102_v23 = vcvt.f32.s32 %v12739_v56  ;;  %v5162_v56 = vcvt.f32.s32 %v12760_v49  ;;  %v14760_v49 = vld [vmem:[#allocation98_spill] sm:$0xff]  ;;  %v5237_v38 = vcvt.f32.s32 %v12805_v0 }
 0x360   : > { %9920 = vmatpush3.xpose.msra.mxu1 %v12424_v18  ;;  %vm5322_vm3 = vcmp.eq.f32.partialorder %v14729_v9, %v12853_v3  ;;  %9882 = vmatprep.subr.mxu0 %v14545_v53  ;;  %v14731_v18 = vand.u32 4294901760, %v12466_v40  ;;  %v5442_v40 = vld [vmem:[%s14735_s2] sm:$0xff]  ;;  %v5132_v9 = vcvt.f32.s32 %v12748_v17  ;;  %v5177_v17 = vcvt.f32.s32 %v12772_v25  ;;  %s10430_s2 = scalar_lea.vmem %s10429_s1, 64 }
 0x361   : > { %v5323_v10 = vsel %vm5322_vm3, %v5318_v12, inf  ;;  %9921 = vmatprep.subr.mxu1 %v14545_v53  ;;  %v12966_v12 = vmul.f32 0.5, %v14751_v45  ;;  %v14761_v25 = vld [vmem:[#allocation99_spill] sm:$0xff]  ;;  %v5163_v47 = vshll.u32 %v5162_v56, 16 }
 0x362   : > { %5324 = vmin.xlane.f32.xlu0 %v5323_v10  ;;  %v14752_v10 = vld [vmem:[#allocation87_spill] sm:$0xff] }
 0x363   : > { %9883 = vmatpush3.xpose.msra.mxu0 %v14730_v37  ;;  %v12971_v37 = vmul.f32 0.5, %v14752_v10 }
 0x364   : > { %9922 = vmatpush3.xpose.msra.mxu1 %v12468_v29  ;;  %9884 = vmatprep.subr.mxu0 %v14545_v53  ;;  %v14736_v29 = vand.u32 4294901760, %v12541_v33  ;;  %v14742_v33 = vmov 1.0  }
 0x365   : > { %9923 = vmatprep.subr.mxu1 %v14545_v53 }
 0x367   : > { %9885 = vmatpush3.xpose.msra.mxu0 %v14731_v18  ;;  %v14753_v18 = vld [vmem:[#allocation93_spill] sm:$0xff] }
 0x368   : > { %9924 = vmatpush3.xpose.msra.mxu1 %v12490_v43  ;;  %9886 = vmatprep.subr.mxu0 %v14545_v53  ;;  %v14734_v43 = vand.u32 4294901760, %v12532_v22 }
 0x369   : > { %9925 = vmatprep.subr.mxu1 %v14545_v53 }
 0x36b   : > { %9887 = vmatpush3.xpose.msra.mxu0 %v14732_v28  ;;  %v12974_v28 = vmul.f32 0.5, %v14753_v18 }
 0x36c   : > { %9926 = vmatpush3.xpose.msra.mxu1 %v12518_v26  ;;  %9888 = vmatprep.subr.mxu0 %v14545_v53  ;;  %v12895_v26 = vand.u32 4294901760, %v5442_v40 }
 0x36d   : > { %9927 = vmatprep.subr.mxu1 %v14545_v53 }
 0x36e   : > { %v12903_v22 = vsub.f32 %v5442_v40, %v12895_v26  ;;  %v14755_v40 = vld [vmem:[#allocation94_spill] sm:$0xff] }
 0x36f   : > { %9889 = vmatpush3.xpose.msra.mxu0 %v14733_v6  ;;  %v14754_v6 = vld [vmem:[#allocation95_spill] sm:$0xff] }
 0x370   : > { %9928 = vmatpush3.xpose.msra.mxu1 %v12525_v14  ;;  %9890 = vmatprep.subr.mxu0 %v14545_v53  ;;  %v14741_v14 = vand.u32 4294901760, %v12622_v44  ;;  %v14744_v44 = vand.u32 4294901760, %v12645_v36 }
 0x371   : > { %9929 = vmatprep.subr.mxu1 %v14545_v53 }
 0x373   : > { %9891 = vmatpush3.xpose.msra.mxu0 %v14734_v43  ;;  %v12978_v43 = vmul.f32 0.5, %v14754_v6 }
 0x374   : > { %9930 = vmatpush3.xpose.msra.mxu1 %v12547_v46  ;;  %9892 = vmatprep.subr.mxu0 %v14545_v53  ;;  %v14737_v46 = vand.u32 4294901760, %v12562_v57  ;;  %v12911_v57 = vand.u32 4294901760, %v12903_v22 }
 0x375   : > { %9931 = vmatprep.subr.mxu1 %v14545_v53 }
 0x376   : > { %v5751_v60 = vsub.f32 %v12903_v22, %v12911_v57 }
 0x377   : > { %9893 = vmatpush3.xpose.msra.mxu0 %v14736_v29  ;;  %v12981_v29 = vmul.f32 0.5, %v14755_v40  ;;  %v13020_v40 = vshll.u32 %v5237_v38, 16 }
 0x378   : > { %9932 = vmatpush3.xpose.msra.mxu1 %v12564_v35  ;;  %9894 = vmatprep.subr.mxu0 %v14545_v53  ;;  %v14743_v35 = vand.u32 4294901760, %v12629_v15 }
 0x379   : > { %9933 = vmatprep.subr.mxu1 %v14545_v53 }
 0x37b   : > { %9895 = vmatpush3.xpose.msra.mxu0 %v14737_v46  ;;  %v14756_v46 = vld [vmem:[#allocation89_spill] sm:$0xff] }
 0x37c   : > { %9934 = vmatpush3.xpose.msra.mxu1 %v12578_v5  ;;  %9896 = vmatprep.subr.mxu0 %v14545_v53  ;;  %v14739_v5 = vand.u32 4294901760, %v12594_v16  ;;  %v5752_v16 = vand.u32 4294901760, %v5751_v60  ;;  %v14757_v60 = vld [vmem:[#allocation12_spill] sm:$0xff] }
 0x37d   : > { %9935 = vmatprep.subr.mxu1 %v14545_v53 }
 0x37f   : > { %9897 = vmatpush3.xpose.msra.mxu0 %v14738_v32  ;;  %v12984_v32 = vmul.f32 0.5, %v14756_v46 }
 0x380   : > { %9936 = vmatpush3.xpose.msra.mxu1 %v12587_v30  ;;  %9898 = vmatprep.subr.mxu0 %v14545_v53 }
 0x381   : > { %9937 = vmatprep.subr.mxu1 %v14545_v53 }
 0x383   : > { %9899 = vmatpush3.xpose.msra.mxu0 %v14739_v5 }
 0x384   : > { %9938 = vmatpush3.xpose.msra.mxu1 %v12608_v42  ;;  %9900 = vmatprep.subr.mxu0 %v14545_v53 }
 0x385   : > { %9939 = vmatprep.subr.mxu1 %v14545_v53 }
 0x387   : > { %9901 = vmatpush3.xpose.msra.mxu0 %v14740_v41  ;;  %v12989_v41 = vmul.f32 0.5, %v14757_v60  ;;  %v13025_v60 = vshll.u32 %v5252_v4, 16 }
 0x388   : > { %9940 = vmatpush3.xpose.msra.mxu1 %v12615_v8  ;;  %9902 = vmatprep.subr.mxu0 %v14545_v53 }
 0x389   : > { %9941 = vmatprep.subr.mxu1 %v14545_v53 }
 0x38b   : > { %9903 = vmatpush3.xpose.msra.mxu0 %v14741_v14  ;;  %v4288_v42 = vpop.f32.mrf.mxu1 }
 0x38c   : > { %9942 = vmatpush3.xpose.msra.mxu1 %v12635_v24  ;;  %9904 = vmatprep.subr.mxu0 %v14545_v53 }
 0x38d   : > { %9972 = vmatprep.subr.mxu1 %v5752_v16  ;;  %v9735_v30 = vpop.f32.mrf.mxu1 }
 0x38f   : > { %9944 = vmatmul.mubr.msk.f32.vlgmr.msra.gmra.mxu1 %vm709_vm0, %v14742_v33  ;;  %9905 = vmatpush3.xpose.msra.mxu0 %v14743_v35  ;;  %v14759_v35 = vld [vmem:[#allocation91_spill] sm:$0xff] }
 0x390   : > { %9973 = vmatpush3.msra.mxu1 %v5752_v16  ;;  %9906 = vmatprep.subr.mxu0 %v14545_v53  ;;  %v14758_v16 = vld [vmem:[#allocation96_spill] sm:$0xff]  ;;  %v12996_v30 = vmul.f32 0.5, %v14759_v35 }
 0x391   : > { %10024 = vmatprep.subr.mxu1 %v12895_v26  ;;  %v12992_v14 = vmul.f32 0.5, %v14758_v16 }
 0x393   : > { %9907 = vmatpush3.xpose.msra.mxu0 %v14744_v44  ;;  %v5103_v44 = vshll.u32 %v5102_v23, 16  ;;  %v5267_v23 = vcvt.f32.s32 %v12818_v63  ;;  %v5312_v63 = vcvt.f32.s32 %v12839_v7 }
 0x394   : > { %9946 = vmatprep.subr.mxu0 %v12895_v26  ;;  %v4201_v24 = vpop.f32.mrf.mxu0 }
 0x395   : > { %v4202_v62 = vadd.f32 %v4201_v24, %v12835_v59  ;;  %v14747_v59 = vld [vmem:[#allocation88_spill] sm:$0xff]  ;;  %v5133_v24 = vshll.u32 %v5132_v9, 16  ;;  %v5282_v9 = vcvt.f32.s32 %v12820_v61  ;;  %v13027_v16 = vshll.u32 %v5267_v23, 16 }
 0x396   : > { %9909 = vmatmul.mubr.msk.f32.vlgmr.msra.gmra.mxu0 %vm709_vm0, %v14742_v33  ;;  %v9700_v8 = vpop.f32.mrf.mxu0  ;;  %v12953_v31 = vmul.f32 0.5, %v14747_v59  ;;  %v5222_v59 = vcvt.f32.s32 %v12788_v13 }
 0x397   : > { %9947 = vmatpush3.msra.mxu0 %v12895_v26  ;;  %v4289_v15 = vadd.f32 %v4288_v42, %v4202_v62  ;;  %v5192_v42 = vcvt.f32.s32 %v12774_v55  ;;  %v12999_v8 = vmul.f32 0.5, %v14760_v49  ;;  %v13005_v55 = vshll.u32 %v5177_v17, 16 }
 0x398   : > { %9998 = vmatprep.subr.mxu0 %v12903_v22  ;;  %v13018_v27 = vshll.u32 %v5222_v59, 16 }
 0x399   : > { %v4293_v48 = vmin.f32 %v4289_v15, 1.0  ;;  %v13002_v15 = vmul.f32 0.5, %v14761_v25  ;;  %v5193_v11 = vshll.u32 %v5192_v42, 16 }
 0x39b   : > { %v4294_v36 = vsub.f32 %v4292_v50, %v4293_v48  ;;  %v5207_v50 = vcvt.f32.s32 %v12786_v19  ;;  %v5297_v19 = vcvt.f32.s32 %v12837_v51  ;;  %v5327_v51 = vcvt.f32.s32 %v12853_v3 }
 0x39d   : > { %v12945_v21 = vmax.f32 %v4294_v36, 0.0  ;;  %v13015_v6 = vshll.u32 %v5207_v50, 16  ;;  %v13031_v42 = vshll.u32 %v5297_v19, 16  ;;  %v13041_v25 = vshll.u32 %v5327_v51, 16 }
 0x39f   : > { %7801 = vst [vmem:[%s12947_s26] sm:$0xff] %v12945_v21 }
 0x3c5   : > { %v5115_v5 = vpop.xlane.xlu0 %5114 }
 0x3c6   : > { %v5116_v33 = vcvt.f32.s32 %v5115_v5 }
 0x3c8   : > { %v5119_v48 = vadd.s32 %v5118_v54, %v5116_v33  ;;  %v13029_v54 = vshll.u32 %v5282_v9, 16 }
 0x3c9   : > { %v5100_v62 = vpop.xlane.xlu1 %5099 }
 0x3ca   : > { %v5101_v36 = vcvt.f32.s32 %v5100_v62  ;;  %vm5331_vm7 = vcmp.eq.s32.totalorder %v14762_v34, %v5119_v48 }
 0x3cb   : > { %v8233_v10 = vsel %vm5331_vm7, 1.0, %v14545_v53 }
 0x3cc   : > { %v5104_v45 = vadd.s32 %v5103_v44, %v5101_v36  ;;  %v5395_v13 = vmul.f32 0.5, %v8233_v10 }
 0x3cd   : > { %v5130_v18 = vpop.xlane.xlu1 %5129 }
 0x3ce   : > { %vm5330_vm8 = vcmp.eq.s32.totalorder %v14762_v34, %v5104_v45  ;;  %v5131_v0 = vcvt.f32.s32 %v5130_v18  ;;  %v5411_v56 = vadd.f32 %v5395_v13, %v5379_v20  ;;  %v13036_v20 = vshll.u32 %v5312_v63, 16 }
 0x3cf   : > { %v4601_v52 = vpop.f32.mrf.mxu1  ;;  %v8232_v61 = vsel %vm5330_vm8, 1.0, %v14545_v53  ;;  %vm6602_vm8 = vcmask 261120  }
 0x3d0   : > { %v5394_v17 = vmul.f32 0.5, %v8232_v61  ;;  %v5134_v5 = vadd.s32 %v5133_v24, %v5131_v0  ;;  %v5447_v7 = vsel %vm709_vm0, %v5411_v56, 0 }
 0x3d1   : > { %v9805_v46 = vpop.f32.mrf.mxu1  ;;  %v5145_v33 = vpop.xlane.xlu0 %5144  ;;  %v13038_v24 = vand.u32 4294901760, %v5447_v7 }
 0x3d2   : > { %v5410_v44 = vadd.f32 %v5394_v17, %v12953_v31  ;;  %vm5332_vm9 = vcmp.eq.s32.totalorder %v14762_v34, %v5134_v5  ;;  %v5146_v3 = vcvt.f32.s32 %v5145_v33 }
 0x3d3   : > { %v5160_v35 = vpop.xlane.xlu1 %5159  ;;  %v8234_v62 = vsel %vm5332_vm9, 1.0, %v14545_v53  ;;  %v13045_v38 = vsub.f32 %v5447_v7, %v13038_v24 }
 0x3d4   : > { %v5161_v49 = vcvt.f32.s32 %v5160_v35  ;;  %v5396_v50 = vmul.f32 0.5, %v8234_v62  ;;  %v5149_v48 = vadd.s32 %v5148_v2, %v5146_v3  ;;  %v5444_v36 = vsel %vm709_vm0, %v5410_v44, 0  ;;  %v4450_v59 = vpop.f32.mrf.mxu0 }
 0x3d5   : > { %v5175_v4 = vpop.xlane.xlu0 %5174  ;;  %v13047_v23 = vand.u32 4294901760, %v5444_v36  ;;  %v13049_v9 = vadd.f32 %v4601_v52, %v4450_v59  ;;  %v5569_v0 = vand.u32 4294901760, %v13045_v38 }
 0x3d6   : > { %v5164_v31 = vadd.s32 %v5163_v47, %v5161_v49  ;;  %v5412_v19 = vadd.f32 %v5396_v50, %v12956_v58  ;;  %vm5333_vm10 = vcmp.eq.s32.totalorder %v14762_v34, %v5149_v48  ;;  %v5176_v10 = vcvt.f32.s32 %v5175_v4  ;;  %v9770_v2 = vpop.f32.mrf.mxu0 }
 0x3d7   : > { %v5190_v45 = vpop.xlane.xlu1 %5189  ;;  %v8235_v13 = vsel %vm5333_vm10, 1.0, %v14545_v53  ;;  %9974 = vmatprep.mubr.f32.mxu1 %v13047_v23  ;;  %v13057_v47 = vsub.f32 %v5444_v36, %v13047_v23  ;;  %v5570_v33 = vsub.f32 %v13045_v38, %v5569_v0 }
 0x3d8   : > { %v5191_v18 = vcvt.f32.s32 %v5190_v45  ;;  %vm5334_vm11 = vcmp.eq.s32.totalorder %v14762_v34, %v5164_v31  ;;  %v5397_v52 = vmul.f32 0.5, %v8235_v13  ;;  %v5179_v58 = vadd.s32 %v13005_v55, %v5176_v10  ;;  %9975 = vmatmul.mubr.f32.vlgmr.msra.gmra.mxu1 %v13038_v24 }
 0x3d9   : > { %v8236_v63 = vsel %vm5334_vm11, 1.0, %v14545_v53  ;;  %v5450_v17 = vsel %vm709_vm0, %v5412_v19, 0  ;;  %v5559_v5 = vand.u32 4294901760, %v13057_v47  ;;  %10025 = vmatpush3.msra.mxu1 %v12895_v26  ;;  %v5571_v4 = vand.u32 4294901760, %v5570_v33 }
 0x3da   : > { %v5194_v61 = vadd.s32 %v5193_v11, %v5191_v18  ;;  %v5398_v46 = vmul.f32 0.5, %v8236_v63  ;;  %v5205_v51 = vpop.xlane.xlu0 %5204  ;;  %v5413_v35 = vadd.f32 %v5397_v52, %v12960_v1  ;;  %vm5335_vm12 = vcmp.eq.s32.totalorder %v14762_v34, %v5179_v58  ;;  %10076 = vmatprep.subr.mxu1 %v12895_v26 }
 0x3db   : > { %v5220_v56 = vpop.xlane.xlu1 %5219  ;;  %v5206_v55 = vcvt.f32.s32 %v5205_v51  ;;  %v8237_v7 = vsel %vm5335_vm12, 1.0, %v14545_v53  ;;  %v13077_v48 = vand.u32 4294901760, %v5450_v17  ;;  %v5560_v31 = vsub.f32 %v13057_v47, %v5559_v5 }
 0x3dc   : > { %vm5336_vm13 = vcmp.eq.s32.totalorder %v14762_v34, %v5194_v61  ;;  %v5414_v11 = vadd.f32 %v5398_v46, %v12963_v39  ;;  %v5221_v3 = vcvt.f32.s32 %v5220_v56  ;;  %v5399_v62 = vmul.f32 0.5, %v8237_v7 }
 0x3dd   : > { %v8238_v44 = vsel %vm5336_vm13, 1.0, %v14545_v53  ;;  %v5209_v50 = vadd.s32 %v13015_v6, %v5206_v55  ;;  %v5453_v39 = vsel %vm709_vm0, %v5413_v35, 0  ;;  %9977 = vmatprep.mubr.f32.mxu1 %v13077_v48  ;;  %v5561_v18 = vand.u32 4294901760, %v5560_v31 }
 0x3de   : > { %v5400_v49 = vmul.f32 0.5, %v8238_v44  ;;  %v5224_v1 = vadd.s32 %v13018_v27, %v5221_v3  ;;  %v5235_v36 = vpop.xlane.xlu0 %5234  ;;  %v5415_v45 = vadd.f32 %v5399_v62, %v12966_v12  ;;  %v13092_v63 = vand.u32 4294901760, %v5453_v39 }
 0x3df   : > { %vm5337_vm14 = vcmp.eq.s32.totalorder %v14762_v34, %v5209_v50  ;;  %v5236_v6 = vcvt.f32.s32 %v5235_v36  ;;  %9948 = vmatprep.mubr.f32.mxu0 %v5561_v18  ;;  %v5456_v58 = vsel %vm709_vm0, %v5414_v11, 0  ;;  %v13097_v51 = vsub.f32 %v5450_v17, %v13077_v48 }
 0x3e0   : > { %v5250_v59 = vpop.xlane.xlu1 %5249  ;;  %v5416_v19 = vadd.f32 %v5400_v49, %v12971_v37  ;;  %v8239_v27 = vsel %vm5337_vm14, 1.0, %v14545_v53  ;;  %vm5338_vm15 = vcmp.eq.s32.totalorder %v14762_v34, %v5224_v1  ;;  %v13102_v33 = vsub.f32 %v5453_v39, %v13092_v63  ;;  %9978 = vmatmul.mubr.f32.gmra.mxu1 %v13092_v63  ;;  %9949 = vmatmul.mubr.f32.vlgmr.msra.gmra.mxu0 %v5571_v4 }
 0x3e1   : > { %v5251_v10 = vcvt.f32.s32 %v5250_v59  ;;  %v5401_v2 = vmul.f32 0.5, %v8239_v27  ;;  %v8240_v13 = vsel %vm5338_vm15, 1.0, %v14545_v53  ;;  %v5239_v52 = vadd.s32 %v13020_v40, %v5236_v6  ;;  %9999 = vmatpush3.msra.mxu0 %v12903_v22 }
 0x3e2   : > { %v5402_v12 = vmul.f32 0.5, %v8240_v13  ;;  %v13105_v40 = vand.u32 4294901760, %v5456_v58  ;;  %v5579_v7 = vand.u32 4294901760, %v13097_v51  ;;  %10050 = vmatprep.subr.mxu0 %v12911_v57  ;;  %v5459_v3 = vsel %vm709_vm0, %v5415_v45, 0 }
 0x3e3   : > { %v5254_v37 = vadd.s32 %v13025_v60, %v5251_v10  ;;  %v5265_v61 = vpop.xlane.xlu0 %5264  ;;  %v5417_v56 = vadd.f32 %v5401_v2, %v12974_v28  ;;  %vm5339_vm1 = vcmp.eq.s32.totalorder %v14762_v34, %v5239_v52  ;;  %v5462_v62 = vsel %vm709_vm0, %v5416_v19, 0 }
 0x3e4   : > { %v5280_v46 = vpop.xlane.xlu1 %5279  ;;  %v5418_v60 = vadd.f32 %v5402_v12, %v12978_v43  ;;  %v8241_v35 = vsel %vm5339_vm1, 1.0, %v14545_v53  ;;  %v5266_v17 = vcvt.f32.s32 %v5265_v61  ;;  %9980 = vmatprep.mubr.f32.mxu1 %v13105_v40  ;;  %v5580_v1 = vsub.f32 %v13097_v51, %v5579_v7 }
 0x3e5   : > { %vm5340_vm2 = vcmp.eq.s32.totalorder %v14762_v34, %v5254_v37  ;;  %v5403_v28 = vmul.f32 0.5, %v8241_v35  ;;  %v5281_v11 = vcvt.f32.s32 %v5280_v46  ;;  %v13123_v36 = vand.u32 4294901760, %v5459_v3 }
 0x3e6   : > { %v8242_v55 = vsel %vm5340_vm2, 1.0, %v14545_v53  ;;  %v5269_v43 = vadd.s32 %v13027_v16, %v5266_v17  ;;  %v13127_v16 = vand.u32 4294901760, %v5462_v62  ;;  %v5589_v10 = vand.u32 4294901760, %v13102_v33 }
 0x3e7   : > { %v5404_v44 = vmul.f32 0.5, %v8242_v55  ;;  %v5295_v49 = vpop.xlane.xlu0 %5294  ;;  %v5419_v22 = vadd.f32 %v5403_v28, %v12981_v29  ;;  %v5284_v50 = vadd.s32 %v13029_v54, %v5281_v11  ;;  %v5581_v29 = vand.u32 4294901760, %v5580_v1  ;;  %9981 = vmatmul.mubr.f32.gmra.mxu1 %v13123_v36 }
 0x3e8   : > { %v5310_v59 = vpop.xlane.xlu1 %5309  ;;  %vm5341_vm4 = vcmp.eq.s32.totalorder %v14762_v34, %v5269_v43  ;;  %v5296_v39 = vcvt.f32.s32 %v5295_v49  ;;  %v13132_v54 = vsub.f32 %v5459_v3, %v13123_v36  ;;  %9983 = vmatprep.mubr.f32.mxu1 %v13127_v16  ;;  %v5465_v18 = vsel %vm709_vm0, %v5417_v56, 0 }
 0x3e9   : > { %v5420_v31 = vadd.f32 %v5404_v44, %v12984_v32  ;;  %v8243_v4 = vsel %vm5341_vm4, 1.0, %v14545_v53  ;;  %vm5342_vm5 = vcmp.eq.s32.totalorder %v14762_v34, %v5284_v50  ;;  %v5311_v6 = vcvt.f32.s32 %v5310_v59  ;;  %9951 = vmatprep.mubr.f32.mxu0 %v5581_v29 }
 0x3ea   : > { %v5405_v45 = vmul.f32 0.5, %v8243_v4  ;;  %v8244_v19 = vsel %vm5342_vm5, 1.0, %v14545_v53  ;;  %v5299_v32 = vadd.s32 %v13031_v42, %v5296_v39  ;;  %v13141_v2 = vsub.f32 %v5456_v58, %v13105_v40 }
 0x3eb   : > { %v5406_v27 = vmul.f32 0.5, %v8244_v19  ;;  %v5314_v52 = vadd.s32 %v13036_v20, %v5311_v6  ;;  %v13146_v12 = vand.u32 4294901760, %v5465_v18  ;;  %v5590_v61 = vsub.f32 %v13102_v33, %v5589_v10  ;;  %v5325_v58 = vpop.xlane.xlu0 %5324 }
 0x3ec   : > { %v5421_v13 = vadd.f32 %v5405_v45, %v12989_v41  ;;  %vm5343_vm6 = vcmp.eq.s32.totalorder %v14762_v34, %v5299_v32  ;;  %v5599_v46 = vand.u32 4294901760, %v13141_v2  ;;  %v5468_v20 = vsel %vm709_vm0, %v5418_v60, 0 }
 0x3ed   : > { %v5422_v42 = vadd.f32 %v5406_v27, %v12992_v14  ;;  %v8245_v37 = vsel %vm5343_vm6, 1.0, %v14545_v53  ;;  %vm5344_vm3 = vcmp.eq.s32.totalorder %v14762_v34, %v5314_v52  ;;  %v13156_v41 = vsub.f32 %v5465_v18, %v13146_v12  ;;  %9984 = vmatmul.mubr.f32.gmra.mxu1 %v13146_v12 }
 0x3ee   : > { %v5407_v56 = vmul.f32 0.5, %v8245_v37  ;;  %v8246_v14 = vsel %vm5344_vm3, 1.0, %v14545_v53  ;;  %v5591_v35 = vand.u32 4294901760, %v5590_v61  ;;  %v5600_v17 = vsub.f32 %v13141_v2, %v5599_v46 }
 0x3ef   : > { %v13164_v28 = vand.u32 4294901760, %v5468_v20  ;;  %v5408_v11 = vmul.f32 0.5, %v8246_v14  ;;  %v5326_v44 = vcvt.f32.s32 %v5325_v58  ;;  %v5609_v43 = vand.u32 4294901760, %v13132_v54 }
 0x3f0   : > { %v5423_v55 = vadd.f32 %v5407_v56, %v12996_v30  ;;  %9952 = vmatmul.mubr.f32.gmra.mxu0 %v5591_v35  ;;  %v5601_v3 = vand.u32 4294901760, %v5600_v17  ;;  %v5471_v60 = vsel %vm709_vm0, %v5419_v22, 0  ;;  %v13171_v49 = vsub.f32 %v5462_v62, %v13127_v16 }
 0x3f1   : > { %9986 = vmatprep.mubr.f32.mxu1 %v13164_v28  ;;  %v5474_v50 = vsel %vm709_vm0, %v5420_v31, 0  ;;  %v5424_v1 = vadd.f32 %v5408_v11, %v12999_v8  ;;  %v5329_v59 = vadd.s32 %v13041_v25, %v5326_v44  ;;  %v5610_v30 = vsub.f32 %v13132_v54, %v5609_v43 }
 0x3f2   : > { %v13179_v39 = vand.u32 4294901760, %v5471_v60  ;;  %9954 = vmatprep.mubr.f32.mxu0 %v5601_v3  ;;  %v5619_v4 = vand.u32 4294901760, %v13171_v49  ;;  %v13182_v29 = vand.u32 4294901760, %v5474_v50  ;;  %v5629_v62 = vand.u32 4294901760, %v13156_v41 }
 0x3f3   : > { %v5477_v22 = vsel %vm709_vm0, %v5421_v13, 0  ;;  %vm5345_vm7 = vcmp.eq.s32.totalorder %v14762_v34, %v5329_v59  ;;  %v5611_v8 = vand.u32 4294901760, %v5610_v30  ;;  %v13202_v32 = vsub.f32 %v5468_v20, %v13164_v28 }
 0x3f4   : > { %v13188_v25 = vsub.f32 %v5471_v60, %v13179_v39  ;;  %9987 = vmatmul.mubr.f32.gmra.mxu1 %v13179_v39  ;;  %v13191_v31 = vand.u32 4294901760, %v5477_v22  ;;  %v8247_v45 = vsel %vm5345_vm7, 1.0, %v14545_v53  ;;  %v5620_v19 = vsub.f32 %v13171_v49, %v5619_v4 }
 0x3f5   : > { %9989 = vmatprep.mubr.f32.mxu1 %v13182_v29  ;;  %v5630_v34 = vsub.f32 %v13156_v41, %v5629_v62  ;;  %v5409_v6 = vmul.f32 0.5, %v8247_v45  ;;  %9955 = vmatmul.mubr.f32.gmra.mxu0 %v5611_v8  ;;  %v5480_v53 = vsel %vm709_vm0, %v5422_v42, 0  ;;  %v5639_v37 = vand.u32 4294901760, %v13202_v32 }
 0x3f6   : > { %v13205_v27 = vsub.f32 %v5477_v22, %v13191_v31  ;;  %v5649_v18 = vand.u32 4294901760, %v13188_v25  ;;  %v5621_v13 = vand.u32 4294901760, %v5620_v19  ;;  %v13210_v61 = vand.u32 4294901760, %v5480_v53 }
 0x3f7   : > { %v5631_v52 = vand.u32 4294901760, %v5630_v34  ;;  %v5425_v58 = vadd.f32 %v5409_v6, %v13002_v15  ;;  %v5483_v20 = vsel %vm709_vm0, %v5423_v55, 0  ;;  %v13219_v42 = vsub.f32 %v5474_v50, %v13182_v29 }
 0x3f8   : > { %9990 = vmatmul.mubr.f32.gmra.mxu1 %v13191_v31  ;;  %v5650_v56 = vsub.f32 %v13188_v25, %v5649_v18  ;;  %9957 = vmatprep.mubr.f32.mxu0 %v5621_v13  ;;  %v5640_v14 = vsub.f32 %v13202_v32, %v5639_v37  ;;  %v13225_v35 = vand.u32 4294901760, %v5483_v20  ;;  %v5486_v15 = vsel %vm709_vm0, %v5424_v1, 0 }
 0x3f9   : > { %9992 = vmatprep.mubr.f32.mxu1 %v13210_v61  ;;  %v5669_v17 = vand.u32 4294901760, %v13205_v27  ;;  %9958 = vmatmul.mubr.f32.gmra.mxu0 %v5631_v52  ;;  %v5659_v55 = vand.u32 4294901760, %v13219_v42  ;;  %v13230_v44 = vand.u32 4294901760, %v5486_v15  ;;  %v5489_v3 = vsel %vm709_vm0, %v5425_v58, 0 }
 0x3fa   : > { %v5651_v11 = vand.u32 4294901760, %v5650_v56  ;;  %v5641_v60 = vand.u32 4294901760, %v5640_v14  ;;  %v13234_v50 = vsub.f32 %v5483_v20, %v13225_v35  ;;  %v13239_v30 = vand.u32 4294901760, %v5489_v3 }
 0x3fb   : > { %v5670_v59 = vsub.f32 %v13205_v27, %v5669_v17  ;;  %v5660_v1 = vsub.f32 %v13219_v42, %v5659_v55  ;;  %v13244_v22 = vsub.f32 %v5480_v53, %v13210_v61  ;;  %v13247_v8 = vsub.f32 %v5486_v15, %v13230_v44 }
 0x3fc   : > { %9993 = vmatmul.mubr.f32.gmra.mxu1 %v13225_v35  ;;  %9960 = vmatprep.mubr.f32.mxu0 %v5641_v60  ;;  %v13251_v45 = vsub.f32 %v5489_v3, %v13239_v30  ;;  %v5689_v19 = vand.u32 4294901760, %v13234_v50  ;;  %vm7781_vm0 = vcmask 1040384  }
 0x3fd   : > { %9995 = vmatprep.mubr.f32.mxu1 %v13230_v44  ;;  %9961 = vmatmul.mubr.f32.gmra.mxu0 %v5651_v11  ;;  %v5661_v34 = vand.u32 4294901760, %v5660_v1  ;;  %v5671_v6 = vand.u32 4294901760, %v5670_v59  ;;  %v5679_v13 = vand.u32 4294901760, %v13244_v22  ;;  %v5699_v52 = vand.u32 4294901760, %v13247_v8 }
 0x3fe   : > { %v5690_v53 = vsub.f32 %v13234_v50, %v5689_v19  ;;  %v5709_v58 = vand.u32 4294901760, %v13251_v45 }
 0x3ff   : > { %9963 = vmatprep.mubr.f32.mxu0 %v5661_v34  ;;  %v5680_v56 = vsub.f32 %v13244_v22, %v5679_v13  ;;  %v5700_v20 = vsub.f32 %v13247_v8, %v5699_v52 }
 0x400   : > { %9996 = vmatmul.mubr.f32.gmra.mxu1 %v13239_v30  ;;  %v5691_v15 = vand.u32 4294901760, %v5690_v53  ;;  %v5710_v11 = vsub.f32 %v13251_v45, %v5709_v58 }
 0x401   : > { %10026 = vmatprep.mubr.f32.mxu1 %v5559_v5  ;;  %9964 = vmatmul.mubr.f32.gmra.mxu0 %v5671_v6  ;;  %v5681_v14 = vand.u32 4294901760, %v5680_v56  ;;  %v5701_v3 = vand.u32 4294901760, %v5700_v20 }
 0x402   : > { %v5711_v60 = vand.u32 4294901760, %v5710_v11 }
 0x403   : > { %9966 = vmatprep.mubr.f32.mxu0 %v5681_v14 }
 0x404   : > { %10027 = vmatmul.mubr.f32.vlgmr.msra.gmra.mxu1 %v5569_v0 }
 0x405   : > { %10029 = vmatprep.mubr.f32.mxu1 %v5579_v7  ;;  %10077 = vmatpush3.msra.mxu1 %v12895_v26 }
 0x406   : > { %9967 = vmatmul.mubr.f32.gmra.mxu0 %v5691_v15 }
 0x407   : > { %9969 = vmatprep.mubr.f32.mxu0 %v5701_v3 }
 0x408   : > { %10030 = vmatmul.mubr.f32.gmra.mxu1 %v5589_v10 }
 0x409   : > { %10032 = vmatprep.mubr.f32.mxu1 %v5599_v46 }
 0x40a   : > { %9970 = vmatmul.mubr.f32.gmra.mxu0 %v5711_v60 }
 0x40b   : > { %10000 = vmatprep.mubr.f32.mxu0 %v13057_v47 }
 0x40c   : > { %10033 = vmatmul.mubr.f32.gmra.mxu1 %v5609_v43 }
 0x40d   : > { %10035 = vmatprep.mubr.f32.mxu1 %v5619_v4 }
 0x40e   : > { %10001 = vmatmul.mubr.f32.vlgmr.msra.gmra.mxu0 %v13045_v38 }
 0x40f   : > { %v4794_v26 = vpop.f32.mrf.mxu1  ;;  %10051 = vmatpush3.msra.mxu0 %v12911_v57  ;;  %10003 = vmatprep.mubr.f32.mxu0 %v13097_v51 }
 0x410   : > { %10036 = vmatmul.mubr.f32.gmra.mxu1 %v5629_v62 }
 0x411   : > { %v9875_v0 = vpop.f32.mrf.mxu1  ;;  %10038 = vmatprep.mubr.f32.mxu1 %v5639_v37 }
 0x412   : > { %10004 = vmatmul.mubr.f32.gmra.mxu0 %v13102_v33 }
 0x413   : > { %10006 = vmatprep.mubr.f32.mxu0 %v13141_v2 }
 0x414   : > { %10039 = vmatmul.mubr.f32.gmra.mxu1 %v5649_v18 }
 0x415   : > { %10041 = vmatprep.mubr.f32.mxu1 %v5659_v55 }
 0x416   : > { %10007 = vmatmul.mubr.f32.gmra.mxu0 %v13132_v54  ;;  %v4705_v57 = vpop.f32.mrf.mxu0 }
 0x417   : > { %10009 = vmatprep.mubr.f32.mxu0 %v13171_v49  ;;  %v4706_v38 = vadd.f32 %v4705_v57, %v13049_v9 }
 0x418   : > { %10042 = vmatmul.mubr.f32.gmra.mxu1 %v5669_v17  ;;  %v9840_v47 = vpop.f32.mrf.mxu0 }
 0x419   : > { %10044 = vmatprep.mubr.f32.mxu1 %v5679_v13  ;;  %v4795_v5 = vadd.f32 %v4794_v26, %v4706_v38 }
 0x41a   : > { %10010 = vmatmul.mubr.f32.gmra.mxu0 %v13156_v41 }
 0x41b   : > { %10012 = vmatprep.mubr.f32.mxu0 %v13202_v32 }
 0x41c   : > { %10045 = vmatmul.mubr.f32.gmra.mxu1 %v5689_v19 }
 0x41d   : > { %10047 = vmatprep.mubr.f32.mxu1 %v5699_v52 }
 0x41e   : > { %10013 = vmatmul.mubr.f32.gmra.mxu0 %v13188_v25  ;;  %v6599_v25 = vld [vmem:[%s14763_s3 + $0x8] sm:$0xff] }
 0x41f   : > { %10015 = vmatprep.mubr.f32.mxu0 %v13219_v42 }
 0x420   : > { %10048 = vmatmul.mubr.f32.gmra.mxu1 %v5709_v58 }
 0x421   : > { %10078 = vmatprep.mubr.f32.mxu1 %v13047_v23 }
 0x422   : > { %10016 = vmatmul.mubr.f32.gmra.mxu0 %v13205_v27  ;;  %v6598_v27 = vld [vmem:[%s14763_s3] sm:$0xff] }
 0x423   : > { %10018 = vmatprep.mubr.f32.mxu0 %v13244_v22  ;;  %v13387_v37 = vand.u32 4294901760, %v6598_v27 }
 0x424   : > { %10079 = vmatmul.mubr.f32.vlgmr.msra.gmra.mxu1 %v13038_v24 }
 0x425   : > { %10081 = vmatprep.mubr.f32.mxu1 %v13077_v48  ;;  %14773 = vst [vmem:[#allocation114_spill] sm:$0xff] %v13387_v37  ;;  %v13392_v42 = vsub.f32 %v6598_v27, %v13387_v37 }
 0x426   : > { %10019 = vmatmul.mubr.f32.gmra.mxu0 %v13234_v50 }
 0x427   : > { %10021 = vmatprep.mubr.f32.mxu0 %v13247_v8  ;;  %14774 = vst [vmem:[#allocation135_spill] sm:$0xff] %v13392_v42  ;;  %v13397_v17 = vand.u32 4294901760, %v13392_v42 }
 0x428   : > { %10082 = vmatmul.mubr.f32.gmra.mxu1 %v13092_v63 }
 0x429   : > { %10084 = vmatprep.mubr.f32.mxu1 %v13105_v40  ;;  %14775 = vst [vmem:[#allocation73_spill] sm:$0xff] %v13397_v17  ;;  %v6929_v55 = vsub.f32 %v13392_v42, %v13397_v17 }
 0x42a   : > { %10022 = vmatmul.mubr.f32.gmra.mxu0 %v13251_v45 }
 0x42b   : > { %10052 = vmatprep.mubr.f32.mxu0 %v13047_v23 }
 0x42c   : > { %10085 = vmatmul.mubr.f32.gmra.mxu1 %v13123_v36 }
 0x42d   : > { %10087 = vmatprep.mubr.f32.mxu1 %v13127_v16 }
 0x42e   : > { %10053 = vmatmul.mubr.f32.vlgmr.msra.gmra.mxu0 %v13038_v24  ;;  %v5004_v24 = vrot.slane %v12945_v21, 4 }
 0x42f   : > { %10055 = vmatprep.mubr.f32.mxu0 %v13077_v48 }
 0x430   : > { %10088 = vmatmul.mubr.f32.gmra.mxu1 %v13146_v12  ;;  %v5005_v23 = vmax.f32 %v12945_v21, %v5004_v24  ;;  %v6601_v21 = vld [vmem:[%s14763_s3 + $0x18] sm:$0xff] }
 0x431   : > { %10090 = vmatprep.mubr.f32.mxu1 %v13164_v28  ;;  %v13344_v2 = vand.u32 4294901760, %v6601_v21 }
 0x432   : > { %10056 = vmatmul.mubr.f32.gmra.mxu0 %v13092_v63  ;;  %v5006_v9 = vrot.slane %v5005_v23, 2 }
 0x433   : > { %10058 = vmatprep.mubr.f32.mxu0 %v13105_v40  ;;  %14764 = vst [vmem:[#allocation20_spill] sm:$0xff] %v13344_v2  ;;  %10102 = vmatprep.subr.mxu0 %v13344_v2 }
 0x434   : > { %10091 = vmatmul.mubr.f32.gmra.mxu1 %v13179_v39  ;;  %v5007_v51 = vmax.f32 %v5005_v23, %v5006_v9  ;;  %10103 = vmatpush3.msra.mxu0 %v13344_v2 }
 0x435   : > { %10093 = vmatprep.mubr.f32.mxu1 %v13182_v29 }
 0x436   : > { %10059 = vmatmul.mubr.f32.gmra.mxu0 %v13123_v36  ;;  %v5008_v33 = vrot.slane %v5007_v51, 1 }
 0x437   : > { %10061 = vmatprep.mubr.f32.mxu0 %v13127_v16 }
 0x438   : > { %10094 = vmatmul.mubr.f32.gmra.mxu1 %v13191_v31  ;;  %v5009_v54 = vmax.f32 %v5007_v51, %v5008_v33 }
 0x439   : > { %10096 = vmatprep.mubr.f32.mxu1 %v13210_v61 }
 0x43a   : > { %10062 = vmatmul.mubr.f32.gmra.mxu0 %v13146_v12  ;;  %v13348_v12 = vsub.f32 %v6601_v21, %v13344_v2 }
 0x43b   : > { %10064 = vmatprep.mubr.f32.mxu0 %v13164_v28  ;;  %v6600_v28 = vld [vmem:[%s14763_s3 + $0x10] sm:$0xff] }
 0x43c   : > { %10097 = vmatmul.mubr.f32.gmra.mxu1 %v13225_v35  ;;  %14765 = vst [vmem:[#allocation107_spill] sm:$0xff] %v13348_v12  ;;  %v13352_v46 = vand.u32 4294901760, %v13348_v12  ;;  %v13359_v49 = vand.u32 4294901760, %v6600_v28 }
 0x43d   : > { %10099 = vmatprep.mubr.f32.mxu1 %v13230_v44 }
 0x43e   : > { %10065 = vmatmul.mubr.f32.gmra.mxu0 %v13179_v39  ;;  %14766 = vst [vmem:[#allocation108_spill] sm:$0xff] %v13352_v46  ;;  %v6908_v41 = vsub.f32 %v13348_v12, %v13352_v46  ;;  %14767 = vst [vmem:[#allocation78_spill] sm:$0xff] %v13359_v49  ;;  %10104 = vmatprep.subr.mxu0 %v13359_v49  ;;  %v13363_v39 = vsub.f32 %v6600_v28, %v13359_v49 }
 0x43f   : > { %10067 = vmatprep.mubr.f32.mxu0 %v13182_v29  ;;  %10105 = vmatpush3.msra.mxu0 %v13359_v49 }
 0x440   : > { %10100 = vmatmul.mubr.f32.gmra.mxu1 %v13239_v30  ;;  %v6909_v43 = vand.u32 4294901760, %v6908_v41  ;;  %14768 = vst [vmem:[#allocation109_spill] sm:$0xff] %v13363_v39  ;;  %v13367_v4 = vand.u32 4294901760, %v13363_v39 }
 0x442   : > { %10068 = vmatmul.mubr.f32.gmra.mxu0 %v13191_v31  ;;  %10134 = vmatprep.subr.mxu1 %v6909_v43  ;;  %14769 = vst [vmem:[#allocation10_spill] sm:$0xff] %v13367_v4  ;;  %v6915_v29 = vsub.f32 %v13363_v39, %v13367_v4  ;;  %v13374_v31 = vand.u32 4294901760, %v6599_v25 }
 0x443   : > { %10070 = vmatprep.mubr.f32.mxu0 %v13210_v61  ;;  %10135 = vmatpush3.msra.mxu1 %v6909_v43 }
 0x444   : > { %v6916_v62 = vand.u32 4294901760, %v6915_v29  ;;  %14770 = vst [vmem:[#allocation118_spill] sm:$0xff] %v13374_v31  ;;  %10106 = vmatprep.subr.mxu0 %v13374_v31  ;;  %v13378_v32 = vsub.f32 %v6599_v25, %v13374_v31 }
 0x445   : > { %10107 = vmatpush3.msra.mxu0 %v13374_v31 }
 0x446   : > { %10071 = vmatmul.mubr.f32.gmra.mxu0 %v13225_v35  ;;  %10136 = vmatprep.subr.mxu1 %v6916_v62  ;;  %14771 = vst [vmem:[#allocation113_spill] sm:$0xff] %v13378_v32  ;;  %v13385_v18 = vand.u32 4294901760, %v13378_v32 }
 0x447   : > { %10073 = vmatprep.mubr.f32.mxu0 %v13230_v44  ;;  %10137 = vmatpush3.msra.mxu1 %v6916_v62  ;;  %v6930_v44 = vand.u32 4294901760, %v6929_v55 }
 0x448   : > { %14772 = vst [vmem:[#allocation120_spill] sm:$0xff] %v13385_v18  ;;  %v6922_v61 = vsub.f32 %v13378_v32, %v13385_v18  ;;  %10108 = vmatprep.subr.mxu0 %v13387_v37 }
 0x449   : > { %10109 = vmatpush3.msra.mxu0 %v13387_v37 }
 0x44a   : > { %10074 = vmatmul.mubr.f32.gmra.mxu0 %v13239_v30  ;;  %v6923_v35 = vand.u32 4294901760, %v6922_v61  ;;  %10166 = vmatprep.subr.mxu0 %v13348_v12 }
 0x44c   : > { %10138 = vmatprep.subr.mxu1 %v6923_v35 }
 0x44d   : > { %10139 = vmatpush3.msra.mxu1 %v6923_v35 }
 0x44e   : > { %10140 = vmatprep.subr.mxu1 %v6930_v44 }
 0x44f   : > { %v5000_v48 = vpop.f32.mrf.mxu1  ;;  %10141 = vmatpush3.msra.mxu1 %v6930_v44 }
 0x450   : > { %10198 = vmatprep.subr.mxu1 %v13344_v2 }
 0x451   : > { %v9945_v63 = vpop.f32.mrf.mxu1 }
 0x456   : > { %v4913_v40 = vpop.f32.mrf.mxu0 }
 0x457   : > { %v4914_v7 = vadd.f32 %v4913_v40, %v4795_v5 }
 0x458   : > { %v9910_v36 = vpop.f32.mrf.mxu0 }
 0x459   : > { %v5001_v16 = vadd.f32 %v5000_v48, %v4914_v7 }
 0x45b   : > { %v7782_v10 = vsel %vm7781_vm0, %v5001_v16, %v5009_v54 }
 0x45c   : > { %7783 = vst [vmem:[%s13338_s28] sm:$0x3] %v7782_v10 }
 0x498   : > { %v13403_v50 = vpop.f32.mrf.mxu1 }
 0x49a   : > { %v13405_v59 = vpop.f32.mrf.mxu1 }
 0x4a0   : > { %v13407_v30 = vpop.f32.mrf.mxu1  ;;  %v9950_v8 = vpop.f32.mrf.mxu0 }
 0x4a1   : > { %v5796_v2 = vadd.f32 %v13403_v50, %v9950_v8 }
 0x4a2   : > { %v13409_v1 = vpop.f32.mrf.mxu1  ;;  %v5563_v34 = vpop.f32.mrf.mxu0 }
 0x4a7   : > { %v13411_v22 = vpop.f32.mrf.mxu1 }
 0x4a9   : > { %v13413_v45 = vpop.f32.mrf.mxu1 }
 0x4ad   : > { %v13415_v19 = vpop.f32.mrf.mxu1 }
 0x4af   : > { %v13417_v6 = vpop.f32.mrf.mxu1 }
 0x4b0   : > { %v9953_v13 = vpop.f32.mrf.mxu0 }
 0x4b2   : > { %v5583_v52 = vpop.f32.mrf.mxu0 }
 0x4b4   : > { %v13419_v53 = vpop.f32.mrf.mxu1 }
 0x4b5   : > { %v9956_v58 = vpop.f32.mrf.mxu0 }
 0x4b6   : > { %v13421_v56 = vpop.f32.mrf.mxu1 }
 0x4b7   : > { %v5603_v20 = vpop.f32.mrf.mxu0 }
 0x4b8   : > { %v13423_v14 = vpop.f32.mrf.mxu1 }
 0x4b9   : > { %v9959_v15 = vpop.f32.mrf.mxu0 }
 0x4ba   : > { %v13425_v11 = vpop.f32.mrf.mxu1 }
 0x4bb   : > { %v5623_v3 = vpop.f32.mrf.mxu0 }
 0x4bc   : > { %v13427_v60 = vpop.f32.mrf.mxu1  ;;  %v5826_v50 = vadd.f32 %v13417_v6, %v5623_v3 }
 0x4bd   : > { %v9962_v26 = vpop.f32.mrf.mxu0 }
 0x4be   : > { %v13429_v0 = vpop.f32.mrf.mxu1 }
 0x4bf   : > { %v5643_v57 = vpop.f32.mrf.mxu0 }
 0x4c0   : > { %v13431_v38 = vpop.f32.mrf.mxu1 }
 0x4c1   : > { %v9965_v47 = vpop.f32.mrf.mxu0 }
 0x4c2   : > { %v13433_v5 = vpop.f32.mrf.mxu1 }
 0x4c3   : > { %v5663_v24 = vpop.f32.mrf.mxu0 }
 0x4c4   : > { %v10028_v23 = vpop.f32.mrf.mxu1 }
 0x4c6   : > { %v9968_v9 = vpop.f32.mrf.mxu0  ;;  %v13435_v48 = vpop.f32.mrf.mxu1 }
 0x4c8   : > { %v5683_v63 = vpop.f32.mrf.mxu0  ;;  %v13437_v51 = vpop.f32.mrf.mxu1 }
 0x4c9   : > { %v5862_v6 = vadd.f32 %v13429_v0, %v5683_v63 }
 0x4ca   : > { %v9971_v33 = vpop.f32.mrf.mxu0  ;;  %v13439_v40 = vpop.f32.mrf.mxu1 }
 0x4cc   : > { %v5703_v7 = vpop.f32.mrf.mxu0  ;;  %v13441_v36 = vpop.f32.mrf.mxu1 }
 0x4ce   : > { %v10002_v16 = vpop.f32.mrf.mxu0  ;;  %v13443_v54 = vpop.f32.mrf.mxu1 }
 0x4cf   : > { %14776 = vst [vmem:[#allocation65_spill] sm:$0xff] %v13443_v54 }
 0x4d0   : > { %v5953_v10 = vpop.f32.mrf.mxu0  ;;  %v13445_v21 = vpop.f32.mrf.mxu1 }
 0x4d1   : > { %14777 = vst [vmem:[#allocation128_spill] sm:$0xff] %v13445_v21 }
 0x4d2   : > { %v10005_v41 = vpop.f32.mrf.mxu0  ;;  %v13447_v28 = vpop.f32.mrf.mxu1 }
 0x4d3   : > { %14778 = vst [vmem:[#allocation122_spill] sm:$0xff] %v13447_v28  ;;  %v5832_v28 = vadd.f32 %v13415_v19, %v9959_v15 }
 0x4d4   : > { %v5967_v43 = vpop.f32.mrf.mxu0  ;;  %v13449_v29 = vpop.f32.mrf.mxu1 }
 0x4d5   : > { %14779 = vst [vmem:[#allocation115_spill] sm:$0xff] %v13449_v29  ;;  %v5802_v29 = vadd.f32 %v13409_v1, %v5583_v52  ;;  %v5856_v1 = vadd.f32 %v13423_v14, %v9965_v47 }
 0x4d6   : > { %v10008_v62 = vpop.f32.mrf.mxu0  ;;  %v13451_v25 = vpop.f32.mrf.mxu1 }
 0x4d7   : > { %14780 = vst [vmem:[#allocation124_spill] sm:$0xff] %v13451_v25  ;;  %v5808_v25 = vadd.f32 %v13407_v30, %v9953_v13  ;;  %v5838_v30 = vadd.f32 %v13421_v56, %v5643_v57  ;;  %v5868_v13 = vadd.f32 %v13427_v60, %v9968_v9  ;;  %v5427_v57 = vld [vmem:[%s13488_s21 + $0x8] sm:$0xff] }
 0x4d8   : > { %v5981_v27 = vpop.f32.mrf.mxu0  ;;  %v13453_v61 = vpop.f32.mrf.mxu1 }
 0x4d9   : > { %14781 = vst [vmem:[#allocation116_spill] sm:$0xff] %v13453_v61  ;;  %v5975_v8 = vadd.f32 %v10005_v41, %v5808_v25 }
 0x4da   : > { %v10011_v35 = vpop.f32.mrf.mxu0  ;;  %v13455_v55 = vpop.f32.mrf.mxu1 }
 0x4db   : > { %14782 = vst [vmem:[#allocation137_spill] sm:$0xff] %v13455_v55  ;;  %v6003_v56 = vadd.f32 %v10011_v35, %v5832_v28  ;;  %v6157_v0 = vadd.f32 %v13437_v51, %v5975_v8  ;;  %v14790_v51 = vld [vmem:[#allocation122_spill] sm:$0xff] }
 0x4dc   : > { %v5995_v44 = vpop.f32.mrf.mxu0  ;;  %v13457_v17 = vpop.f32.mrf.mxu1 }
 0x4dd   : > { %14783 = vst [vmem:[#allocation139_spill] sm:$0xff] %v13457_v17  ;;  %v5790_v17 = vadd.f32 %v13405_v59, %v5563_v34  ;;  %v5844_v59 = vadd.f32 %v13419_v53, %v9962_v26  ;;  %v5880_v53 = vadd.f32 %v13431_v38, %v9971_v33 }
 0x4de   : > { %v10014_v18 = vpop.f32.mrf.mxu0  ;;  %v13459_v4 = vpop.f32.mrf.mxu1  ;;  %v14792_v25 = vld [vmem:[#allocation124_spill] sm:$0xff] }
 0x4df   : > { %14784 = vst [vmem:[#allocation125_spill] sm:$0xff] %v13459_v4  ;;  %v5961_v4 = vadd.f32 %v10002_v16, %v5796_v2  ;;  %v5954_v2 = vadd.f32 %v5953_v10, %v5790_v17 }
 0x4e0   : > { %v6009_v46 = vpop.f32.mrf.mxu0  ;;  %v13461_v42 = vpop.f32.mrf.mxu1  ;;  %v14793_v35 = vld [vmem:[#allocation116_spill] sm:$0xff] }
 0x4e1   : > { %14785 = vst [vmem:[#allocation117_spill] sm:$0xff] %v13461_v42  ;;  %v5820_v42 = vadd.f32 %v13411_v22, %v9956_v58  ;;  %v5850_v22 = vadd.f32 %v13425_v11, %v5663_v24  ;;  %v6141_v17 = vadd.f32 %v10028_v23, %v5961_v4  ;;  %v5874_v11 = vadd.f32 %v13433_v5, %v5703_v7  ;;  %v14789_v7 = vld [vmem:[#allocation128_spill] sm:$0xff] }
 0x4e2   : > { %v10017_v32 = vpop.f32.mrf.mxu0  ;;  %v13463_v39 = vpop.f32.mrf.mxu1  ;;  %v6133_v3 = vadd.f32 %v13435_v48, %v5954_v2  ;;  %v6010_v60 = vadd.f32 %v6009_v46, %v5838_v30  ;;  %v5426_v48 = vld [vmem:[%s13488_s21] sm:$0xff]  ;;  %v6189_v16 = vadd.f32 %v14789_v7, %v6003_v56  ;;  %v14794_v8 = vld [vmem:[#allocation137_spill] sm:$0xff]  ;;  %v5431_v56 = vld [vmem:[%s13488_s21 + $0x28] sm:$0xff] }
 0x4e3   : > { %14786 = vst [vmem:[#allocation126_spill] sm:$0xff] %v13463_v39  ;;  %v5814_v39 = vadd.f32 %v13413_v45, %v5603_v20  ;;  %v5968_v45 = vadd.f32 %v5967_v43, %v5802_v29  ;;  %v5989_v52 = vadd.f32 %v10008_v62, %v5820_v42  ;;  %v5996_v20 = vadd.f32 %v5995_v44, %v5826_v50  ;;  %v5429_v62 = vld [vmem:[%s13488_s21 + $0x18] sm:$0xff] }
 0x4e4   : > { %v6023_v12 = vpop.f32.mrf.mxu0  ;;  %v10080_v37 = vpop.f32.mrf.mxu1  ;;  %v6017_v42 = vadd.f32 %v10014_v18, %v5844_v59  ;;  %v6031_v26 = vadd.f32 %v10017_v32, %v5856_v1  ;;  %v14788_v18 = vld [vmem:[#allocation65_spill] sm:$0xff] }
 0x4e5   : > { %v5982_v58 = vadd.f32 %v5981_v27, %v5814_v39  ;;  %v6149_v38 = vadd.f32 %v13439_v40, %v5968_v45  ;;  %v6173_v5 = vadd.f32 %v13441_v36, %v5989_v52  ;;  %v6024_v63 = vadd.f32 %v6023_v12, %v5850_v22  ;;  %v14791_v40 = vld [vmem:[#allocation115_spill] sm:$0xff] }
 0x4e6   : > { %v10020_v31 = vpop.f32.mrf.mxu0  ;;  %v6488_v49 = vpop.f32.mrf.mxu1  ;;  %v6181_v10 = vadd.f32 %v14790_v51, %v5996_v20  ;;  %v13509_v43 = vadd.f32 %v14791_v40, %v6017_v42  ;;  %v13515_v27 = vadd.f32 %v14792_v25, %v6010_v60  ;;  %v13518_v44 = vadd.f32 %v14793_v35, %v6031_v26  ;;  %v5433_v51 = vld [vmem:[%s13488_s21 + $0x38] sm:$0xff]  ;;  %v5432_v35 = vld [vmem:[%s13488_s21 + $0x30] sm:$0xff] }
 0x4e7   : > { %v6165_v9 = vadd.f32 %v14788_v18, %v5982_v58  ;;  %v6045_v33 = vadd.f32 %v10020_v31, %v5868_v13  ;;  %v13528_v45 = vadd.f32 %v14794_v8, %v6024_v63  ;;  %v14795_v13 = vld [vmem:[#allocation139_spill] sm:$0xff] }
 0x4e8   : > { %v6037_v61 = vpop.f32.mrf.mxu0  ;;  %v13466_v55 = vpop.f32.mrf.mxu1  ;;  %v14797_v42 = vld [vmem:[#allocation117_spill] sm:$0xff] }
 0x4e9   : > { %v6038_v36 = vadd.f32 %v6037_v61, %v5862_v6  ;;  %v13531_v52 = vadd.f32 %v14795_v13, %v6045_v33  ;;  %v5435_v13 = vld [vmem:[%s13488_s21 + $0x48] sm:$0xff] }
 0x4ea   : > { %v10023_v21 = vpop.f32.mrf.mxu0  ;;  %v13474_v54 = vpop.f32.mrf.mxu1 }
 0x4eb   : > { %v6059_v29 = vadd.f32 %v10023_v21, %v5880_v53  ;;  %v5428_v21 = vld [vmem:[%s13488_s21 + $0x10] sm:$0xff] }
 0x4ec   : > { %v6051_v34 = vpop.f32.mrf.mxu0  ;;  %v13481_v19 = vpop.f32.mrf.mxu1 }
 0x4ed   : > { %v6052_v2 = vadd.f32 %v6051_v34, %v5874_v11 }
 0x4ee   : > { %v10054_v14 = vpop.f32.mrf.mxu0  ;;  %v13492_v15 = vpop.f32.mrf.mxu1 }
 0x4ef   : > { %v6333_v39 = vadd.f32 %v10054_v14, %v6141_v17  ;;  %v14796_v14 = vld [vmem:[#allocation125_spill] sm:$0xff] }
 0x4f0   : > { %v6326_v4 = vpop.f32.mrf.mxu0  ;;  %v13498_v47 = vpop.f32.mrf.mxu1  ;;  %v13542_v11 = vadd.f32 %v14796_v14, %v6038_v36 }
 0x4f1   : > { %v6495_v24 = vadd.f32 %v10080_v37, %v6333_v39  ;;  %v6327_v23 = vadd.f32 %v6326_v4, %v6133_v3  ;;  %v13545_v39 = vadd.f32 %v14797_v42, %v6059_v29  ;;  %v14800_v29 = vld [vmem:[#allocation78_spill] sm:$0xff] }
 0x4f2   : > { %v10057_v46 = vpop.f32.mrf.mxu0  ;;  %v13504_v32 = vpop.f32.mrf.mxu1 }
 0x4f3   : > { %v6583_v41 = vmul.f32 %v6495_v24, %v5427_v57  ;;  %v6489_v28 = vadd.f32 %v6488_v49, %v6327_v23  ;;  %v6345_v37 = vadd.f32 %v10057_v46, %v6157_v0 }
 0x4f4   : > { %v6338_v12 = vpop.f32.mrf.mxu0  ;;  %v13512_v31 = vpop.f32.mrf.mxu1 }
 0x4f5   : > { %v6607_v50 = vsel %vm6602_vm8, %v6583_v41, 0  ;;  %v6582_v49 = vmul.f32 %v6489_v28, %v5426_v48  ;;  %v6507_v59 = vadd.f32 %v13466_v55, %v6345_v37  ;;  %v6339_v30 = vadd.f32 %v6338_v12, %v6149_v38  ;;  %v5430_v38 = vld [vmem:[%s13488_s21 + $0x20] sm:$0xff]  ;;  %v14799_v37 = vld [vmem:[#allocation20_spill] sm:$0xff] }
 0x4f6   : > { %v13522_v61 = vand.u32 4294901760, %v6607_v50  ;;  %v10060_v1 = vpop.f32.mrf.mxu0  ;;  %v13525_v22 = vpop.f32.mrf.mxu1 }
 0x4f7   : > { %v6604_v58 = vsel %vm6602_vm8, %v6582_v49, 0  ;;  %v6585_v17 = vmul.f32 %v6507_v59, %v5429_v62  ;;  %v6501_v55 = vadd.f32 %v13474_v54, %v6339_v30  ;;  %v6357_v6 = vadd.f32 %v10060_v1, %v6173_v5  ;;  %v14798_v5 = vld [vmem:[#allocation126_spill] sm:$0xff] }
 0x4f8   : > { %v13536_v34 = vsub.f32 %v6607_v50, %v13522_v61  ;;  %v13538_v53 = vand.u32 4294901760, %v6604_v58  ;;  %v6350_v20 = vpop.f32.mrf.mxu0  ;;  %v13556_v23 = vpop.f32.mrf.mxu1  ;;  %v13560_v18 = vadd.f32 %v14798_v5, %v6052_v2 }
 0x4f9   : > { %v6613_v3 = vsel %vm6602_vm8, %v6585_v17, 0  ;;  %v6584_v60 = vmul.f32 %v6501_v55, %v5428_v21  ;;  %v6519_v26 = vadd.f32 %v13481_v19, %v6357_v6  ;;  %v6351_v54 = vadd.f32 %v6350_v20, %v6165_v9  ;;  %v14801_v21 = vld [vmem:[#allocation118_spill] sm:$0xff] }
 0x4fa   : > { %v6732_v57 = vand.u32 4294901760, %v13536_v34  ;;  %v13551_v4 = vsub.f32 %v6604_v58, %v13538_v53  ;;  %v13553_v0 = vand.u32 4294901760, %v6613_v3  ;;  %v10063_v24 = vpop.f32.mrf.mxu0  ;;  %10142 = vmatprep.mubr.f32.mxu1 %v13538_v53  ;;  %v13585_v50 = vpop.f32.mrf.mxu1  ;;  %v14802_v20 = vld [vmem:[#allocation114_spill] sm:$0xff] }
 0x4fb   : > { %v6610_v19 = vsel %vm6602_vm8, %v6584_v60, 0  ;;  %v6587_v9 = vmul.f32 %v6519_v26, %v5431_v56  ;;  %v6513_v63 = vadd.f32 %v13492_v15, %v6351_v54  ;;  %v6369_v33 = vadd.f32 %v10063_v24, %v6189_v16  ;;  %10143 = vmatmul.mubr.f32.vlgmr.msra.gmra.mxu1 %v13522_v61  ;;  %v5434_v60 = vld [vmem:[%s13488_s21 + $0x40] sm:$0xff] }
 0x4fc   : > { %v6733_v48 = vsub.f32 %v13536_v34, %v6732_v57  ;;  %v13569_v46 = vsub.f32 %v6613_v3, %v13553_v0  ;;  %v13571_v7 = vand.u32 4294901760, %v6610_v19  ;;  %v6362_v41 = vpop.f32.mrf.mxu0  ;;  %v6722_v28 = vand.u32 4294901760, %v13551_v4  ;;  %10199 = vmatpush3.msra.mxu1 %v14799_v37  ;;  %v10098_v3 = vpop.f32.mrf.mxu1 }
 0x4fd   : > { %v6619_v15 = vsel %vm6602_vm8, %v6587_v9, 0  ;;  %v6586_v16 = vmul.f32 %v6513_v63, %v5430_v38  ;;  %v6531_v40 = vadd.f32 %v13498_v47, %v6369_v33  ;;  %v6363_v36 = vadd.f32 %v6362_v41, %v6181_v10  ;;  %10200 = vmatprep.subr.mxu1 %v14800_v29  ;;  %v5437_v63 = vld [vmem:[%s13488_s21 + $0x58] sm:$0xff]  ;;  %v14803_v33 = vld [vmem:[#allocation107_spill] sm:$0xff] }
 0x4fe   : > { %v6734_v62 = vand.u32 4294901760, %v6733_v48  ;;  %v13580_v12 = vsub.f32 %v6610_v19, %v13571_v7  ;;  %v13582_v25 = vand.u32 4294901760, %v6619_v15  ;;  %v10066_v49 = vpop.f32.mrf.mxu0  ;;  %10145 = vmatprep.mubr.f32.mxu1 %v13571_v7  ;;  %v6723_v47 = vsub.f32 %v13551_v4, %v6722_v28  ;;  %10201 = vmatpush3.msra.mxu1 %v14800_v29 }
 0x4ff   : > { %v6616_v10 = vsel %vm6602_vm8, %v6586_v16, 0  ;;  %v6589_v59 = vmul.f32 %v6531_v40, %v5433_v51  ;;  %v6525_v30 = vadd.f32 %v13504_v32, %v6363_v36  ;;  %v6381_v2 = vadd.f32 %v10066_v49, %v13509_v43  ;;  %10146 = vmatmul.mubr.f32.gmra.mxu1 %v13553_v0  ;;  %10202 = vmatprep.subr.mxu1 %v14801_v21  ;;  %v14804_v40 = vld [vmem:[#allocation109_spill] sm:$0xff] }
 0x500   : > { %v13598_v1 = vsub.f32 %v6619_v15, %v13582_v25  ;;  %v13600_v8 = vand.u32 4294901760, %v6616_v10  ;;  %v6374_v58 = vpop.f32.mrf.mxu0  ;;  %v6724_v17 = vand.u32 4294901760, %v6723_v47  ;;  %v6742_v55 = vand.u32 4294901760, %v13580_v12  ;;  %10203 = vmatpush3.msra.mxu1 %v14801_v21  ;;  %v5436_v49 = vld [vmem:[%s13488_s21 + $0x50] sm:$0xff] }
 0x501   : > { %v6625_v32 = vsel %vm6602_vm8, %v6589_v59, 0  ;;  %v6588_v43 = vmul.f32 %v6525_v30, %v5432_v35  ;;  %v6543_v6 = vadd.f32 %v13512_v31, %v6381_v2  ;;  %v6375_v56 = vadd.f32 %v6374_v58, %v13515_v27  ;;  %10204 = vmatprep.subr.mxu1 %v14802_v20  ;;  %v6560_v35 = vpop.f32.mrf.mxu1 }
 0x502   : > { %v13610_v14 = vsub.f32 %v6616_v10, %v13600_v8  ;;  %v13612_v42 = vand.u32 4294901760, %v6625_v32  ;;  %v10069_v26 = vpop.f32.mrf.mxu0  ;;  %10110 = vmatprep.mubr.f32.mxu0 %v6724_v17  ;;  %10148 = vmatprep.mubr.f32.mxu1 %v13600_v8  ;;  %v6743_v31 = vsub.f32 %v13580_v12, %v6742_v55  ;;  %v6752_v27 = vand.u32 4294901760, %v13569_v46  ;;  %v5439_v17 = vld [vmem:[%s13488_s21 + $0x68] sm:$0xff] }
 0x503   : > { %v6622_v54 = vsel %vm6602_vm8, %v6588_v43, 0  ;;  %v6591_v38 = vmul.f32 %v6543_v6, %v5435_v13  ;;  %v6537_v24 = vadd.f32 %v13525_v22, %v6375_v56  ;;  %v6393_v5 = vadd.f32 %v10069_v26, %v13518_v44  ;;  %10111 = vmatmul.mubr.f32.vlgmr.msra.gmra.mxu0 %v6734_v62  ;;  %10149 = vmatmul.mubr.f32.gmra.mxu1 %v13582_v25 }
 0x504   : > { %v13625_v19 = vsub.f32 %v6625_v32, %v13612_v42  ;;  %v13627_v9 = vand.u32 4294901760, %v6622_v54  ;;  %10167 = vmatpush3.msra.mxu0 %v14803_v33  ;;  %v6386_v48 = vpop.f32.mrf.mxu0  ;;  %v6744_v51 = vand.u32 4294901760, %v6743_v31  ;;  %v6753_v22 = vsub.f32 %v13569_v46, %v6752_v27  ;;  %10205 = vmatpush3.msra.mxu1 %v14802_v20  ;;  %v14806_v33 = vld [vmem:[#allocation135_spill] sm:$0xff] }
 0x505   : > { %v6631_v44 = vsel %vm6602_vm8, %v6591_v38, 0  ;;  %v6590_v41 = vmul.f32 %v6537_v24, %v5434_v60  ;;  %v6555_v15 = vadd.f32 %v13556_v23, %v6393_v5  ;;  %v6387_v16 = vadd.f32 %v6386_v48, %v13528_v45  ;;  %10168 = vmatprep.subr.mxu0 %v14804_v40  ;;  %10262 = vmatprep.subr.mxu1 %v14799_v37  ;;  %v10101_v38 = vpop.f32.mrf.mxu1  ;;  %v5438_v24 = vld [vmem:[%s13488_s21 + $0x60] sm:$0xff] }
 0x506   : > { %v13641_v36 = vsub.f32 %v6622_v54, %v13627_v9  ;;  %v13643_v62 = vand.u32 4294901760, %v6631_v44  ;;  %v10072_v47 = vpop.f32.mrf.mxu0  ;;  %10113 = vmatprep.mubr.f32.mxu0 %v6744_v51  ;;  %10151 = vmatprep.mubr.f32.mxu1 %v13627_v9  ;;  %v6754_v10 = vand.u32 4294901760, %v6753_v22  ;;  %v6762_v23 = vand.u32 4294901760, %v13610_v14 }
 0x507   : > { %v6628_v45 = vsel %vm6602_vm8, %v6590_v41, 0  ;;  %v6593_v59 = vmul.f32 %v6555_v15, %v5437_v63  ;;  %v6549_v30 = vadd.f32 %v13585_v50, %v6387_v16  ;;  %v6405_v2 = vadd.f32 %v10072_v47, %v13531_v52  ;;  %10152 = vmatmul.mubr.f32.gmra.mxu1 %v13612_v42  ;;  %10169 = vmatpush3.msra.mxu0 %v14804_v40  ;;  %v14805_v52 = vld [vmem:[#allocation113_spill] sm:$0xff]  ;;  %v14807_v47 = vld [vmem:[#allocation108_spill] sm:$0xff] }
 0x508   : > { %v13654_v13 = vsub.f32 %v6631_v44, %v13643_v62  ;;  %v13656_v58 = vand.u32 4294901760, %v6628_v45  ;;  %10114 = vmatmul.mubr.f32.gmra.mxu0 %v6754_v10  ;;  %v6398_v32 = vpop.f32.mrf.mxu0  ;;  %v6763_v43 = vsub.f32 %v13610_v14, %v6762_v23  ;;  %v6772_v50 = vand.u32 4294901760, %v13598_v1  ;;  %10170 = vmatprep.subr.mxu0 %v14805_v52  ;;  %v5441_v15 = vld [vmem:[%s13488_s21 + $0x78] sm:$0xff] }
 0x509   : > { %v6637_v6 = vsel %vm6602_vm8, %v6593_v59, 0  ;;  %v6592_v56 = vmul.f32 %v6549_v30, %v5436_v49  ;;  %v6567_v60 = vadd.f32 %v10098_v3, %v6405_v2  ;;  %v6399_v26 = vadd.f32 %v6398_v32, %v13542_v11  ;;  %10171 = vmatpush3.msra.mxu0 %v14805_v52  ;;  %v6572_v30 = vpop.f32.mrf.mxu1 }
 0x50a   : > { %v13668_v31 = vsub.f32 %v6628_v45, %v13656_v58  ;;  %v13670_v54 = vand.u32 4294901760, %v6637_v6  ;;  %v10075_v5 = vpop.f32.mrf.mxu0  ;;  %v6764_v63 = vand.u32 4294901760, %v6763_v43  ;;  %10154 = vmatprep.mubr.f32.mxu1 %v13656_v58  ;;  %v6773_v3 = vsub.f32 %v13598_v1, %v6772_v50  ;;  %10172 = vmatprep.subr.mxu0 %v14806_v33 }
 0x50b   : > { %v6634_v11 = vsel %vm6602_vm8, %v6592_v56, 0  ;;  %v6595_v48 = vmul.f32 %v6567_v60, %v5439_v17  ;;  %v6561_v51 = vadd.f32 %v6560_v35, %v6399_v26  ;;  %v6417_v22 = vadd.f32 %v10075_v5, %v13545_v39  ;;  %10155 = vmatmul.mubr.f32.gmra.mxu1 %v13643_v62  ;;  %10173 = vmatpush3.msra.mxu0 %v14806_v33  ;;  %v5440_v17 = vld [vmem:[%s13488_s21 + $0x70] sm:$0xff]  ;;  %s10424_s21 = scalar_lea.vmem %s7826_s18, 32 }
 0x50c   : > { %v13683_v44 = vsub.f32 %v6637_v6, %v13670_v54  ;;  %v13685_v41 = vand.u32 4294901760, %v6634_v11  ;;  %10116 = vmatprep.mubr.f32.mxu0 %v6764_v63  ;;  %v6774_v16 = vand.u32 4294901760, %v6773_v3  ;;  %v6410_v40 = vpop.f32.mrf.mxu0  ;;  %v6782_v49 = vand.u32 4294901760, %v13641_v36  ;;  %10230 = vmatprep.subr.mxu0 %v14807_v47  ;;  %p10425_p11 = scmp.ne.s32.totalorder %s7826_s18, %s10424_s21  ;;  %p10432_p1 = scmp.lt.s32.totalorder %s10430_s2, %s10424_s21 }
 0x50d   : > { %v6643_v39 = vsel %vm6602_vm8, %v6595_v48, 0  ;;  %v6594_v35 = vmul.f32 %v6561_v51, %v5438_v24  ;;  %v6579_v10 = vadd.f32 %v10101_v38, %v6417_v22  ;;  %v6411_v45 = vadd.f32 %v6410_v40, %v13560_v18 }
 0x50e   : > { %v13693_v59 = vsub.f32 %v6634_v11, %v13685_v41  ;;  %v13695_v2 = vand.u32 4294901760, %v6643_v39  ;;  %10117 = vmatmul.mubr.f32.gmra.mxu0 %v6774_v16  ;;  %v6783_v32 = vsub.f32 %v13641_v36, %v6782_v49  ;;  %10157 = vmatprep.mubr.f32.mxu1 %v13685_v41  ;;  %v6792_v43 = vand.u32 4294901760, %v13625_v19  ;;  %p10426_p12 = pnand %p10425_p11, %p10679_p5  ;;  %p10433_p2 = por %p10432_p1, %p10431_p0 }
 0x50f   : > { %v6640_v52 = vsel %vm6602_vm8, %v6594_v35, 0  ;;  %v6597_v6 = vmul.f32 %v6579_v10, %v5441_v15  ;;  %v6573_v18 = vadd.f32 %v6572_v30, %v6411_v45  ;;  %10158 = vmatmul.mubr.f32.gmra.mxu1 %v13670_v54  ;;  %v6802_v56 = vand.u32 4294901760, %v13668_v31 }
 0x510   : > { %v13707_v60 = vsub.f32 %v6643_v39, %v13695_v2  ;;  %v13709_v26 = vand.u32 4294901760, %v6640_v52  ;;  %v6784_v38 = vand.u32 4294901760, %v6783_v32  ;;  %v6793_v24 = vsub.f32 %v13625_v19, %v6792_v43  ;;  %p10427_p13 = pneg %p10426_p12 }
 0x511   : > { %v6649_v5 = vsel %vm6602_vm8, %v6597_v6, 0  ;;  %v6596_v63 = vmul.f32 %v6573_v18, %v5440_v17  ;;  %v6803_v3 = vsub.f32 %v13668_v31, %v6802_v56  ;;  %v6812_v33 = vand.u32 4294901760, %v13654_v13 }
 0x512   : > { %v13720_v11 = vsub.f32 %v6640_v52, %v13709_v26  ;;  %v13722_v48 = vand.u32 4294901760, %v6649_v5  ;;  %10119 = vmatprep.mubr.f32.mxu0 %v6784_v38  ;;  %v6794_v51 = vand.u32 4294901760, %v6793_v24  ;;  %10160 = vmatprep.mubr.f32.mxu1 %v13709_v26  ;;  %v6822_v22 = vand.u32 4294901760, %v13693_v59  ;;  %p10434_p3 = pnand %p10433_p2, %p10427_p13 }
 0x513   : > { %v6646_v15 = vsel %vm6602_vm8, %v6596_v63, 0  ;;  %v6804_v16 = vand.u32 4294901760, %v6803_v3  ;;  %v6813_v40 = vsub.f32 %v13654_v13, %v6812_v33  ;;  %10161 = vmatmul.mubr.f32.gmra.mxu1 %v13695_v2  ;;  %v6832_v39 = vand.u32 4294901760, %v13683_v44 }
 0x514   : > { %v13732_v35 = vand.u32 4294901760, %v6646_v15  ;;  %10120 = vmatmul.mubr.f32.gmra.mxu0 %v6794_v51  ;;  %v6823_v10 = vsub.f32 %v13693_v59, %v6822_v22  ;;  %v6842_v45 = vand.u32 4294901760, %v13720_v11  ;;  %v13737_v30 = vsub.f32 %v6649_v5, %v13722_v48 }
 0x515   : > { %10122 = vmatprep.mubr.f32.mxu0 %v6804_v16  ;;  %v6814_v17 = vand.u32 4294901760, %v6813_v40  ;;  %v6833_v32 = vsub.f32 %v13683_v44, %v6832_v39  ;;  %v6852_v38 = vand.u32 4294901760, %v13707_v60 }
 0x516   : > { %v13741_v52 = vsub.f32 %v6646_v15, %v13732_v35  ;;  %v6824_v6 = vand.u32 4294901760, %v6823_v10  ;;  %10163 = vmatprep.mubr.f32.mxu1 %v13732_v35  ;;  %v6843_v18 = vsub.f32 %v13720_v11, %v6842_v45  ;;  %v6872_v15 = vand.u32 4294901760, %v13737_v30 }
 0x517   : > { %10164 = vmatmul.mubr.f32.gmra.mxu1 %v13722_v48  ;;  %v6834_v63 = vand.u32 4294901760, %v6833_v32  ;;  %v6853_v3 = vsub.f32 %v13707_v60, %v6852_v38 }
 0x518   : > { %10123 = vmatmul.mubr.f32.gmra.mxu0 %v6814_v17  ;;  %10206 = vmatprep.mubr.f32.mxu1 %v6722_v28  ;;  %v6862_v24 = vand.u32 4294901760, %v13741_v52  ;;  %v6844_v5 = vand.u32 4294901760, %v6843_v18  ;;  %v6873_v40 = vsub.f32 %v13737_v30, %v6872_v15 }
 0x519   : > { %10125 = vmatprep.mubr.f32.mxu0 %v6824_v6  ;;  %v6854_v16 = vand.u32 4294901760, %v6853_v3 }
 0x51a   : > { %v6863_v51 = vsub.f32 %v13741_v52, %v6862_v24 }
 0x51b   : > { %10207 = vmatmul.mubr.f32.vlgmr.msra.gmra.mxu1 %v6732_v57  ;;  %v6874_v57 = vand.u32 4294901760, %v6873_v40 }
 0x51c   : > { %10126 = vmatmul.mubr.f32.gmra.mxu0 %v6834_v63  ;;  %10209 = vmatprep.mubr.f32.mxu1 %v6742_v55  ;;  %v6864_v28 = vand.u32 4294901760, %v6863_v51 }
 0x51d   : > { %10128 = vmatprep.mubr.f32.mxu0 %v6844_v5  ;;  %10263 = vmatpush3.msra.mxu1 %v14799_v37  ;;  %v14808_v37 = vld [vmem:[#allocation10_spill] sm:$0xff] }
 0x51e   : > { %10264 = vmatprep.subr.mxu1 %v14800_v29 }
 0x51f   : > { %10210 = vmatmul.mubr.f32.gmra.mxu1 %v6752_v27 }
 0x520   : > { %10129 = vmatmul.mubr.f32.gmra.mxu0 %v6854_v16  ;;  %10212 = vmatprep.mubr.f32.mxu1 %v6762_v23 }
 0x521   : > { %10131 = vmatprep.mubr.f32.mxu0 %v6864_v28  ;;  %10265 = vmatpush3.msra.mxu1 %v14800_v29 }
 0x522   : > { %10266 = vmatprep.subr.mxu1 %v14801_v21 }
 0x523   : > { %10213 = vmatmul.mubr.f32.gmra.mxu1 %v6772_v50 }
 0x524   : > { %10132 = vmatmul.mubr.f32.gmra.mxu0 %v6874_v57  ;;  %10215 = vmatprep.mubr.f32.mxu1 %v6782_v49 }
 0x525   : > { %10174 = vmatprep.mubr.f32.mxu0 %v13551_v4  ;;  %10267 = vmatpush3.msra.mxu1 %v14801_v21  ;;  %v14810_v4 = vld [vmem:[#allocation73_spill] sm:$0xff] }
 0x526   : > { %10268 = vmatprep.subr.mxu1 %v14802_v20 }
 0x527   : > { %10216 = vmatmul.mubr.f32.gmra.mxu1 %v6792_v43 }
 0x528   : > { %10175 = vmatmul.mubr.f32.vlgmr.msra.gmra.mxu0 %v13536_v34  ;;  %10218 = vmatprep.mubr.f32.mxu1 %v6802_v56  ;;  %v14809_v34 = vld [vmem:[#allocation120_spill] sm:$0xff] }
 0x529   : > { %10231 = vmatpush3.msra.mxu0 %v14807_v47  ;;  %10177 = vmatprep.mubr.f32.mxu0 %v13580_v12 }
 0x52a   : > { %10232 = vmatprep.subr.mxu0 %v14808_v37  ;;  %10269 = vmatpush3.msra.mxu1 %v14802_v20 }
 0x52b   : > { %10219 = vmatmul.mubr.f32.gmra.mxu1 %v6812_v33  ;;  %10233 = vmatpush3.msra.mxu0 %v14808_v37 }
 0x52c   : > { %10178 = vmatmul.mubr.f32.gmra.mxu0 %v13569_v46  ;;  %10221 = vmatprep.mubr.f32.mxu1 %v6822_v22 }
 0x52d   : > { %10180 = vmatprep.mubr.f32.mxu0 %v13610_v14  ;;  %10234 = vmatprep.subr.mxu0 %v14809_v34 }
 0x52e   : > { %10235 = vmatpush3.msra.mxu0 %v14809_v34 }
 0x52f   : > { %10222 = vmatmul.mubr.f32.gmra.mxu1 %v6832_v39  ;;  %10236 = vmatprep.subr.mxu0 %v14810_v4 }
 0x530   : > { %10181 = vmatmul.mubr.f32.gmra.mxu0 %v13598_v1  ;;  %10224 = vmatprep.mubr.f32.mxu1 %v6842_v45 }
 0x531   : > { %10183 = vmatprep.mubr.f32.mxu0 %v13641_v36  ;;  %10237 = vmatpush3.msra.mxu0 %v14810_v4 }
 0x533   : > { %10225 = vmatmul.mubr.f32.gmra.mxu1 %v6852_v38 }
 0x534   : > { %10184 = vmatmul.mubr.f32.gmra.mxu0 %v13625_v19  ;;  %10227 = vmatprep.mubr.f32.mxu1 %v6862_v24 }
 0x535   : > { %10186 = vmatprep.mubr.f32.mxu0 %v13668_v31 }
 0x537   : > { %10228 = vmatmul.mubr.f32.gmra.mxu1 %v6872_v15 }
 0x538   : > { %10187 = vmatmul.mubr.f32.gmra.mxu0 %v13654_v13  ;;  %10270 = vmatprep.mubr.f32.mxu1 %v13538_v53 }
 0x539   : > { %10189 = vmatprep.mubr.f32.mxu0 %v13693_v59 }
 0x53b   : > { %10271 = vmatmul.mubr.f32.vlgmr.msra.gmra.mxu1 %v13522_v61 }
 0x53c   : > { %10190 = vmatmul.mubr.f32.gmra.mxu0 %v13683_v44  ;;  %10273 = vmatprep.mubr.f32.mxu1 %v13571_v7 }
 0x53d   : > { %10192 = vmatprep.mubr.f32.mxu0 %v13720_v11 }
 0x53f   : > { %10274 = vmatmul.mubr.f32.gmra.mxu1 %v13553_v0 }
 0x540   : > { %10193 = vmatmul.mubr.f32.gmra.mxu0 %v13707_v60  ;;  %10276 = vmatprep.mubr.f32.mxu1 %v13600_v8 }
 0x541   : > { %10195 = vmatprep.mubr.f32.mxu0 %v13741_v52 }
 0x543   : > { %10277 = vmatmul.mubr.f32.gmra.mxu1 %v13582_v25 }
 0x544   : > { %10196 = vmatmul.mubr.f32.gmra.mxu0 %v13737_v30  ;;  %10279 = vmatprep.mubr.f32.mxu1 %v13627_v9 }
 0x545   : > { %10238 = vmatprep.mubr.f32.mxu0 %v13538_v53 }
 0x547   : > { %10280 = vmatmul.mubr.f32.gmra.mxu1 %v13612_v42 }
 0x548   : > { %10239 = vmatmul.mubr.f32.vlgmr.msra.gmra.mxu0 %v13522_v61  ;;  %10282 = vmatprep.mubr.f32.mxu1 %v13656_v58 }
 0x549   : > { %10241 = vmatprep.mubr.f32.mxu0 %v13571_v7 }
 0x54b   : > { %10283 = vmatmul.mubr.f32.gmra.mxu1 %v13643_v62 }
 0x54c   : > { %10242 = vmatmul.mubr.f32.gmra.mxu0 %v13553_v0  ;;  %10285 = vmatprep.mubr.f32.mxu1 %v13685_v41 }
 0x54d   : > { %10244 = vmatprep.mubr.f32.mxu0 %v13600_v8 }
 0x54f   : > { %10286 = vmatmul.mubr.f32.gmra.mxu1 %v13670_v54 }
 0x550   : > { %10245 = vmatmul.mubr.f32.gmra.mxu0 %v13582_v25  ;;  %10288 = vmatprep.mubr.f32.mxu1 %v13709_v26 }
 0x551   : > { %10247 = vmatprep.mubr.f32.mxu0 %v13627_v9 }
 0x553   : > { %10289 = vmatmul.mubr.f32.gmra.mxu1 %v13695_v2 }
 0x554   : > { %10248 = vmatmul.mubr.f32.gmra.mxu0 %v13612_v42  ;;  %10291 = vmatprep.mubr.f32.mxu1 %v13732_v35 }
 0x555   : > { %10250 = vmatprep.mubr.f32.mxu0 %v13656_v58 }
 0x557   : > { %10292 = vmatmul.mubr.f32.gmra.mxu1 %v13722_v48 }
 0x558   : > { %10251 = vmatmul.mubr.f32.gmra.mxu0 %v13643_v62 }
 0x559   : > { %10253 = vmatprep.mubr.f32.mxu0 %v13685_v41 }
 0x55c   : > { %10254 = vmatmul.mubr.f32.gmra.mxu0 %v13670_v54 }
 0x55d   : > { %10256 = vmatprep.mubr.f32.mxu0 %v13709_v26 }
 0x560   : > { %10257 = vmatmul.mubr.f32.gmra.mxu0 %v13695_v2 }
 0x561   : > { %10259 = vmatprep.mubr.f32.mxu0 %v13732_v35 }
 0x564   : > { %10260 = vmatmul.mubr.f32.gmra.mxu0 %v13722_v48 }
 0x565   : > { %10437 = shalt.err (!%p10434_p3)
}
 0x566   : > { %s10438_s3 = scalar_lea.hbm %s7823_s11, 32  ;;  %s10442_s27 = scalar_lea.hbm %s14172_s8, 96 }
 0x567   : > { %p10439_p4 = scmp.ne.s32.totalorder %s7823_s11, %s10438_s3  ;;  %p10443_p9 = scmp.lt.s32.totalorder %s7823_s11, %s14172_s8 }
 0x568   : > { %p10444_p10 = scmp.lt.s32.totalorder %s10442_s27, %s10438_s3 }
 0x569   : > { %p10440_p7 = pnand %p10439_p4, %p10679_p5 }
 0x56a   : > { %p10445_p11 = por %p10444_p10, %p10443_p9 }
 0x56b   : > { %p10441_p8 = pneg %p10440_p7 }
 0x56d   : > { %p10446_p12 = pnand %p10445_p11, %p10441_p8 }
 0x56f   : > { %10449 = shalt.err (!%p10446_p12)
}
 0x570   : > { %10294 = dma.vmem_to_hbm [thread:$0]  (%p10679_p5), %s7826_s18, 32, %s7823_s11, %s7803_s20   ;;  %vm7784_vm9 = vcmask 31744  }
 0x571   : > { %s8219_s0 = sshll.u32 %s12707_s12, 7  ;;  %s7833_s3 = ssub.s32 (%p10679_p5), 34, %s10690_s25 }
 0x572   : > { %s13964_s1 = scalar_lea.vmem [#allocation4], %s8219_s0   ;;  %s8269_s4 = sshll.u32 (%p10679_p5), %s10662_s17, 7 }
 0x573   : > { %p7834_p13 = scmp.lt.s32.totalorder (%p10679_p5), %s7833_s3, 16  ;;  %s14045_s20 = scalar_lea.vmem (%p10679_p5), %s14173_s9, %s8269_s4  }
 0x5bb   : > { %v13852_v61 = vpop.f32.mrf.mxu1 }
 0x5bd   : > { %v13854_v53 = vpop.f32.mrf.mxu1 }
 0x5bf   : > { %v13856_v0 = vpop.f32.mrf.mxu1 }
 0x5c1   : > { %v13858_v46 = vpop.f32.mrf.mxu1 }
 0x5c3   : > { %v10112_v7 = vpop.f32.mrf.mxu0  ;;  %v13860_v29 = vpop.f32.mrf.mxu1 }
 0x5c5   : > { %v6726_v12 = vpop.f32.mrf.mxu0  ;;  %v13862_v25 = vpop.f32.mrf.mxu1 }
 0x5c7   : > { %v13864_v21 = vpop.f32.mrf.mxu1 }
 0x5c8   : > { %v10115_v1 = vpop.f32.mrf.mxu0 }
 0x5c9   : > { %v13866_v8 = vpop.f32.mrf.mxu1 }
 0x5ca   : > { %v13868_v55 = vpop.f32.mrf.mxu0 }
 0x5cb   : > { %v13870_v20 = vpop.f32.mrf.mxu1 }
 0x5cd   : > { %v13872_v14 = vpop.f32.mrf.mxu1 }
 0x5ce   : > { %v13874_v42 = vpop.f32.mrf.mxu0 }
 0x5cf   : > { %v13876_v27 = vpop.f32.mrf.mxu1 }
 0x5d0   : > { %v13878_v19 = vpop.f32.mrf.mxu0 }
 0x5d1   : > { %v13880_v9 = vpop.f32.mrf.mxu1 }
 0x5d3   : > { %v13882_v36 = vpop.f32.mrf.mxu1 }
 0x5d4   : > { %v13884_v62 = vpop.f32.mrf.mxu0 }
 0x5d5   : > { %v13886_v23 = vpop.f32.mrf.mxu1 }
 0x5d6   : > { %14811 = vst [vmem:[#allocation119_spill] sm:$0xff] %v13886_v23  ;;  %v13888_v13 = vpop.f32.mrf.mxu0 }
 0x5d7   : > { %v13890_v58 = vpop.f32.mrf.mxu1 }
 0x5d8   : > { %14812 = vst [vmem:[#allocation84_spill] sm:$0xff] %v13890_v58  ;;  %v13892_v50 = vpop.f32.mrf.mxu0  ;;  %v6986_v58 = vadd.f32 %v13856_v0, %v10115_v1  ;;  %v6992_v0 = vadd.f32 %v13862_v25, %v13878_v19  ;;  %v7004_v19 = vadd.f32 %v13866_v8, %v13888_v13 }
 0x5d9   : > { %v13894_v31 = vpop.f32.mrf.mxu1 }
 0x5da   : > { %14813 = vst [vmem:[#allocation130_spill] sm:$0xff] %v13894_v31  ;;  %v13896_v54 = vpop.f32.mrf.mxu0  ;;  %v6968_v31 = vadd.f32 %v13854_v53, %v6726_v12  ;;  %v6998_v53 = vadd.f32 %v13860_v29, %v13874_v42 }
 0x5db   : > { %v10208_v44 = vpop.f32.mrf.mxu1 }
 0x5dc   : > { %v13898_v41 = vpop.f32.mrf.mxu0 }
 0x5dd   : > { %v7319_v49 = vpop.f32.mrf.mxu1 }
 0x5de   : > { %v13900_v47 = vpop.f32.mrf.mxu0 }
 0x5df   : > { %v10211_v59 = vpop.f32.mrf.mxu1 }
 0x5e0   : > { %v13902_v2 = vpop.f32.mrf.mxu0 }
 0x5e1   : > { %v13904_v43 = vpop.f32.mrf.mxu1 }
 0x5e2   : > { %v13906_v56 = vpop.f32.mrf.mxu0 }
 0x5e3   : > { %14814 = vst [vmem:[#allocation75_spill] sm:$0xff] %v13906_v56  ;;  %v13908_v60 = vpop.f32.mrf.mxu1 }
 0x5e4   : > { %v13910_v26 = vpop.f32.mrf.mxu0 }
 0x5e5   : > { %14815 = vst [vmem:[#allocation58_spill] sm:$0xff] %v13910_v26  ;;  %v13912_v33 = vpop.f32.mrf.mxu1 }
 0x5e6   : > { %v13914_v11 = vpop.f32.mrf.mxu0 }
 0x5e7   : > { %14816 = vst [vmem:[#allocation127_spill] sm:$0xff] %v13914_v11  ;;  %v13916_v48 = vpop.f32.mrf.mxu1 }
 0x5e8   : > { %v10176_v22 = vpop.f32.mrf.mxu0 }
 0x5e9   : > { %v13918_v39 = vpop.f32.mrf.mxu1 }
 0x5ea   : > { %v7137_v35 = vpop.f32.mrf.mxu0 }
 0x5eb   : > { %v13920_v10 = vpop.f32.mrf.mxu1  ;;  %v7138_v26 = vadd.f32 %v7137_v35, %v6968_v31 }
 0x5ec   : > { %v10179_v45 = vpop.f32.mrf.mxu0 }
 0x5ed   : > { %v13922_v30 = vpop.f32.mrf.mxu1 }
 0x5ee   : > { %v7151_v17 = vpop.f32.mrf.mxu0 }
 0x5ef   : > { %v13924_v32 = vpop.f32.mrf.mxu1 }
 0x5f0   : > { %14817 = vst [vmem:[#allocation121_spill] sm:$0xff] %v13924_v32  ;;  %v10182_v52 = vpop.f32.mrf.mxu0 }
 0x5f1   : > { %v13926_v6 = vpop.f32.mrf.mxu1  ;;  %v7173_v31 = vadd.f32 %v10182_v52, %v6998_v53 }
 0x5f2   : > { %14818 = vst [vmem:[#allocation131_spill] sm:$0xff] %v13926_v6  ;;  %v7165_v18 = vpop.f32.mrf.mxu0 }
 0x5f3   : > { %v13928_v38 = vpop.f32.mrf.mxu1 }
 0x5f4   : > { %14819 = vst [vmem:[#allocation132_spill] sm:$0xff] %v13928_v38  ;;  %v10185_v24 = vpop.f32.mrf.mxu0 }
 0x5f5   : > { %v13930_v5 = vpop.f32.mrf.mxu1 }
 0x5f6   : > { %14820 = vst [vmem:[#allocation69_spill] sm:$0xff] %v13930_v5  ;;  %v7179_v63 = vpop.f32.mrf.mxu0  ;;  %v6974_v5 = vadd.f32 %v13852_v61, %v10112_v7  ;;  %v7159_v61 = vadd.f32 %v10179_v45, %v6986_v58  ;;  %v7166_v45 = vadd.f32 %v7165_v18, %v6992_v0  ;;  %v14832_v0 = vld [vmem:[#allocation84_spill] sm:$0xff] }
 0x5f7   : > { %v13932_v3 = vpop.f32.mrf.mxu1  ;;  %v7180_v18 = vadd.f32 %v7179_v63, %v7004_v19  ;;  %v7034_v63 = vadd.f32 %v13876_v27, %v13898_v41 }
 0x5f8   : > { %14821 = vst [vmem:[#allocation133_spill] sm:$0xff] %v13932_v3  ;;  %v13934_v51 = vpop.f32.mrf.mxu0  ;;  %v7352_v13 = vadd.f32 %v13912_v33, %v7166_v45 }
 0x5f9   : > { %v13936_v15 = vpop.f32.mrf.mxu1 }
 0x5fa   : > { %14822 = vst [vmem:[#allocation11_spill] sm:$0xff] %v13936_v15  ;;  %v13938_v28 = vpop.f32.mrf.mxu0  ;;  %v7145_v15 = vadd.f32 %v10176_v22, %v6974_v5  ;;  %v7320_v5 = vadd.f32 %v7319_v49, %v7138_v26  ;;  %v7360_v26 = vadd.f32 %v13908_v60, %v7173_v31 }
 0x5fb   : > { %v10272_v16 = vpop.f32.mrf.mxu1 }
 0x5fc   : > { %v13940_v40 = vpop.f32.mrf.mxu0  ;;  %v7328_v7 = vadd.f32 %v10208_v44, %v7145_v15 }
 0x5fd   : > { %v7687_v57 = vpop.f32.mrf.mxu1 }
 0x5fe   : > { %v13942_v37 = vpop.f32.mrf.mxu0 }
 0x5ff   : > { %v10275_v34 = vpop.f32.mrf.mxu1 }
 0x600   : > { %v13944_v4 = vpop.f32.mrf.mxu0 }
 0x601   : > { %14823 = vst [vmem:[#allocation59_spill] sm:$0xff] %v13944_v4  ;;  %v7699_v38 = vpop.f32.mrf.mxu1  ;;  %v6980_v4 = vadd.f32 %v13858_v46, %v13868_v55  ;;  %v7344_v46 = vadd.f32 %v10211_v59, %v7159_v61  ;;  %v7010_v55 = vadd.f32 %v13864_v21, %v13884_v62  ;;  %v14827_v61 = vld [vmem:[#allocation75_spill] sm:$0xff] }
 0x602   : > { %v13947_v3 = vpop.f32.mrf.mxu0 }
 0x603   : > { %14824 = vst [vmem:[#allocation129_spill] sm:$0xff] %v13947_v3  ;;  %v10278_v11 = vpop.f32.mrf.mxu1  ;;  %v7152_v12 = vadd.f32 %v7151_v17, %v6980_v4  ;;  %v7187_v59 = vadd.f32 %v10185_v24, %v7010_v55  ;;  %v7022_v17 = vadd.f32 %v13870_v20, %v13892_v50  ;;  %v7016_v24 = vadd.f32 %v13872_v14, %v13896_v54 }
 0x604   : > { %v13950_v6 = vpop.f32.mrf.mxu0 }
 0x605   : > { %14825 = vst [vmem:[#allocation123_spill] sm:$0xff] %v13950_v6  ;;  %v7711_v32 = vpop.f32.mrf.mxu1  ;;  %v7336_v42 = vadd.f32 %v13904_v43, %v7152_v12  ;;  %v7201_v15 = vadd.f32 %v13934_v51, %v7022_v17  ;;  %v7376_v60 = vadd.f32 %v13916_v48, %v7187_v59  ;;  %v7194_v33 = vadd.f32 %v13938_v28, %v7016_v24 }
 0x606   : > { %v13953_v23 = vpop.f32.mrf.mxu0  ;;  %v7368_v51 = vadd.f32 %v13918_v39, %v7180_v18  ;;  %v7215_v48 = vadd.f32 %v13940_v40, %v7034_v63 }
 0x607   : > { %14826 = vst [vmem:[#allocation134_spill] sm:$0xff] %v13953_v23  ;;  %v10281_v56 = vpop.f32.mrf.mxu1  ;;  %v7392_v28 = vadd.f32 %v13920_v10, %v7201_v15  ;;  %v7384_v40 = vadd.f32 %v13922_v30, %v7194_v33 }
 0x608   : > { %v10240_v3 = vpop.f32.mrf.mxu0  ;;  %v14829_v12 = vld [vmem:[#allocation59_spill] sm:$0xff] }
 0x609   : > { %v7529_v22 = vadd.f32 %v10240_v3, %v7328_v7  ;;  %v7723_v6 = vpop.f32.mrf.mxu1  ;;  %v14828_v7 = vld [vmem:[#allocation119_spill] sm:$0xff] }
 0x60a   : > { %v7522_v1 = vpop.f32.mrf.mxu0 }
 0x60b   : > { %v7694_v35 = vadd.f32 %v10272_v16, %v7529_v22  ;;  %v7523_v23 = vadd.f32 %v7522_v1, %v7320_v5  ;;  %v10284_v44 = vpop.f32.mrf.mxu1  ;;  %v14830_v22 = vld [vmem:[#allocation121_spill] sm:$0xff]  ;;  %v14831_v5 = vld [vmem:[#allocation58_spill] sm:$0xff] }
 0x60c   : > { %v10243_v58 = vpop.f32.mrf.mxu0  ;;  %v7058_v1 = vadd.f32 %v14832_v0, %v14831_v5  ;;  %v14837_v19 = vld [vmem:[#allocation123_spill] sm:$0xff] }
 0x60d   : > { %7786 = vst.msk [vmem:[%s13964_s1 + $0x8] sm:$0xff] %vm7784_vm9, %v7694_v35  ;;  %v7688_v29 = vadd.f32 %v7687_v57, %v7523_v23  ;;  %v7541_v25 = vadd.f32 %v10243_v58, %v7344_v46  ;;  %v7735_v23 = vpop.f32.mrf.mxu1  ;;  %v14833_v35 = vld [vmem:[#allocation129_spill] sm:$0xff]  ;;  %v14834_v58 = vld [vmem:[#allocation131_spill] sm:$0xff] }
 0x60e   : > { %v7534_v49 = vpop.f32.mrf.mxu0 }
 0x60f   : > { %7785 = vst.msk [vmem:[%s13964_s1] sm:$0xff] %vm7784_vm9, %v7688_v29  ;;  %v7706_v21 = vadd.f32 %v10275_v34, %v7541_v25  ;;  %v7535_v62 = vadd.f32 %v7534_v49, %v7336_v42  ;;  %v10287_v16 = vpop.f32.mrf.mxu1  ;;  %v7046_v34 = vadd.f32 %v13882_v36, %v13902_v2  ;;  %v14835_v29 = vld [vmem:[#allocation127_spill] sm:$0xff]  ;;  %v14836_v25 = vld [vmem:[#allocation130_spill] sm:$0xff]  ;;  %v7243_v49 = vadd.f32 %v14837_v19, %v7058_v1 }
 0x610   : > { %v10246_v52 = vpop.f32.mrf.mxu0 }
 0x611   : > { %7788 = vst.msk [vmem:[%s13964_s1 + $0x18] sm:$0xff] %vm7784_vm9, %v7706_v21  ;;  %v7700_v43 = vadd.f32 %v7699_v38, %v7535_v62  ;;  %v7553_v8 = vadd.f32 %v10246_v52, %v7360_v26  ;;  %v7229_v10 = vadd.f32 %v14829_v12, %v7046_v34  ;;  %v14838_v62 = vld [vmem:[#allocation132_spill] sm:$0xff] }
 0x612   : > { %v7546_v3 = vpop.f32.mrf.mxu0 }
 0x613   : > { %7787 = vst.msk [vmem:[%s13964_s1 + $0x10] sm:$0xff] %vm7784_vm9, %v7700_v43  ;;  %v7718_v20 = vadd.f32 %v10278_v11, %v7553_v8  ;;  %v7547_v50 = vadd.f32 %v7546_v3, %v7352_v13  ;;  %v7028_v11 = vadd.f32 %v13880_v9, %v13900_v47  ;;  %v7424_v26 = vadd.f32 %v14838_v62, %v7229_v10  ;;  %v14840_v13 = vld [vmem:[#allocation69_spill] sm:$0xff] }
 0x614   : > { %v10249_v38 = vpop.f32.mrf.mxu0 }
 0x615   : > { %7790 = vst.msk [vmem:[%s13964_s1 + $0x28] sm:$0xff] %vm7784_vm9, %v7718_v20  ;;  %v7712_v14 = vadd.f32 %v7711_v32, %v7547_v50  ;;  %v7565_v54 = vadd.f32 %v10249_v38, %v7376_v60  ;;  %v7747_v32 = vpop.f32.mrf.mxu1  ;;  %v7208_v39 = vadd.f32 %v13942_v37, %v7028_v11  ;;  %v7408_v37 = vadd.f32 %v14830_v22, %v7215_v48  ;;  %v14841_v50 = vld [vmem:[#allocation133_spill] sm:$0xff] }
 0x616   : > { %v7558_v57 = vpop.f32.mrf.mxu0  ;;  %v7440_v60 = vadd.f32 %v14841_v50, %v7243_v49 }
 0x617   : > { %7789 = vst.msk [vmem:[%s13964_s1 + $0x20] sm:$0xff] %vm7784_vm9, %v7712_v14  ;;  %v7730_v27 = vadd.f32 %v10281_v56, %v7565_v54  ;;  %v7559_v41 = vadd.f32 %v7558_v57, %v7368_v51  ;;  %v7040_v56 = vadd.f32 %v14828_v7, %v14827_v61  ;;  %v7400_v45 = vadd.f32 %v14834_v58, %v7208_v39  ;;  %v14842_v14 = vld [vmem:[#allocation11_spill] sm:$0xff] }
 0x618   : > { %v10252_v4 = vpop.f32.mrf.mxu0 }
 0x619   : > { %7792 = vst.msk [vmem:[%s13964_s1 + $0x38] sm:$0xff] %vm7784_vm9, %v7730_v27  ;;  %v7724_v9 = vadd.f32 %v7723_v6, %v7559_v41  ;;  %v7577_v47 = vadd.f32 %v10252_v4, %v7392_v28  ;;  %v10290_v6 = vpop.f32.mrf.mxu1  ;;  %v7222_v30 = vadd.f32 %v14833_v35, %v7040_v56 }
 0x61a   : > { %v7570_v53 = vpop.f32.mrf.mxu0 }
 0x61b   : > { %7791 = vst.msk [vmem:[%s13964_s1 + $0x30] sm:$0xff] %vm7784_vm9, %v7724_v9  ;;  %v7742_v36 = vadd.f32 %v10284_v44, %v7577_v47  ;;  %v7571_v2 = vadd.f32 %v7570_v53, %v7384_v40  ;;  %v7052_v44 = vadd.f32 %v14836_v25, %v14835_v29  ;;  %v7759_v17 = vpop.f32.mrf.mxu1  ;;  %v7416_v24 = vadd.f32 %v14840_v13, %v7222_v30 }
 0x61c   : > { %v10255_v31 = vpop.f32.mrf.mxu0 }
 0x61d   : > { %7794 = vst.msk [vmem:[%s13964_s1 + $0x48] sm:$0xff] %vm7784_vm9, %v7742_v36  ;;  %v7736_v46 = vadd.f32 %v7735_v23, %v7571_v2  ;;  %v7589_v55 = vadd.f32 %v10255_v31, %v7408_v37  ;;  %v14839_v23 = vld [vmem:[#allocation134_spill] sm:$0xff]  ;;  %v10293_v63 = vpop.f32.mrf.mxu1 }
 0x61e   : > { %v7582_v42 = vpop.f32.mrf.mxu0  ;;  %v7236_v18 = vadd.f32 %v14839_v23, %v7052_v44 }
 0x61f   : > { %7793 = vst.msk [vmem:[%s13964_s1 + $0x40] sm:$0xff] %vm7784_vm9, %v7736_v46  ;;  %v7754_v59 = vadd.f32 %v10287_v16, %v7589_v55  ;;  %v7583_v21 = vadd.f32 %v7582_v42, %v7400_v45  ;;  %v7771_v48 = vpop.f32.mrf.mxu1 }
 0x620   : > { %v10258_v52 = vpop.f32.mrf.mxu0  ;;  %v7432_v54 = vadd.f32 %v14842_v14, %v7236_v18 }
 0x621   : > { %7796 = vst.msk [vmem:[%s13964_s1 + $0x58] sm:$0xff] %vm7784_vm9, %v7754_v59  ;;  %v7748_v43 = vadd.f32 %v7747_v32, %v7583_v21  ;;  %v7601_v8 = vadd.f32 %v10258_v52, %v7424_v26 }
 0x622   : > { %v7594_v3 = vpop.f32.mrf.mxu0 }
 0x623   : > { %7795 = vst.msk [vmem:[%s13964_s1 + $0x50] sm:$0xff] %vm7784_vm9, %v7748_v43  ;;  %v7766_v15 = vadd.f32 %v10290_v6, %v7601_v8  ;;  %v7595_v20 = vadd.f32 %v7594_v3, %v7416_v24 }
 0x624   : > { %v10261_v38 = vpop.f32.mrf.mxu0 }
 0x625   : > { %7798 = vst.msk [vmem:[%s13964_s1 + $0x68] sm:$0xff] %vm7784_vm9, %v7766_v15  ;;  %v7760_v16 = vadd.f32 %v7759_v17, %v7595_v20  ;;  %v7613_v33 = vadd.f32 %v10261_v38, %v7440_v60 }
 0x626   : > { %v7606_v51 = vpop.f32.mrf.mxu0 }
 0x627   : > { %7797 = vst.msk [vmem:[%s13964_s1 + $0x60] sm:$0xff] %vm7784_vm9, %v7760_v16  ;;  %v7778_v11 = vadd.f32 %v10293_v63, %v7613_v33  ;;  %v7607_v57 = vadd.f32 %v7606_v51, %v7432_v54  ;;  %7831 = sbr.rel (!%p10679_p5) target bundleno = 1621 (0x655), region = 60 }
 0x629   : > { %7800 = vst.msk [vmem:[%s13964_s1 + $0x78] sm:$0xff] %vm7784_vm9, %v7778_v11  ;;  %v7772_v27 = vadd.f32 %v7771_v48, %v7607_v57 }
 0x62b   : > { %7799 = vst.msk [vmem:[%s13964_s1 + $0x70] sm:$0xff] %vm7784_vm9, %v7772_v27 }
 0x62c   : > { %s14852_s3 = smov (!%p7834_p13, %s7833_s3), 16 }
 0x62d   : > { %s8253_s21 = sshll.u32 %s14852_s3, 7 }
 0x62e   : > { %p8256_p0 = scmp.eq.s32.totalorder %s8253_s21, 0 }
 0x62f   : > { %s14051_s28 = sshrl.u32 (!%p8256_p0), %s14852_s3, 4 }
 0x630   : > { %7842 = sbr.rel (%p8256_p0) target bundleno = 1621 (0x655), region = 64  ;;  %p8257_p1 = scmp.le.s32.totalorder (!%p8256_p0), %s14051_s28, 0 }
 0x635   : > { %8134 = sbr.rel (%p8257_p1) target bundleno = 1604 (0x644), region = 179  ;;  %s14843_s25 = smov (!%p8257_p1), %s14045_s20 }
 0x636   : > { %s14844_s29 = smov (!%p8257_p1), %s13964_s1  ;;  %s14060_s27 = smov (!%p8257_p1), 0  }
 0x637   : > { %s14062_s30 = smov (!%p8257_p1), 0  }
 0x63a LB: >> { %v7935_v41 = vld [vmem:[%s10554_s29] sm:$0xff]  ;;  %v7937_v28 = vld [vmem:[%s10554_s29 + $0x8] sm:$0xff]  ;;  %v7939_v34 = vld [vmem:[%s10554_s29 + $0x10] sm:$0xff]  ;;  %s7967_s0 = sadd.s32 1, %s10558_s27  ;;  %s7929_s30 = sadd.s32 1, %s10562_s30   ;;  %s10562_s30 = sphi %s14062_s30, %s7929_s30   ;;  %s10558_s27 = sphi %s14060_s27, %s14845_s27   ;;  %s10554_s29 = sphi %s14844_s29, %s7972_s29   ;;  %s10550_s25 = sphi %s14843_s25, %s7973_s25  }
 0x63b   : >> { %7936 = vst [vmem:[%s10550_s25] sm:$0xff] %v7935_v41  ;;  %7938 = vst [vmem:[%s10550_s25 + $0x8] sm:$0xff] %v7937_v28  ;;  %v7941_v32 = vld [vmem:[%s10554_s29 + $0x18] sm:$0xff]  ;;  %v7943_v4 = vld [vmem:[%s10554_s29 + $0x20] sm:$0xff]  ;;  %p7968_p2 = scmp.ge.s32.totalorder %s7967_s0, %s14051_s28  ;;  %p7928_p3 = scmp.ge.s32.totalorder %s7929_s30, %s14051_s28 }
 0x63c   : >> { %7940 = vst [vmem:[%s10550_s25 + $0x10] sm:$0xff] %v7939_v34  ;;  %v7945_v39 = vld [vmem:[%s10554_s29 + $0x28] sm:$0xff]  ;;  %7942 = vst [vmem:[%s10550_s25 + $0x18] sm:$0xff] %v7941_v32  ;;  %v7947_v9 = vld [vmem:[%s10554_s29 + $0x30] sm:$0xff] }
 0x63d   : >> { %7944 = vst [vmem:[%s10550_s25 + $0x20] sm:$0xff] %v7943_v4  ;;  %7946 = vst [vmem:[%s10550_s25 + $0x28] sm:$0xff] %v7945_v39  ;;  %v7949_v47 = vld [vmem:[%s10554_s29 + $0x38] sm:$0xff]  ;;  %v7951_v40 = vld [vmem:[%s10554_s29 + $0x40] sm:$0xff]  ;;  %s14854_s0 = smov (%p7968_p2, %s7967_s0), 0 }
 0x63e   : >> { %7948 = vst [vmem:[%s10550_s25 + $0x30] sm:$0xff] %v7947_v9  ;;  %7950 = vst [vmem:[%s10550_s25 + $0x38] sm:$0xff] %v7949_v47  ;;  %v7953_v61 = vld [vmem:[%s10554_s29 + $0x48] sm:$0xff]  ;;  %v7955_v7 = vld [vmem:[%s10554_s29 + $0x50] sm:$0xff]  ;;  %s8258_s4 = sshll.u32 %s14854_s0, 7  ;;  %s14845_s27 = smov %s14854_s0 }
 0x63f   : >> { %7952 = vst [vmem:[%s10550_s25 + $0x40] sm:$0xff] %v7951_v40  ;;  %v7957_v56 = vld [vmem:[%s10554_s29 + $0x58] sm:$0xff]  ;;  %7954 = vst [vmem:[%s10550_s25 + $0x48] sm:$0xff] %v7953_v61  ;;  %v7959_v53 = vld [vmem:[%s10554_s29 + $0x60] sm:$0xff]  ;;  %7931 = sbr.rel (!%p7928_p3) target bundleno = 1594 (0x63a), region = 185 }
 0x640   : >> { %7956 = vst [vmem:[%s10550_s25 + $0x50] sm:$0xff] %v7955_v7  ;;  %7958 = vst [vmem:[%s10550_s25 + $0x58] sm:$0xff] %v7957_v56  ;;  %v7961_v12 = vld [vmem:[%s10554_s29 + $0x68] sm:$0xff]  ;;  %v7963_v10 = vld [vmem:[%s10554_s29 + $0x70] sm:$0xff] }
 0x641   : >> { %7960 = vst [vmem:[%s10550_s25 + $0x60] sm:$0xff] %v7959_v53  ;;  %7962 = vst [vmem:[%s10550_s25 + $0x68] sm:$0xff] %v7961_v12  ;;  %v7965_v36 = vld [vmem:[%s10554_s29 + $0x78] sm:$0xff]  ;;  %s7972_s29 = scalar_lea.vmem %s13964_s1, %s8258_s4 [#allocation4]  }
 0x642   : >> { %7964 = vst [vmem:[%s10550_s25 + $0x70] sm:$0xff] %v7963_v10  ;;  %7966 = vst [vmem:[%s10550_s25 + $0x78] sm:$0xff] %v7965_v36  ;;  %s7973_s25 = scalar_lea.vmem %s14045_s20, %s8258_s4  }
 0x644 PF: > { %s14120_s11 = sand.u32 15, %s14852_s3   ;;  %s8270_s18 = sshll.u32 %s14051_s28, 7 }
 0x645   : > { %s7978_s21 = scalar_lea.vmem %s13964_s1, %s8270_s18 [#allocation4]   ;;  %s7980_s4 = scalar_lea.vmem %s14045_s20, %s8270_s18  }
 0x646   : > { %p8263_p4 = scmp.le.s32.totalorder %s14120_s11, 0 }
 0x647   : > { %s10564_s2 = smov (!%p8263_p4), %s7980_s4   ;;  %s10568_s5 = smov (!%p8263_p4), %s7978_s21  }
 0x648   : > { %8148 = sbr.rel (%p8263_p4) target bundleno = 1621 (0x655), region = 190  ;;  %s10572_s6 = smov (!%p8263_p4), 0  }
 0x649   : > { %s10576_s0 = smov (!%p8263_p4), 0  }
 0x64d LB: >> { %v7990_v2 = vld [vmem:[%s10570_s5] sm:$0xff]  ;;  %s7992_s3 = sadd.s32 1, %s10574_s6  ;;  %s7984_s0 = sadd.s32 1, %s10578_s0   ;;  %s10578_s0 = sphi %s10576_s0, %s7984_s0   ;;  %s10574_s6 = sphi %s10572_s6, %s10573_s6   ;;  %s10570_s5 = sphi %s10568_s5, %s7997_s5   ;;  %s10566_s2 = sphi %s10564_s2, %s7998_s2  }
 0x64e   : >> { %7991 = vst [vmem:[%s10566_s2] sm:$0xff] %v7990_v2  ;;  %p7993_p7 = scmp.ge.s32.totalorder %s7992_s3, %s14120_s11  ;;  %p7983_p8 = scmp.ge.s32.totalorder %s7984_s0, %s14120_s11 }
 0x650   : >> { %s14856_s3 = smov (%p7993_p7, %s7992_s3), 0  ;;  %7986 = sbr.rel (!%p7983_p8) target bundleno = 1613 (0x64d), region = 196 }
 0x651   : >> { %s8264_s1 = sshll.u32 %s14856_s3, 3  ;;  %s10573_s6 = smov %s14856_s3  }
 0x652   : >> { %s7997_s5 = scalar_lea.vmem %s7978_s21, %s8264_s1 [#allocation4]   ;;  %s7998_s2 = scalar_lea.vmem %s7980_s4, %s8264_s1  }
 0x655 PF: > { %s8266_s6 = sshll.u32 %s10662_s17, 7  ;;  %s8011_s20 = sshll.u32 %s12947_s26, 4  ;;  %s8012_s20 = int_to_ptr.vmem [resolvable:$true] %s8011_s20 }
 0x656   : > { %s8009_s29 = scalar_lea.hbm %s14174_s10, %s8266_s6  ;;  %s10450_s27 = scalar_lea.vmem %s8012_s20, 128 }
 0x657   : > { %p10451_p9 = scmp.ne.s32.totalorder %s8012_s20, %s10450_s27  ;;  %s10585_s5 = smov [#allocation5]  }
 0x658   : > { %s10454_s2 = sshll.u32 %s10585_s5, 4  ;;  %s10455_s2 = int_to_ptr.vmem [resolvable:$false] %s10454_s2 }
 0x659   : > { %p10452_p10 = pnand %p10451_p9, %p10679_p5  ;;  %s10456_s30 = scalar_lea.vmem %s10455_s2, 256 }
 0x65a   : > { %p10457_p12 = scmp.lt.s32.totalorder %s8012_s20, %s10455_s2  ;;  %p10458_p13 = scmp.lt.s32.totalorder %s10456_s30, %s10450_s27 }
 0x65b   : > { %p10453_p11 = pneg %p10452_p10 }
 0x65c   : > { %p10459_p0 = por %p10458_p13, %p10457_p12 }
 0x65e   : > { %p10460_p1 = pnand %p10459_p0, %p10453_p11 }
 0x660   : > { %10463 = shalt.err (!%p10460_p1)
}
 0x661   : > { %s10464_s17 = scalar_lea.hbm %s8009_s29, 128  ;;  %s10468_s18 = scalar_lea.hbm %s14174_s10, 384 }
 0x662   : > { %p10465_p2 = scmp.ne.s32.totalorder %s8009_s29, %s10464_s17  ;;  %p10469_p7 = scmp.lt.s32.totalorder %s8009_s29, %s14174_s10 }
 0x663   : > { %p10470_p8 = scmp.lt.s32.totalorder %s10468_s18, %s10464_s17 }
 0x664   : > { %p10466_p3 = pnand %p10465_p2, %p10679_p5 }
 0x665   : > { %p10471_p9 = por %p10470_p8, %p10469_p7 }
 0x666   : > { %p10467_p4 = pneg %p10466_p3 }
 0x668   : > { %p10472_p10 = pnand %p10471_p9, %p10467_p4 }
 0x66a   : > { %10475 = shalt.err (!%p10472_p10)
}
 0x66b   : > { %s14846_s0 = scalar_lea.sflag [#allocation6], %s12707_s12 }
 0x66c   : > { %10295 = dma.vmem_to_hbm [thread:$0]  (%p10679_p5), %s8012_s20, 128, %s8009_s29, %s14846_s0  }
 0x66d PF: > { %p10305_p11 = scmp.ge.s32.totalorder %s10546_s16, 2  ;;  %s8023_s3 = sand.u32 1, %s10534_s13  }
 0x66e   : > { %s8024_s1 = scalar_lea.sflag [#allocation3], %s8023_s3 }
 0x66f   : > { %p10299_p12 = pnand %p10305_p11, %p10683_p6 }
 0x671   : > { %p10300_p13 = pneg %p10299_p12 }
 0x673   : > { %10525 = dma.done.wait (%p10300_p13), %s8024_s1, 32  }
 0x674   : > { %10527 = vsyncadd (%p10300_p13), %s8024_s1, 4294967264  ;;  %s8040_s6 = scalar_lea.sflag [#allocation6], %s8023_s3 }
 0x675   : > { %10529 = dma.done.wait (%p10300_p13), %s8040_s6, 128  }
 0x676   : > { %10531 = vsyncadd (%p10300_p13), %s8040_s6, 4294967168  ;;  %p24_p5 = scmp.ge.s32.totalorder %s10666_s19, 5   ;;  %s14847_s13 = smov %s10538_s14 }
 0x677   : > { %s14848_s14 = smov %s10542_s15  ;;  %s14849_s15 = smov %s10677_s22 }
 0x678   : > { %s14850_s16 = smov %s10666_s19  ;;  %26 = sbr.rel (!%p24_p5) target bundleno = 13 (0xd), region = 207 }
 0x67d   :  { %8045 = vsyncpa [#allocation3], 1 }
 0x67e   :  { %8047 = vsyncpa [#allocation3 + $0x1], 1 }
 0x67f   :  { %8048 = vsyncpa [#allocation6], 1 }
 0x680   :  { %8050 = vsyncpa [#allocation6 + $0x1], 1 }

</bundles_post_ra>
